<compile_context>
chip_gen: v7x
topology: tpu7x:2x2x1
jax: 0.10.0
libtpu: 0.0.40
codegen_flags: <defaults>
</compile_context>

<pallas_src>
import functools
import math

import jax
import jax.numpy as jnp
from jax import lax
from jax.experimental import pallas as pl
from jax.experimental.pallas import tpu as pltpu

LANE = 128


def _round_up(x, m):
    return (x + m - 1) // m * m


# ----------------------------------------------------------------------------
# Fused kernel: dilated KxK conv (BN folded into W / bias) + bias + ReLU.
# One grid step = (batch element, output-row tile).  Input rows (with halo)
# are manually double-buffered from HBM.
# ----------------------------------------------------------------------------
def _aspp_kernel(x_hbm, w_ref, b_ref, o_ref, xbuf, sem, acc_ref, *,
                 ksize, dilation, th, wo_pad, rows, rows_alloc):
    # x_hbm  : (N, Hp, Wp, Cin_p) bf16, raw HBM ref (memory_space=pl.ANY)
    # w_ref  : (K*K, Cin_p, Cout_p) bf16, whole array resident in VMEM
    # b_ref  : (1, Cout_p) f32, whole array resident in VMEM
    # o_ref  : (1, TH, Wo_p, Cout_p) output row tile (bf16)
    # xbuf   : VMEM (2*rows_alloc, Wp, Cin_p) bf16 -- two halo-row buffers
    # sem    : DMA semaphores, shape (2,)
    # acc_ref: VMEM (TH*Wo_p, Cout_p) f32 accumulator
    i = pl.program_id(0)
    r = pl.program_id(1)
    nr = pl.num_programs(1)

    slot = r % 2
    cin_p = x_hbm.shape[-1]
    cout_p = o_ref.shape[-1]

    def halo_copy(batch_idx, tile_idx, sl):
        row0 = pl.multiple_of(tile_idx * th, 8)          # th is a multiple of 8
        dst0 = pl.multiple_of(sl * rows_alloc, 8)        # rows_alloc multiple of 8
        return pltpu.make_async_copy(
            x_hbm.at[batch_idx, pl.ds(row0, rows), :, :],
            xbuf.at[pl.ds(dst0, rows), :, :],
            sem.at[sl])

    # Prime the pipeline once per batch element.  Each batch element is
    # self-contained DMA-wise, so the batch axis is safely "parallel".
    @pl.when(r == 0)
    def _():
        halo_copy(i, r, slot).start()

    # Wait for this tile's halo rows.
    halo_copy(i, r, slot).wait()

    # Prefetch the next row tile of the same batch element while we compute.
    @pl.when(r + 1 < nr)
    def _():
        halo_copy(i, r + 1, 1 - slot).start()

    # K*K shifted-tap matmuls on the MXU, accumulating into VMEM scratch.
    acc_ref[...] = jnp.zeros_like(acc_ref)
    base = pl.multiple_of(slot * rows_alloc, 8)
    for kh in range(ksize):
        for kw in range(ksize):
            tap = xbuf[pl.ds(base + kh * dilation, th),
                       pl.ds(kw * dilation, wo_pad), :]          # (TH, Wo_p, Cin_p)
            acc_ref[...] += jnp.dot(
                tap.reshape(th * wo_pad, cin_p),
                w_ref[kh * ksize + kw],
                preferred_element_type=jnp.float32)

    # Folded-BN bias + ReLU, emit bf16.
    z = jnp.maximum(acc_ref[...] + b_ref[...], 0.0)
    o_ref[0] = z.reshape(th, wo_pad, cout_p).astype(o_ref.dtype)


# ----------------------------------------------------------------------------
# Parameter construction: mirrors _ASPPModule.__init__ / _init_weight and
# folds the (eval-mode) BatchNorm into the conv weights / bias.
# ----------------------------------------------------------------------------
def init_aspp_params(key, inplanes, planes, kernel_size, padding, dilation,
                     eps=1e-5):
    # Conv2d weight: kaiming_normal_ (fan_in, gain=sqrt(2)), bias=False.
    fan_in = inplanes * kernel_size * kernel_size
    w = math.sqrt(2.0 / fan_in) * jax.random.normal(
        key, (kernel_size, kernel_size, inplanes, planes), jnp.float32)

    # BatchNorm as initialised by _init_weight (gamma=1, beta=0) with default
    # running stats (mean=0, var=1), evaluated in eval mode and folded.
    gamma = jnp.ones((planes,), jnp.float32)
    beta = jnp.zeros((planes,), jnp.float32)
    mean = jnp.zeros((planes,), jnp.float32)
    var = jnp.ones((planes,), jnp.float32)
    scale = gamma * jax.lax.rsqrt(var + eps)
    shift = beta - mean * scale

    w_folded = w * scale[None, None, None, :]

    # Zero-pad channels to lane multiples (128) so loads/stores are lane-dense.
    cin_p = _round_up(inplanes, LANE)
    cout_p = _round_up(planes, LANE)
    w_p = jnp.zeros((kernel_size, kernel_size, cin_p, cout_p), jnp.float32)
    w_p = w_p.at[:, :, :inplanes, :planes].set(w_folded)
    b_p = jnp.zeros((1, cout_p), jnp.float32).at[0, :planes].set(shift)

    return dict(
        w_folded=w_p.reshape(kernel_size * kernel_size, cin_p, cout_p
                             ).astype(jnp.bfloat16),
        b_folded=b_p,
        ksize=kernel_size, dilation=dilation, padding=padding,
        inplanes=inplanes, planes=planes,
    )


# ----------------------------------------------------------------------------
# Forward pass (NCHW in / NCHW out, like the PyTorch module).
# ----------------------------------------------------------------------------
def aspp_forward(x_nchw, params, *, out_dtype=jnp.bfloat16, row_tile=None):
    k, dil, pad = params["ksize"], params["dilation"], params["padding"]
    cin, cout = params["inplanes"], params["planes"]
    w = params["w_folded"]                       # (K*K, Cin_p, Cout_p) bf16
    b = params["b_folded"]                       # (1, Cout_p) f32
    cin_p, cout_p = w.shape[1], w.shape[2]

    n, c, h, wdt = x_nchw.shape
    assert c == cin

    keff = (k - 1) * dil + 1
    halo = keff - 1
    ho = h + 2 * pad - keff + 1                  # stride == 1
    wo = wdt + 2 * pad - keff + 1
    assert ho > 0 and wo > 0

    # Lane/sublane friendly widths (review: align wo to 8, th*wo_pad >= 256).
    wo_pad = _round_up(wo, 8)
    wp = _round_up(wo_pad + halo, 8)

    # Row tile: multiple of 8; larger for the 1x1 branch (no halo).
    if row_tile is None:
        target = 1024 if k == 1 else 512
        row_tile = max(8, -(-target // wo_pad))
    th = min(_round_up(row_tile, 8), _round_up(ho, 8))
    n_tiles = -(-ho // th)
    ho_pad = n_tiles * th
    hp = ho_pad + halo

    rows = th + halo                             # rows DMAed per tile
    rows_alloc = _round_up(rows, 8)              # slot stride (sublane aligned)

    # NCHW -> NHWC, cast to bf16 ONCE, single pad:
    # 'same' spatial padding + extra bottom rows / right cols + lane padding.
    x = jnp.transpose(x_nchw, (0, 2, 3, 1)).astype(jnp.bfloat16)
    x = jnp.pad(x, ((0, 0),
                    (pad, hp - h - pad),
                    (pad, wp - wdt - pad),
                    (0, cin_p - cin)))

    # Explicit VMEM budget: x halo double buffer + f32 accumulator + single
    # weight/bias copies + pipelined output blocks + compiler headroom,
    # capped below the physical VMEM of this TPU generation.
    est = (2 * rows_alloc * wp * cin_p * 2        # manual x double buffer (bf16)
           + th * wo_pad * cout_p * 4             # f32 accumulator
           + k * k * cin_p * cout_p * 2           # weights, one copy (bf16)
           + 8 * cout_p * 4                       # bias
           + 2 * th * wo_pad * cout_p * 2         # output double buffer (bf16)
           + (4 << 20))                           # internal-scratch headroom
    try:
        phys = int(pltpu.get_tpu_info().vmem_capacity_bytes)
    except Exception:
        phys = 128 * 1024 * 1024
    vmem_limit = int(min(max(est, 32 << 20), int(phys * 0.85)))

    kernel = functools.partial(_aspp_kernel, ksize=k, dilation=dil, th=th,
                               wo_pad=wo_pad, rows=rows, rows_alloc=rows_alloc)

    out = pl.pallas_call(
        kernel,
        out_shape=jax.ShapeDtypeStruct((n, ho_pad, wo_pad, cout_p), out_dtype),
        grid=(n, n_tiles),
        in_specs=[
            pl.BlockSpec(memory_space=pl.ANY),                   # x stays in HBM
            pl.BlockSpec(memory_space=pltpu.MemorySpace.VMEM),   # weights, 1 copy
            pl.BlockSpec(memory_space=pltpu.MemorySpace.VMEM),   # bias, 1 copy
        ],
        out_specs=pl.BlockSpec((1, th, wo_pad, cout_p),
                               lambda i, r: (i, r, 0, 0)),
        scratch_shapes=[
            pltpu.VMEM((2 * rows_alloc, wp, cin_p), jnp.bfloat16),  # halo rows x2
            pltpu.SemaphoreType.DMA((2,)),
            pltpu.VMEM((th * wo_pad, cout_p), jnp.float32),         # accumulator
        ],
        compiler_params=pltpu.CompilerParams(
            dimension_semantics=("parallel", "arbitrary"),
            vmem_limit_bytes=vmem_limit),
    )(x, w, b)

    out = out[:, :ho, :wo, :cout]                # drop row / col / lane padding
    return jnp.transpose(out, (0, 3, 1, 2))      # back to NCHW (bf16)


# ----------------------------------------------------------------------------
# Pure-JAX reference (same folded params, same bf16 operand quantization).
# ----------------------------------------------------------------------------
def _aspp_ref(x_nchw, params):
    k, dil, pad = params["ksize"], params["dilation"], params["padding"]
    cin, cout = params["inplanes"], params["planes"]
    wq = params["w_folded"].astype(jnp.float32).reshape(
        k, k, params["w_folded"].shape[1], params["w_folded"].shape[2])
    wq = wq[:, :, :cin, :cout]                   # HWIO
    bq = params["b_folded"][0, :cout]
    xq = x_nchw.astype(jnp.bfloat16).astype(jnp.float32)
    y = jax.lax.conv_general_dilated(
        xq, wq, window_strides=(1, 1),
        padding=[(pad, pad), (pad, pad)], rhs_dilation=(dil, dil),
        dimension_numbers=("NCHW", "HWIO", "NCHW"))
    return jnp.maximum(y + bq[None, :, None, None], 0.0)


if __name__ == "__main__":
    key = jax.random.PRNGKey(0)
    k1, k2, kx, kx2 = jax.random.split(key, 4)

    x = jax.random.normal(kx, (2, 4, 16, 16), jnp.float32)       # NCHW

    # 3x3 atrous branch: kernel_size=3, padding=dilation=2.
    p3 = init_aspp_params(k1, inplanes=4, planes=8, kernel_size=3,
                          padding=2, dilation=2)
    y3 = jax.block_until_ready(aspp_forward(x, p3))
    assert y3.shape == (2, 8, 16, 16), y3.shape
    y3f = y3.astype(jnp.float32)
    assert bool(jnp.all(jnp.isfinite(y3f)))
    assert bool(jnp.all(y3f >= 0.0))                             # ReLU
    assert bool(jnp.allclose(y3f, _aspp_ref(x, p3), atol=5e-2, rtol=5e-2))

    # 1x1 branch: kernel_size=1, padding=0, dilation=1 (large-tile path).
    p1 = init_aspp_params(k2, inplanes=4, planes=8, kernel_size=1,
                          padding=0, dilation=1)
    y1 = jax.block_until_ready(aspp_forward(x, p1))
    assert y1.shape == (2, 8, 16, 16), y1.shape
    assert bool(jnp.allclose(y1.astype(jnp.float32), _aspp_ref(x, p1),
                             atol=5e-2, rtol=5e-2))

    # Larger image with 2 row tiles per batch element: exercises the manual
    # halo-row DMA double buffering across grid steps.
    x2 = jax.random.normal(kx2, (2, 4, 32, 32), jnp.float32)
    y2 = jax.block_until_ready(aspp_forward(x2, p3, row_tile=16))
    assert y2.shape == (2, 8, 32, 32), y2.shape
    assert bool(jnp.allclose(y2.astype(jnp.float32), _aspp_ref(x2, p3),
                             atol=5e-2, rtol=5e-2))

    print("KERNEL_OK")
</pallas_src>

<mosaic_0001>
module attributes {stable_mosaic.version = 11 : i64} {
  func.func @_aspp_kernel(%arg0: i32, %arg1: i32, %arg2: memref<2x20x24x128xbf16, #tpu.memory_space<any>>, %arg3: memref<9x128x128xbf16, #tpu.memory_space<vmem>>, %arg4: memref<1x128xf32, #tpu.memory_space<vmem>>, %arg5: memref<1x16x16x128xbf16, #tpu.memory_space<vmem>>, %arg6: memref<48x24x128xbf16, #tpu.memory_space<vmem>>, %arg7: memref<2x!tpu.dma_semaphore, #tpu.memory_space<semaphore_mem>>, %arg8: memref<256x128xf32, #tpu.memory_space<vmem>>) attributes {dimension_semantics = [#tpu.dimension_semantics<parallel>, #tpu.dimension_semantics<arbitrary>], iteration_bounds = array<i64: 2, 1>, scalar_prefetch = 0 : i64, scratch_operands = 3 : i64, tpu.core_type = #tpu.core_type<tc>, window_params = [{}, {pipeline_mode = #tpu.pipeline_mode<synchronous>, transform_indices = @transform_1, window_bounds = array<i64: 9, 128, 128>}, {pipeline_mode = #tpu.pipeline_mode<synchronous>, transform_indices = @transform_2, window_bounds = array<i64: 1, 128>}, {transform_indices = @transform_3, window_bounds = array<i64: 1, 16, 16, 128>}]} {
    %c2_i32 = arith.constant 2 : i32
    %c0_i32 = arith.constant 0 : i32
    %0 = arith.cmpi eq, %c2_i32, %c0_i32 : i32
    %c1_i32 = arith.constant 1 : i32
    %1 = arith.select %0, %c1_i32, %c2_i32 : i32
    %2 = arith.remsi %arg1, %1 : i32
    %c0_i32_0 = arith.constant 0 : i32
    %3 = arith.cmpi ne, %2, %c0_i32_0 : i32
    %c0_i32_1 = arith.constant 0 : i32
    %4 = arith.cmpi slt, %2, %c0_i32_1 : i32
    %c0_i32_2 = arith.constant 0 : i32
    %5 = arith.cmpi slt, %1, %c0_i32_2 : i32
    %6 = arith.xori %4, %5 : i1
    %7 = arith.andi %6, %3 : i1
    %8 = arith.addi %2, %1 : i32
    %9 = arith.select %7, %8, %2 : i32
    %c0_i32_3 = arith.constant 0 : i32
    %10 = arith.cmpi eq, %arg1, %c0_i32_3 : i32
    %11 = arith.extui %10 : i1 to i32
    %c0_i32_4 = arith.constant 0 : i32
    %12 = arith.cmpi ne, %11, %c0_i32_4 : i32
    scf.if %12 {
      %c16_i32_113 = arith.constant 16 : i32
      %131 = arith.muli %arg1, %c16_i32_113 : i32
      %132 = tpu.assume_multiple %131, 8 : i32
      %c24_i32_114 = arith.constant 24 : i32
      %133 = arith.muli %9, %c24_i32_114 : i32
      %134 = tpu.assume_multiple %133, 8 : i32
      %c0_i32_115 = arith.constant 0 : i32
      %c0_i32_116 = arith.constant 0 : i32
      %135 = tpu.memref_slice %arg2[%arg0, %132, %c0_i32_115, %c0_i32_116] : memref<2x20x24x128xbf16, #tpu.memory_space<any>> -> memref<1x20x24x128xbf16, #tpu.memory_space<any>>
      %136 = tpu.memref_squeeze %135 : memref<1x20x24x128xbf16, #tpu.memory_space<any>> -> memref<20x24x128xbf16, #tpu.memory_space<any>>
      %c0_i32_117 = arith.constant 0 : i32
      %c0_i32_118 = arith.constant 0 : i32
      %137 = tpu.memref_slice %arg6[%134, %c0_i32_117, %c0_i32_118] : memref<48x24x128xbf16, #tpu.memory_space<vmem>> -> memref<20x24x128xbf16, #tpu.memory_space<vmem>>
      %138 = tpu.memref_slice %arg7[%9] : memref<2x!tpu.dma_semaphore, #tpu.memory_space<semaphore_mem>> -> memref<1x!tpu.dma_semaphore, #tpu.memory_space<semaphore_mem>>
      %139 = tpu.memref_squeeze %138 : memref<1x!tpu.dma_semaphore, #tpu.memory_space<semaphore_mem>> -> memref<!tpu.dma_semaphore, #tpu.memory_space<semaphore_mem>>
      tpu.enqueue_dma source(%136 : memref<20x24x128xbf16, #tpu.memory_space<any>>) target(%137 : memref<20x24x128xbf16, #tpu.memory_space<vmem>>) target_semaphore(%139 : memref<!tpu.dma_semaphore, #tpu.memory_space<semaphore_mem>>)
    } else {
    }
    %c16_i32 = arith.constant 16 : i32
    %13 = arith.muli %arg1, %c16_i32 : i32
    %14 = tpu.assume_multiple %13, 8 : i32
    %c24_i32 = arith.constant 24 : i32
    %15 = arith.muli %9, %c24_i32 : i32
    %16 = tpu.assume_multiple %15, 8 : i32
    %c0_i32_5 = arith.constant 0 : i32
    %c0_i32_6 = arith.constant 0 : i32
    %17 = tpu.memref_slice %arg2[%arg0, %14, %c0_i32_5, %c0_i32_6] : memref<2x20x24x128xbf16, #tpu.memory_space<any>> -> memref<1x20x24x128xbf16, #tpu.memory_space<any>>
    %18 = tpu.memref_squeeze %17 : memref<1x20x24x128xbf16, #tpu.memory_space<any>> -> memref<20x24x128xbf16, #tpu.memory_space<any>>
    %c0_i32_7 = arith.constant 0 : i32
    %c0_i32_8 = arith.constant 0 : i32
    %19 = tpu.memref_slice %arg6[%16, %c0_i32_7, %c0_i32_8] : memref<48x24x128xbf16, #tpu.memory_space<vmem>> -> memref<20x24x128xbf16, #tpu.memory_space<vmem>>
    %20 = tpu.memref_slice %arg7[%9] : memref<2x!tpu.dma_semaphore, #tpu.memory_space<semaphore_mem>> -> memref<1x!tpu.dma_semaphore, #tpu.memory_space<semaphore_mem>>
    %21 = tpu.memref_squeeze %20 : memref<1x!tpu.dma_semaphore, #tpu.memory_space<semaphore_mem>> -> memref<!tpu.dma_semaphore, #tpu.memory_space<semaphore_mem>>
    tpu.wait_dma2 semaphore(%21 : memref<!tpu.dma_semaphore, #tpu.memory_space<semaphore_mem>>) src(%18 : memref<20x24x128xbf16, #tpu.memory_space<any>>) dst(%19 : memref<20x24x128xbf16, #tpu.memory_space<vmem>>)
    %c1_i32_9 = arith.constant 1 : i32
    %22 = arith.addi %arg1, %c1_i32_9 : i32
    %c1_i32_10 = arith.constant 1 : i32
    %23 = arith.cmpi slt, %22, %c1_i32_10 : i32
    %24 = arith.extui %23 : i1 to i32
    %c0_i32_11 = arith.constant 0 : i32
    %25 = arith.cmpi ne, %24, %c0_i32_11 : i32
    scf.if %25 {
      %c1_i32_113 = arith.constant 1 : i32
      %131 = arith.addi %arg1, %c1_i32_113 : i32
      %c1_i32_114 = arith.constant 1 : i32
      %132 = arith.subi %c1_i32_114, %9 : i32
      %c16_i32_115 = arith.constant 16 : i32
      %133 = arith.muli %131, %c16_i32_115 : i32
      %134 = tpu.assume_multiple %133, 8 : i32
      %c24_i32_116 = arith.constant 24 : i32
      %135 = arith.muli %132, %c24_i32_116 : i32
      %136 = tpu.assume_multiple %135, 8 : i32
      %c0_i32_117 = arith.constant 0 : i32
      %c0_i32_118 = arith.constant 0 : i32
      %137 = tpu.memref_slice %arg2[%arg0, %134, %c0_i32_117, %c0_i32_118] : memref<2x20x24x128xbf16, #tpu.memory_space<any>> -> memref<1x20x24x128xbf16, #tpu.memory_space<any>>
      %138 = tpu.memref_squeeze %137 : memref<1x20x24x128xbf16, #tpu.memory_space<any>> -> memref<20x24x128xbf16, #tpu.memory_space<any>>
      %c0_i32_119 = arith.constant 0 : i32
      %c0_i32_120 = arith.constant 0 : i32
      %139 = tpu.memref_slice %arg6[%136, %c0_i32_119, %c0_i32_120] : memref<48x24x128xbf16, #tpu.memory_space<vmem>> -> memref<20x24x128xbf16, #tpu.memory_space<vmem>>
      %140 = tpu.memref_slice %arg7[%132] : memref<2x!tpu.dma_semaphore, #tpu.memory_space<semaphore_mem>> -> memref<1x!tpu.dma_semaphore, #tpu.memory_space<semaphore_mem>>
      %141 = tpu.memref_squeeze %140 : memref<1x!tpu.dma_semaphore, #tpu.memory_space<semaphore_mem>> -> memref<!tpu.dma_semaphore, #tpu.memory_space<semaphore_mem>>
      tpu.enqueue_dma source(%138 : memref<20x24x128xbf16, #tpu.memory_space<any>>) target(%139 : memref<20x24x128xbf16, #tpu.memory_space<vmem>>) target_semaphore(%141 : memref<!tpu.dma_semaphore, #tpu.memory_space<semaphore_mem>>)
    } else {
    }
    %cst = arith.constant 0.000000e+00 : f32
    %26 = vector.broadcast %cst : f32 to vector<256x128xf32>
    %c0 = arith.constant 0 : index
    %c0_12 = arith.constant 0 : index
    %27 = vector.load %arg8[%c0, %c0_12] : memref<256x128xf32, #tpu.memory_space<vmem>>, vector<256x128xf32>
    tpu.vector_store %arg8[%c0, %c0_12], %26 {strides = array<i32>} : memref<256x128xf32, #tpu.memory_space<vmem>>, vector<256x128xf32>,
    %c24_i32_13 = arith.constant 24 : i32
    %28 = arith.muli %9, %c24_i32_13 : i32
    %29 = tpu.assume_multiple %28, 8 : i32
    %c0_i32_14 = arith.constant 0 : i32
    %30 = arith.addi %29, %c0_i32_14 : i32
    %31 = arith.index_cast %30 : i32 to index
    %c0_15 = arith.constant 0 : index
    %c0_16 = arith.constant 0 : index
    %32 = vector.load %arg6[%31, %c0_15, %c0_16] : memref<48x24x128xbf16, #tpu.memory_space<vmem>>, vector<16x16x128xbf16>
    %c0_17 = arith.constant 0 : index
    %c0_18 = arith.constant 0 : index
    %33 = vector.load %arg8[%c0_17, %c0_18] : memref<256x128xf32, #tpu.memory_space<vmem>>, vector<256x128xf32>
    %34 = vector.shape_cast %32 : vector<16x16x128xbf16> to vector<256x128xbf16>
    %c0_19 = arith.constant 0 : index
    %c0_20 = arith.constant 0 : index
    %c0_21 = arith.constant 0 : index
    %35 = vector.load %arg3[%c0_19, %c0_20, %c0_21] : memref<9x128x128xbf16, #tpu.memory_space<vmem>>, vector<1x128x128xbf16>
    %36 = vector.shape_cast %35 : vector<1x128x128xbf16> to vector<128x128xbf16>
    %cst_22 = arith.constant dense<0.000000e+00> : vector<256x128xf32>
    %37 = tpu.matmul %34, %36, %cst_22 {dimension_numbers = #tpu.dot_dimension_numbers<[1], [0], [0], [1], [0, 0, 1, 1], [], []>} : vector<256x128xbf16>, vector<128x128xbf16>, vector<256x128xf32> -> vector<256x128xf32>
    %38 = arith.addf %33, %37 : vector<256x128xf32>
    %c0_23 = arith.constant 0 : index
    %c0_24 = arith.constant 0 : index
    %39 = vector.load %arg8[%c0_23, %c0_24] : memref<256x128xf32, #tpu.memory_space<vmem>>, vector<256x128xf32>
    tpu.vector_store %arg8[%c0_23, %c0_24], %38 {strides = array<i32>} : memref<256x128xf32, #tpu.memory_space<vmem>>, vector<256x128xf32>,
    %c0_i32_25 = arith.constant 0 : i32
    %40 = arith.addi %29, %c0_i32_25 : i32
    %41 = arith.index_cast %40 : i32 to index
    %c2 = arith.constant 2 : index
    %c0_26 = arith.constant 0 : index
    %42 = vector.load %arg6[%41, %c2, %c0_26] : memref<48x24x128xbf16, #tpu.memory_space<vmem>>, vector<16x16x128xbf16>
    %c0_27 = arith.constant 0 : index
    %c0_28 = arith.constant 0 : index
    %43 = vector.load %arg8[%c0_27, %c0_28] : memref<256x128xf32, #tpu.memory_space<vmem>>, vector<256x128xf32>
    %44 = vector.shape_cast %42 : vector<16x16x128xbf16> to vector<256x128xbf16>
    %c1 = arith.constant 1 : index
    %c0_29 = arith.constant 0 : index
    %c0_30 = arith.constant 0 : index
    %45 = vector.load %arg3[%c1, %c0_29, %c0_30] : memref<9x128x128xbf16, #tpu.memory_space<vmem>>, vector<1x128x128xbf16>
    %46 = vector.shape_cast %45 : vector<1x128x128xbf16> to vector<128x128xbf16>
    %cst_31 = arith.constant dense<0.000000e+00> : vector<256x128xf32>
    %47 = tpu.matmul %44, %46, %cst_31 {dimension_numbers = #tpu.dot_dimension_numbers<[1], [0], [0], [1], [0, 0, 1, 1], [], []>} : vector<256x128xbf16>, vector<128x128xbf16>, vector<256x128xf32> -> vector<256x128xf32>
    %48 = arith.addf %43, %47 : vector<256x128xf32>
    %c0_32 = arith.constant 0 : index
    %c0_33 = arith.constant 0 : index
    %49 = vector.load %arg8[%c0_32, %c0_33] : memref<256x128xf32, #tpu.memory_space<vmem>>, vector<256x128xf32>
    tpu.vector_store %arg8[%c0_32, %c0_33], %48 {strides = array<i32>} : memref<256x128xf32, #tpu.memory_space<vmem>>, vector<256x128xf32>,
    %c0_i32_34 = arith.constant 0 : i32
    %50 = arith.addi %29, %c0_i32_34 : i32
    %51 = arith.index_cast %50 : i32 to index
    %c4 = arith.constant 4 : index
    %c0_35 = arith.constant 0 : index
    %52 = vector.load %arg6[%51, %c4, %c0_35] : memref<48x24x128xbf16, #tpu.memory_space<vmem>>, vector<16x16x128xbf16>
    %c0_36 = arith.constant 0 : index
    %c0_37 = arith.constant 0 : index
    %53 = vector.load %arg8[%c0_36, %c0_37] : memref<256x128xf32, #tpu.memory_space<vmem>>, vector<256x128xf32>
    %54 = vector.shape_cast %52 : vector<16x16x128xbf16> to vector<256x128xbf16>
    %c2_38 = arith.constant 2 : index
    %c0_39 = arith.constant 0 : index
    %c0_40 = arith.constant 0 : index
    %55 = vector.load %arg3[%c2_38, %c0_39, %c0_40] : memref<9x128x128xbf16, #tpu.memory_space<vmem>>, vector<1x128x128xbf16>
    %56 = vector.shape_cast %55 : vector<1x128x128xbf16> to vector<128x128xbf16>
    %cst_41 = arith.constant dense<0.000000e+00> : vector<256x128xf32>
    %57 = tpu.matmul %54, %56, %cst_41 {dimension_numbers = #tpu.dot_dimension_numbers<[1], [0], [0], [1], [0, 0, 1, 1], [], []>} : vector<256x128xbf16>, vector<128x128xbf16>, vector<256x128xf32> -> vector<256x128xf32>
    %58 = arith.addf %53, %57 : vector<256x128xf32>
    %c0_42 = arith.constant 0 : index
    %c0_43 = arith.constant 0 : index
    %59 = vector.load %arg8[%c0_42, %c0_43] : memref<256x128xf32, #tpu.memory_space<vmem>>, vector<256x128xf32>
    tpu.vector_store %arg8[%c0_42, %c0_43], %58 {strides = array<i32>} : memref<256x128xf32, #tpu.memory_space<vmem>>, vector<256x128xf32>,
    %c2_i32_44 = arith.constant 2 : i32
    %60 = arith.addi %29, %c2_i32_44 : i32
    %61 = arith.index_cast %60 : i32 to index
    %c0_45 = arith.constant 0 : index
    %c0_46 = arith.constant 0 : index
    %62 = vector.load %arg6[%61, %c0_45, %c0_46] : memref<48x24x128xbf16, #tpu.memory_space<vmem>>, vector<16x16x128xbf16>
    %c0_47 = arith.constant 0 : index
    %c0_48 = arith.constant 0 : index
    %63 = vector.load %arg8[%c0_47, %c0_48] : memref<256x128xf32, #tpu.memory_space<vmem>>, vector<256x128xf32>
    %64 = vector.shape_cast %62 : vector<16x16x128xbf16> to vector<256x128xbf16>
    %c3 = arith.constant 3 : index
    %c0_49 = arith.constant 0 : index
    %c0_50 = arith.constant 0 : index
    %65 = vector.load %arg3[%c3, %c0_49, %c0_50] : memref<9x128x128xbf16, #tpu.memory_space<vmem>>, vector<1x128x128xbf16>
    %66 = vector.shape_cast %65 : vector<1x128x128xbf16> to vector<128x128xbf16>
    %cst_51 = arith.constant dense<0.000000e+00> : vector<256x128xf32>
    %67 = tpu.matmul %64, %66, %cst_51 {dimension_numbers = #tpu.dot_dimension_numbers<[1], [0], [0], [1], [0, 0, 1, 1], [], []>} : vector<256x128xbf16>, vector<128x128xbf16>, vector<256x128xf32> -> vector<256x128xf32>
    %68 = arith.addf %63, %67 : vector<256x128xf32>
    %c0_52 = arith.constant 0 : index
    %c0_53 = arith.constant 0 : index
    %69 = vector.load %arg8[%c0_52, %c0_53] : memref<256x128xf32, #tpu.memory_space<vmem>>, vector<256x128xf32>
    tpu.vector_store %arg8[%c0_52, %c0_53], %68 {strides = array<i32>} : memref<256x128xf32, #tpu.memory_space<vmem>>, vector<256x128xf32>,
    %c2_i32_54 = arith.constant 2 : i32
    %70 = arith.addi %29, %c2_i32_54 : i32
    %71 = arith.index_cast %70 : i32 to index
    %c2_55 = arith.constant 2 : index
    %c0_56 = arith.constant 0 : index
    %72 = vector.load %arg6[%71, %c2_55, %c0_56] : memref<48x24x128xbf16, #tpu.memory_space<vmem>>, vector<16x16x128xbf16>
    %c0_57 = arith.constant 0 : index
    %c0_58 = arith.constant 0 : index
    %73 = vector.load %arg8[%c0_57, %c0_58] : memref<256x128xf32, #tpu.memory_space<vmem>>, vector<256x128xf32>
    %74 = vector.shape_cast %72 : vector<16x16x128xbf16> to vector<256x128xbf16>
    %c4_59 = arith.constant 4 : index
    %c0_60 = arith.constant 0 : index
    %c0_61 = arith.constant 0 : index
    %75 = vector.load %arg3[%c4_59, %c0_60, %c0_61] : memref<9x128x128xbf16, #tpu.memory_space<vmem>>, vector<1x128x128xbf16>
    %76 = vector.shape_cast %75 : vector<1x128x128xbf16> to vector<128x128xbf16>
    %cst_62 = arith.constant dense<0.000000e+00> : vector<256x128xf32>
    %77 = tpu.matmul %74, %76, %cst_62 {dimension_numbers = #tpu.dot_dimension_numbers<[1], [0], [0], [1], [0, 0, 1, 1], [], []>} : vector<256x128xbf16>, vector<128x128xbf16>, vector<256x128xf32> -> vector<256x128xf32>
    %78 = arith.addf %73, %77 : vector<256x128xf32>
    %c0_63 = arith.constant 0 : index
    %c0_64 = arith.constant 0 : index
    %79 = vector.load %arg8[%c0_63, %c0_64] : memref<256x128xf32, #tpu.memory_space<vmem>>, vector<256x128xf32>
    tpu.vector_store %arg8[%c0_63, %c0_64], %78 {strides = array<i32>} : memref<256x128xf32, #tpu.memory_space<vmem>>, vector<256x128xf32>,
    %c2_i32_65 = arith.constant 2 : i32
    %80 = arith.addi %29, %c2_i32_65 : i32
    %81 = arith.index_cast %80 : i32 to index
    %c4_66 = arith.constant 4 : index
    %c0_67 = arith.constant 0 : index
    %82 = vector.load %arg6[%81, %c4_66, %c0_67] : memref<48x24x128xbf16, #tpu.memory_space<vmem>>, vector<16x16x128xbf16>
    %c0_68 = arith.constant 0 : index
    %c0_69 = arith.constant 0 : index
    %83 = vector.load %arg8[%c0_68, %c0_69] : memref<256x128xf32, #tpu.memory_space<vmem>>, vector<256x128xf32>
    %84 = vector.shape_cast %82 : vector<16x16x128xbf16> to vector<256x128xbf16>
    %c5 = arith.constant 5 : index
    %c0_70 = arith.constant 0 : index
    %c0_71 = arith.constant 0 : index
    %85 = vector.load %arg3[%c5, %c0_70, %c0_71] : memref<9x128x128xbf16, #tpu.memory_space<vmem>>, vector<1x128x128xbf16>
    %86 = vector.shape_cast %85 : vector<1x128x128xbf16> to vector<128x128xbf16>
    %cst_72 = arith.constant dense<0.000000e+00> : vector<256x128xf32>
    %87 = tpu.matmul %84, %86, %cst_72 {dimension_numbers = #tpu.dot_dimension_numbers<[1], [0], [0], [1], [0, 0, 1, 1], [], []>} : vector<256x128xbf16>, vector<128x128xbf16>, vector<256x128xf32> -> vector<256x128xf32>
    %88 = arith.addf %83, %87 : vector<256x128xf32>
    %c0_73 = arith.constant 0 : index
    %c0_74 = arith.constant 0 : index
    %89 = vector.load %arg8[%c0_73, %c0_74] : memref<256x128xf32, #tpu.memory_space<vmem>>, vector<256x128xf32>
    tpu.vector_store %arg8[%c0_73, %c0_74], %88 {strides = array<i32>} : memref<256x128xf32, #tpu.memory_space<vmem>>, vector<256x128xf32>,
    %c4_i32 = arith.constant 4 : i32
    %90 = arith.addi %29, %c4_i32 : i32
    %91 = arith.index_cast %90 : i32 to index
    %c0_75 = arith.constant 0 : index
    %c0_76 = arith.constant 0 : index
    %92 = vector.load %arg6[%91, %c0_75, %c0_76] : memref<48x24x128xbf16, #tpu.memory_space<vmem>>, vector<16x16x128xbf16>
    %c0_77 = arith.constant 0 : index
    %c0_78 = arith.constant 0 : index
    %93 = vector.load %arg8[%c0_77, %c0_78] : memref<256x128xf32, #tpu.memory_space<vmem>>, vector<256x128xf32>
    %94 = vector.shape_cast %92 : vector<16x16x128xbf16> to vector<256x128xbf16>
    %c6 = arith.constant 6 : index
    %c0_79 = arith.constant 0 : index
    %c0_80 = arith.constant 0 : index
    %95 = vector.load %arg3[%c6, %c0_79, %c0_80] : memref<9x128x128xbf16, #tpu.memory_space<vmem>>, vector<1x128x128xbf16>
    %96 = vector.shape_cast %95 : vector<1x128x128xbf16> to vector<128x128xbf16>
    %cst_81 = arith.constant dense<0.000000e+00> : vector<256x128xf32>
    %97 = tpu.matmul %94, %96, %cst_81 {dimension_numbers = #tpu.dot_dimension_numbers<[1], [0], [0], [1], [0, 0, 1, 1], [], []>} : vector<256x128xbf16>, vector<128x128xbf16>, vector<256x128xf32> -> vector<256x128xf32>
    %98 = arith.addf %93, %97 : vector<256x128xf32>
    %c0_82 = arith.constant 0 : index
    %c0_83 = arith.constant 0 : index
    %99 = vector.load %arg8[%c0_82, %c0_83] : memref<256x128xf32, #tpu.memory_space<vmem>>, vector<256x128xf32>
    tpu.vector_store %arg8[%c0_82, %c0_83], %98 {strides = array<i32>} : memref<256x128xf32, #tpu.memory_space<vmem>>, vector<256x128xf32>,
    %c4_i32_84 = arith.constant 4 : i32
    %100 = arith.addi %29, %c4_i32_84 : i32
    %101 = arith.index_cast %100 : i32 to index
    %c2_85 = arith.constant 2 : index
    %c0_86 = arith.constant 0 : index
    %102 = vector.load %arg6[%101, %c2_85, %c0_86] : memref<48x24x128xbf16, #tpu.memory_space<vmem>>, vector<16x16x128xbf16>
    %c0_87 = arith.constant 0 : index
    %c0_88 = arith.constant 0 : index
    %103 = vector.load %arg8[%c0_87, %c0_88] : memref<256x128xf32, #tpu.memory_space<vmem>>, vector<256x128xf32>
    %104 = vector.shape_cast %102 : vector<16x16x128xbf16> to vector<256x128xbf16>
    %c7 = arith.constant 7 : index
    %c0_89 = arith.constant 0 : index
    %c0_90 = arith.constant 0 : index
    %105 = vector.load %arg3[%c7, %c0_89, %c0_90] : memref<9x128x128xbf16, #tpu.memory_space<vmem>>, vector<1x128x128xbf16>
    %106 = vector.shape_cast %105 : vector<1x128x128xbf16> to vector<128x128xbf16>
    %cst_91 = arith.constant dense<0.000000e+00> : vector<256x128xf32>
    %107 = tpu.matmul %104, %106, %cst_91 {dimension_numbers = #tpu.dot_dimension_numbers<[1], [0], [0], [1], [0, 0, 1, 1], [], []>} : vector<256x128xbf16>, vector<128x128xbf16>, vector<256x128xf32> -> vector<256x128xf32>
    %108 = arith.addf %103, %107 : vector<256x128xf32>
    %c0_92 = arith.constant 0 : index
    %c0_93 = arith.constant 0 : index
    %109 = vector.load %arg8[%c0_92, %c0_93] : memref<256x128xf32, #tpu.memory_space<vmem>>, vector<256x128xf32>
    tpu.vector_store %arg8[%c0_92, %c0_93], %108 {strides = array<i32>} : memref<256x128xf32, #tpu.memory_space<vmem>>, vector<256x128xf32>,
    %c4_i32_94 = arith.constant 4 : i32
    %110 = arith.addi %29, %c4_i32_94 : i32
    %111 = arith.index_cast %110 : i32 to index
    %c4_95 = arith.constant 4 : index
    %c0_96 = arith.constant 0 : index
    %112 = vector.load %arg6[%111, %c4_95, %c0_96] : memref<48x24x128xbf16, #tpu.memory_space<vmem>>, vector<16x16x128xbf16>
    %c0_97 = arith.constant 0 : index
    %c0_98 = arith.constant 0 : index
    %113 = vector.load %arg8[%c0_97, %c0_98] : memref<256x128xf32, #tpu.memory_space<vmem>>, vector<256x128xf32>
    %114 = vector.shape_cast %112 : vector<16x16x128xbf16> to vector<256x128xbf16>
    %c8 = arith.constant 8 : index
    %c0_99 = arith.constant 0 : index
    %c0_100 = arith.constant 0 : index
    %115 = vector.load %arg3[%c8, %c0_99, %c0_100] : memref<9x128x128xbf16, #tpu.memory_space<vmem>>, vector<1x128x128xbf16>
    %116 = vector.shape_cast %115 : vector<1x128x128xbf16> to vector<128x128xbf16>
    %cst_101 = arith.constant dense<0.000000e+00> : vector<256x128xf32>
    %117 = tpu.matmul %114, %116, %cst_101 {dimension_numbers = #tpu.dot_dimension_numbers<[1], [0], [0], [1], [0, 0, 1, 1], [], []>} : vector<256x128xbf16>, vector<128x128xbf16>, vector<256x128xf32> -> vector<256x128xf32>
    %118 = arith.addf %113, %117 : vector<256x128xf32>
    %c0_102 = arith.constant 0 : index
    %c0_103 = arith.constant 0 : index
    %119 = vector.load %arg8[%c0_102, %c0_103] : memref<256x128xf32, #tpu.memory_space<vmem>>, vector<256x128xf32>
    tpu.vector_store %arg8[%c0_102, %c0_103], %118 {strides = array<i32>} : memref<256x128xf32, #tpu.memory_space<vmem>>, vector<256x128xf32>,
    %c0_104 = arith.constant 0 : index
    %c0_105 = arith.constant 0 : index
    %120 = vector.load %arg8[%c0_104, %c0_105] : memref<256x128xf32, #tpu.memory_space<vmem>>, vector<256x128xf32>
    %c0_106 = arith.constant 0 : index
    %c0_107 = arith.constant 0 : index
    %121 = vector.load %arg4[%c0_106, %c0_107] : memref<1x128xf32, #tpu.memory_space<vmem>>, vector<1x128xf32>
    %122 = vector.broadcast %121 : vector<1x128xf32> to vector<256x128xf32>
    %123 = arith.addf %120, %122 : vector<256x128xf32>
    %cst_108 = arith.constant 0.000000e+00 : f32
    %124 = vector.broadcast %cst_108 : f32 to vector<256x128xf32>
    %125 = arith.maximumf %123, %124 : vector<256x128xf32>
    %126 = vector.shape_cast %125 : vector<256x128xf32> to vector<16x16x128xf32>
    %127 = arith.truncf %126 : vector<16x16x128xf32> to vector<16x16x128xbf16>
    %c0_109 = arith.constant 0 : index
    %c0_110 = arith.constant 0 : index
    %c0_111 = arith.constant 0 : index
    %c0_112 = arith.constant 0 : index
    %128 = vector.load %arg5[%c0_109, %c0_110, %c0_111, %c0_112] : memref<1x16x16x128xbf16, #tpu.memory_space<vmem>>, vector<1x16x16x128xbf16>
    %129 = vector.shape_cast %128 : vector<1x16x16x128xbf16> to vector<16x16x128xbf16>
    %130 = vector.shape_cast %127 : vector<16x16x128xbf16> to vector<1x16x16x128xbf16>
    tpu.vector_store %arg5[%c0_109, %c0_110, %c0_111, %c0_112], %130 {strides = array<i32>} : memref<1x16x16x128xbf16, #tpu.memory_space<vmem>>, vector<1x16x16x128xbf16>,
    return
  }
  func.func @transform_1(%arg0: i32, %arg1: i32) -> (i32, i32, i32) {
    %c0_i32 = arith.constant 0 : i32
    %c0_i32_0 = arith.constant 0 : i32
    %c0_i32_1 = arith.constant 0 : i32
    %c0_i32_2 = arith.constant 0 : i32
    return %c0_i32, %c0_i32_0, %c0_i32_1 : i32, i32, i32
  }
  func.func @transform_2(%arg0: i32, %arg1: i32) -> (i32, i32) {
    %c0_i32 = arith.constant 0 : i32
    %c0_i32_0 = arith.constant 0 : i32
    %c0_i32_1 = arith.constant 0 : i32
    return %c0_i32, %c0_i32_0 : i32, i32
  }
  func.func @transform_3(%arg0: i32, %arg1: i32) -> (i32, i32, i32, i32) {
    %c0_i32 = arith.constant 0 : i32
    %c0_i32_0 = arith.constant 0 : i32
    %c0_i32_1 = arith.constant 0 : i32
    return %arg0, %arg1, %c0_i32, %c0_i32_0 : i32, i32, i32, i32
  }
}

</mosaic_0001>

<bundles_post_ra>
// kernel: tpu_custom_call.1
= control target key start
LH: loop header
LB: loop body
LE: loop exit
PB: predicated region body
PF: predicated region fallthrough
CT: control target
= control target key end

     0   :  { %8 = vsyncpa [#allocation6], 0  ;;  %s8343_s0 = inlined_call_operand.hbm [shape: bf16[2,20,24,128], index: 0, kind: input, shape index: {}]   ;;  %s8344_s1 = inlined_call_operand.hbm [shape: bf16[9,128,128], index: 1, kind: input, shape index: {}]   ;;  %s8345_s2 = inlined_call_operand.vmem [shape: f32[1,128], index: 2, kind: input, shape index: {}]   ;;  %s8346_s3 = inlined_call_operand.hbm [shape: bf16[2,16,16,128], index: 3, kind: output, shape index: {}]  }
   0x1   :  { %9 = vsyncpa [#allocation7], 0 }
   0x2   :  { %11 = vsyncpa [#allocation7 + $0x1], 0  ;;  %s7614_s12 = smov 0   ;;  %s7616_s13 = smov 0  }
   0x3   :  { %s7618_s14 = smov 0   ;;  %s7620_s15 = smov 0  }
   0x4   :  { %s7622_s16 = smov 0   ;;  %s7624_s17 = smov 0  }
   0x5 LB: > { %s5584_s18 = sadd.s32 4294967295, %s7585_s17   ;;  %s5585_s19 = sadd.s32 4294967294, %s7585_s17   ;;  %s7585_s17 = sphi %s7624_s17, %s17_s17   ;;  %s7581_s16 = sphi %s7622_s16, %s8368_s16   ;;  %s7577_s15 = sphi %s7620_s15, %s8367_s15   ;;  %s7573_s14 = sphi %s7618_s14, %s8366_s14   ;;  %s7569_s13 = sphi %s7616_s13, %s8365_s13   ;;  %s7565_s12 = sphi %s7614_s12, %s8364_s12  }
   0x6   : > { %s29_s20 = sadd.s32 1, %s7581_s16  ;;  %s80_s21 = sadd.s32 1, %s7573_s14 }
   0x7   : > { %p31_p0 = scmp.ge.s32.totalorder %s29_s20, 2  ;;  %p90_p1 = scmp.ne.s32.totalorder %s7573_s14, %s7569_s13 }
   0x8   : > { %p91_p2 = scmp.eq.s32.totalorder %s5584_s18, 1  ;;  %p96_p3 = scmp.ne.s32.totalorder %s7569_s13, %s7565_s12 }
   0x9   : > { %s8370_s20 = smov (%p31_p0, %s29_s20), 0  ;;  %p97_p5 = scmp.eq.s32.totalorder %s5585_s19, 1 }
   0xa   : > { %p7654_p4 = por %p91_p2, %p90_p1  ;;  %s75_s23 = ssub.s32 %s7581_s16, %s8370_s20 }
   0xb   : > { %p5586_p6 = scmp.ge.s32.totalorder %s7585_s17, 1  ;;  %p78_p7 = scmp.eq.s32.totalorder %s75_s23, 0 }
   0xc   : > { %s8351_s22 = scalar_select %p7654_p4, 1, 0 }
   0xd   : > { %p7661_p8 = por %p97_p5, %p96_p3  ;;  %p104_p9 = scmp.lt.s32.totalorder %s7585_s17, 3 }
   0xe   : > { %s7667_s25 = scalar_select %p78_p7, %s7573_s14, %s80_s21  }
   0xf   : > { %s8352_s24 = scalar_select %p7661_p8, 1, 0 }
  0x10   : > { %p7669_p10 = pnand %p5586_p6, %p104_p9  ;;  %p7673_p11 = scmp.eq.s32.totalorder %s5584_s18, 0 }
  0x11   : > { %s7587_s28 = smov [#allocation5]   ;;  %s7449_s6 = scalar_lea.hbm %s8344_s1, 9216 }
  0x12   : > { %s8353_s26 = scalar_select %p7669_p10, 1, 0 }
  0x13   : > { %s8354_s27 = scalar_select %p7673_p11, 1, 0 }
  0x14   : > { %p7256_p12 = pneg %p7669_p10  ;;  %s116_s29 = sshll.u32 %s7587_s28, 4  ;;  %s117_s29 = int_to_ptr.vmem [resolvable:$true] %s116_s29 }
  0x15   : > { %p7450_p0 = scmp.ne.s32.totalorder %s8344_s1, %s7449_s6  ;;  %p7456_p5 = scmp.lt.u32.totalorder %s7449_s6, %s8344_s1 }
  0x16   : > { %p7681_p13 = pnand %p7673_p11, %p7256_p12 }
  0x18   : > { %p7451_p1 = pneg %p7681_p13 }
  0x1a   : > { %p7452_p2 = pnand %p7451_p1, %p7450_p0 }
  0x1c   : > { %p7453_p3 = pneg %p7452_p2 }
  0x1e   : > { %p7458_p6 = pnand %p7456_p5, %p7453_p3 }
  0x20   : > { %7461 = shalt.err (!%p7458_p6)
}
  0x21   : > { %s7462_s11 = scalar_lea.vmem %s117_s29, 9216  ;;  %p7470_p8 = scmp.lt.s32.totalorder %s117_s29, %s117_s29 }
  0x22   : > { %p7463_p7 = scmp.ne.s32.totalorder %s117_s29, %s7462_s11  ;;  %p7471_p4 = scmp.lt.s32.totalorder %s7462_s11, %s7462_s11 }
  0x24   : > { %p7465_p9 = pnand %p7463_p7, %p7451_p1  ;;  %p7472_p11 = por %p7471_p4, %p7470_p8 }
  0x26   : > { %p7466_p12 = pneg %p7465_p9 }
  0x28   : > { %p7473_p10 = pnand %p7472_p11, %p7466_p12 }
  0x2a   : > { %7476 = shalt.err (!%p7473_p10)
}
  0x2b   : > { %s7588_s18 = smov 64   ;;  %s7589_s19 = smov 4  }
  0x2c   : > { %7259 = dma.hbm_to_vmem [thread:$0]  (!%p7681_p13), %s8344_s1, 9216, %s117_s29, [#allocation6], %s7588_s18, %s7588_s18, %s7589_s19  }
  0x2d   : > { %p8356_p0 = scmp.ne.s32.totalorder %s8353_s26, 0 }
  0x2e   : > { %p8357_p2 = scmp.ne.s32.totalorder (!%p8356_p0), %s8354_s27, 0 }
  0x2f   : > { %135 = sbr.rel (%p8356_p0) target bundleno = 633 (0x279), region = 28 }
  0x36   : > { %7554 = dma.done.wait (%p8357_p2), [#allocation6], 9216  }
  0x37   : > { %7556 = vsyncadd (%p8357_p2), [#allocation6], 4294958080  ;;  %s149_s28 = sand.u32 1, %s7569_s13   ;;  %s6201_s4 = smul.u32 3840, %s7577_s15 }
  0x38   : > { %s5590_s30 = sshll.u32 %s149_s28, 7  ;;  %s7590_s7 = smov [#allocation2]  }
  0x39   : > { %s176_s29 = scalar_lea.hbm %s8343_s0, %s6201_s4  ;;  %s188_s26 = sshll.u32 %s7590_s7, 4  ;;  %s189_s26 = int_to_ptr.vmem [resolvable:$true] %s188_s26 }
  0x3a   : > { %s7477_s8 = scalar_lea.hbm %s176_s29, 3840  ;;  %s7479_s27 = scalar_lea.hbm %s8343_s0, 7680 }
  0x3b   : > { %p7478_p4 = scmp.ne.s32.totalorder %s176_s29, %s7477_s8  ;;  %p7480_p8 = scmp.lt.u32.totalorder %s176_s29, %s8343_s0 }
  0x3c   : > { %p7481_p10 = scmp.lt.u32.totalorder %s7479_s27, %s7477_s8  ;;  %p7483_p13 = scmp.lt.u32.totalorder %s7477_s8, %s176_s29 }
  0x3e   : > { %p7482_p11 = por %p7481_p10, %p7480_p8 }
  0x40   : > { %p7484_p1 = por %p7483_p13, %p7482_p11 }
  0x42   : > { %p7485_p3 = pnand %p7484_p1, %p7478_p4 }
  0x44   : > { %7488 = shalt.err (!%p7485_p3)  }
  0x45   : > { %s7489_s19 = scalar_lea.vmem %s189_s26, 3840  ;;  %s7493_s21 = scalar_lea.vmem %s189_s26, 9216 }
  0x46   : > { %p7490_p5 = scmp.ne.s32.totalorder %s189_s26, %s7489_s19  ;;  %p7494_p6 = scmp.lt.s32.totalorder %s189_s26, %s189_s26 }
  0x47   : > { %p7495_p7 = scmp.lt.s32.totalorder %s7493_s21, %s7489_s19 }
  0x49   : > { %p7496_p9 = por %p7495_p7, %p7494_p6 }
  0x4b   : > { %p7497_p12 = pnand %p7496_p9, %p7490_p5 }
  0x4d   : > { %7500 = shalt.err (!%p7497_p12)  }
  0x4e   : > { %191 = dma.hbm_to_vmem [thread:$0]  %s176_s29, 3840, %s189_s26, [#allocation3] }
  0x4f   : > { %s7720_s23 = scalar_lea.vmem [#allocation8], %s5590_s30 }
  0x50   : > { %7557 = dma.done.wait [#allocation3], 3840 }
  0x51   : > { %7558 = vsyncadd [#allocation3], 4294963456  ;;  %v7321_v0 = vld [vmem:[#allocation5] sm:$0xff]   ;;  %v7323_v2 = vld [vmem:[#allocation5 + $0x8] sm:$0xff]   ;;  %vm840_vm0 = vcmask 1042432   ;;  %vm841_vm1 = vcmask 1046532  }
  0x52   : > { %v7322_v1 = vld [vmem:[#allocation5 + $0x100] sm:$0xff]   ;;  %6546 = vmatprep.subr.bf16.mxu1 %v7321_v0  ;;  %v7324_v3 = vld [vmem:[#allocation5 + $0x108] sm:$0xff]   ;;  %v7325_v4 = vld [vmem:[#allocation5 + $0x10] sm:$0xff]   ;;  %vm1437_vm3 = vcmask 1041408   ;;  %vm1438_vm4 = vcmask 1045508   ;;  %s6234_s5 = sshll.u32 %s7577_s15, 11 }
  0x53   : > { %6738 = vmatprep.subr.bf16.mxu0 %v7322_v1  ;;  %6547 = vmatpush3.bf16.msra.mxu1 %v7321_v0  ;;  %v7326_v5 = vld [vmem:[#allocation5 + $0x110] sm:$0xff]   ;;  %v7327_v6 = vld [vmem:[#allocation5 + $0x18] sm:$0xff]   ;;  %vm7722_vm2 = vmor %vm840_vm0, %vm841_vm1  ;;  %s5470_s6 = sshll.u32 %s7720_s23, 4  ;;  %s8289_s26 = scalar_lea.hbm %s8346_s3, %s6234_s5  ;;  %s8291_s6 = int_to_ptr.vmem [resolvable:$true] %s5470_s6 }
  0x54   : > { %6739 = vmatpush3.bf16.msra.mxu0 %v7322_v1  ;;  %6548 = vmatprep.subr.bf16.mxu1 %v7323_v2  ;;  %v7328_v7 = vld [vmem:[#allocation5 + $0x118] sm:$0xff]   ;;  %v7329_v9 = vld [vmem:[#allocation5 + $0x20] sm:$0xff]   ;;  %v7331_v11 = vld [vmem:[#allocation5 + $0x28] sm:$0xff]   ;;  %s8297_s15 = scalar_lea.sflag [#allocation7], %s149_s28  ;;  %s7501_s8 = scalar_lea.vmem %s8291_s6, 2048 }
  0x55   : > { %6740 = vmatprep.subr.bf16.mxu0 %v7324_v3  ;;  %v7330_v10 = vld [vmem:[#allocation5 + $0x120] sm:$0xff]   ;;  %v7332_v12 = vld [vmem:[#allocation5 + $0x128] sm:$0xff]   ;;  %v5753_v14 = vld [vmem:[#allocation2 + $0x18] sm:$0xe]  ;;  %p7502_p0 = scmp.ne.s32.totalorder %s8291_s6, %s7501_s8  ;;  %p8362_p2 = scmp.ne.s32.totalorder %s8351_s22, 0 }
  0x56   : > { %v7337_v13 = vld [vmem:[#allocation2] sm:$0xff]   ;;  %v5754_v15 = vld [vmem:[#allocation2 + $0x1c] sm:$0xf]  ;;  %v5801_v17 = vrot.slane %v5753_v14, 9  ;;  %v7333_v20 = vld [vmem:[#allocation5 + $0x30] sm:$0xff]   ;;  %s7591_s9 = smov [#allocation8]  }
  0x57   : > { %6549 = vmatpush3.bf16.msra.mxu1 %v7323_v2  ;;  %v5755_v16 = vld [vmem:[#allocation2 + $0x20] sm:$0x1]  ;;  %6562 = vmatprep.mubr.bf16.mxu1 %v7337_v13  ;;  %v2490_v18 = vrot.slane %v5754_v15, 5  ;;  %v5756_v23 = vld [vmem:[#allocation2 + $0x24] sm:$0xe]  ;;  %v7334_v25 = vld [vmem:[#allocation5 + $0x130] sm:$0xff]   ;;  %p7503_p4 = pnand %p7502_p0, %p8362_p2 }
  0x58   : > { %6741 = vmatpush3.bf16.msra.mxu0 %v7324_v3  ;;  %6550 = vmatprep.subr.bf16.mxu1 %v7325_v4  ;;  %v2493_v19 = vrot.slane %v5755_v16, 5  ;;  %v5757_v24 = vld [vmem:[#allocation2 + $0x28] sm:$0xf]  ;;  %v5758_v26 = vld [vmem:[#allocation2 + $0x2c] sm:$0x1]  ;;  %v7335_v29 = vld [vmem:[#allocation5 + $0x38] sm:$0xff]  }
  0x59   : > { %6742 = vmatprep.subr.bf16.mxu0 %v7326_v5  ;;  %v2491_v21 = vsel %vm7722_vm2, %v5801_v17, %v2490_v18  ;;  %v2492_v22 = vrot.slane %v2490_v18, 4  ;;  %v2497_v27 = vrot.slane %v5757_v24, 5  ;;  %v5802_v31 = vrot.slane %v5756_v23, 9  ;;  %v5759_v34 = vld [vmem:[#allocation2 + $0x30] sm:$0xe]  ;;  %v7336_v35 = vld [vmem:[#allocation5 + $0x138] sm:$0xff]   ;;  %vm7755_vm5 = vmor %vm1437_vm3, %vm1438_vm4  ;;  %p7504_p8 = pneg %p7503_p4 }
  0x5a   : > { %v2500_v33 = vrot.slane %v5758_v26, 5  ;;  %v5760_v36 = vld [vmem:[#allocation2 + $0x34] sm:$0xf]  ;;  %v5761_v37 = vld [vmem:[#allocation2 + $0x38] sm:$0x1]  ;;  %v5803_v38 = vrot.slane %v5759_v34, 9 }
  0x5b   : > { %6551 = vmatpush3.bf16.msra.mxu1 %v7325_v4  ;;  %v2494_v28 = vsel %vm7722_vm2, %v2492_v22, %v2493_v19  ;;  %v2499_v32 = vrot.slane %v2497_v27, 4  ;;  %v2504_v39 = vrot.slane %v5760_v36, 5  ;;  %v2507_v40 = vrot.slane %v5761_v37, 5  ;;  %v7338_v41 = vld [vmem:[#allocation2 + $0xc] sm:$0xff]   ;;  %v7339_v42 = vld [vmem:[#allocation5 + $0x40] sm:$0xff]   ;;  %v7342_v51 = vld [vmem:[#allocation2 + $0x18] sm:$0xff]  }
  0x5c   : > { %6743 = vmatpush3.bf16.msra.mxu0 %v7326_v5  ;;  %6552 = vmatprep.subr.bf16.mxu1 %v7327_v6  ;;  %v5817_v30 = vcombine.low %v2491_v21, %v2494_v28  ;;  %v2498_v43 = vsel %vm7722_vm2, %v5802_v31, %v2497_v27  ;;  %v5762_v46 = vld [vmem:[#allocation2 + $0x3c] sm:$0xe]  ;;  %v5763_v47 = vld [vmem:[#allocation2 + $0x40] sm:$0xf]  ;;  %v5764_v49 = vld [vmem:[#allocation2 + $0x44] sm:$0x1] }
  0x5d   : > { %6744 = vmatprep.subr.bf16.mxu0 %v7328_v7  ;;  %v2501_v44 = vsel %vm7722_vm2, %v2499_v32, %v2500_v33  ;;  %v2506_v45 = vrot.slane %v2504_v39, 4  ;;  %v7340_v48 = vld [vmem:[#allocation5 + $0x140] sm:$0xff]   ;;  %v2511_v50 = vrot.slane %v5763_v47, 5  ;;  %v2505_v52 = vsel %vm7722_vm2, %v5803_v38, %v2504_v39  ;;  %v7341_v56 = vld [vmem:[#allocation5 + $0x148] sm:$0xff]   ;;  %v5767_v62 = vld [vmem:[#allocation2 + $0x50] sm:$0x1] }
  0x5e   : > { %6754 = vmatprep.mubr.bf16.mxu0 %v5817_v30  ;;  %v5804_v54 = vrot.slane %v5762_v46, 9  ;;  %v5818_v55 = vcombine.low %v2498_v43, %v2501_v44  ;;  %v2514_v58 = vrot.slane %v5764_v49, 5  ;;  %v5765_v59 = vld [vmem:[#allocation2 + $0x48] sm:$0xe]  ;;  %v5766_v60 = vld [vmem:[#allocation2 + $0x4c] sm:$0xf] }
  0x5f   : > { %6553 = vmatpush3.bf16.msra.mxu1 %v7327_v6  ;;  %v2508_v53 = vsel %vm7722_vm2, %v2506_v45, %v2507_v40  ;;  %v2513_v57 = vrot.slane %v2511_v50, 4  ;;  %v5805_v63 = vrot.slane %v5765_v59, 9  ;;  %v2518_v0 = vrot.slane %v5766_v60, 5  ;;  %v7344_v1 = vld [vmem:[#allocation5 + $0x48] sm:$0xff]   ;;  %v5768_v4 = vld [vmem:[#allocation2 + $0x54] sm:$0xe] }
  0x60   : > { %6745 = vmatpush3.bf16.msra.mxu0 %v7328_v7  ;;  %6554 = vmatprep.subr.bf16.mxu1 %v7329_v9  ;;  %v5819_v61 = vcombine.low %v2505_v52, %v2508_v53  ;;  %v2521_v2 = vrot.slane %v5767_v62, 5  ;;  %v7343_v5 = vld [vmem:[#allocation2 + $0x24] sm:$0xff]   ;;  %v2512_v6 = vsel %vm7722_vm2, %v5804_v54, %v2511_v50  ;;  %v7347_v16 = vld [vmem:[#allocation2 + $0x30] sm:$0xff]   ;;  %v5806_v17 = vrot.slane %v5768_v4, 9  ;;  %v5771_v22 = vld [vmem:[#allocation2 + $0x60] sm:$0xe] }
  0x61   : > { %6746 = vmatprep.subr.bf16.mxu0 %v7330_v10  ;;  %v2520_v3 = vrot.slane %v2518_v0, 4  ;;  %v2515_v7 = vsel %vm7722_vm2, %v2513_v57, %v2514_v58  ;;  %v2519_v13 = vsel %vm7722_vm2, %v5805_v63, %v2518_v0  ;;  %v5772_v23 = vld [vmem:[#allocation2 + $0x64] sm:$0xf]  ;;  %v5773_v24 = vld [vmem:[#allocation2 + $0x68] sm:$0x1]  ;;  %v5807_v26 = vrot.slane %v5771_v22, 9 }
  0x62   : > { %v5820_v18 = vcombine.low %v2512_v6, %v2515_v7  ;;  %v2532_v27 = vrot.slane %v5772_v23, 5  ;;  %v2535_v28 = vrot.slane %v5773_v24, 5  ;;  %v7354_v30 = vld [vmem:[#allocation5 + $0x58] sm:$0xff]   ;;  %v5774_v31 = vld [vmem:[#allocation2 + $0x6c] sm:$0xe]  ;;  %v7350_v38 = vld [vmem:[#allocation5 + $0x160] sm:$0xff]  }
  0x63   : > { %6555 = vmatpush3.bf16.msra.mxu1 %v7329_v9  ;;  %v7349_v9 = vld [vmem:[#allocation5 + $0x50] sm:$0xff]   ;;  %v2522_v14 = vsel %vm7722_vm2, %v2520_v3, %v2521_v2  ;;  %v7348_v33 = vld [vmem:[#allocation2 + $0x3c] sm:$0xff]   ;;  %v7351_v43 = vld [vmem:[#allocation5 + $0x168] sm:$0xff]   ;;  %v5808_v44 = vrot.slane %v5774_v31, 9  ;;  %s7505_s10 = sshll.u32 %s7591_s9, 4  ;;  %s7506_s10 = int_to_ptr.vmem [resolvable:$false] %s7505_s10 }
  0x64   : > { %6747 = vmatpush3.bf16.msra.mxu0 %v7330_v10  ;;  %6556 = vmatprep.subr.bf16.mxu1 %v7331_v11  ;;  %v5769_v10 = vld [vmem:[#allocation2 + $0x58] sm:$0xf]  ;;  %v5821_v21 = vcombine.low %v2519_v13, %v2522_v14  ;;  %v5775_v32 = vld [vmem:[#allocation2 + $0x70] sm:$0xf]  ;;  %v5776_v36 = vld [vmem:[#allocation2 + $0x74] sm:$0x1]  ;;  %v2533_v39 = vsel %vm7722_vm2, %v5807_v26, %v2532_v27  ;;  %p7508_p10 = scmp.lt.s32.totalorder %s8291_s6, %s7506_s10 }
  0x65   : > { %6748 = vmatprep.subr.bf16.mxu0 %v7332_v12  ;;  %v2525_v15 = vrot.slane %v5769_v10, 5  ;;  %v2539_v37 = vrot.slane %v5775_v32, 5  ;;  %v2542_v45 = vrot.slane %v5776_v36, 5  ;;  %v5841_v46 = vld [vmem:[#allocation2 + $0x18] sm:$0xc]  ;;  %v7355_v62 = vld [vmem:[#allocation5 + $0x170] sm:$0xff]  }
  0x66   : > { %v5842_v49 = vld [vmem:[#allocation2 + $0x1c] sm:$0xf]  ;;  %v5843_v50 = vld [vmem:[#allocation2 + $0x20] sm:$0x3]  ;;  %v5844_v57 = vld [vmem:[#allocation2 + $0x24] sm:$0xc] }
  0x67   : > { %6557 = vmatpush3.bf16.msra.mxu1 %v7331_v11  ;;  %v5770_v11 = vld [vmem:[#allocation2 + $0x5c] sm:$0x1]  ;;  %v2527_v19 = vrot.slane %v2525_v15, 4  ;;  %v2526_v34 = vsel %vm7722_vm2, %v5806_v17, %v2525_v15  ;;  %v3084_v53 = vrot.slane %v5842_v49, 6  ;;  %v3087_v54 = vrot.slane %v5843_v50, 6  ;;  %v7353_v59 = vld [vmem:[#allocation2 + $0x54] sm:$0xff]  }
  0x68   : > { %6749 = vmatpush3.bf16.msra.mxu0 %v7332_v12  ;;  %6558 = vmatprep.subr.bf16.mxu1 %v7333_v20  ;;  %v7345_v12 = vld [vmem:[#allocation5 + $0x150] sm:$0xff]   ;;  %v5845_v58 = vld [vmem:[#allocation2 + $0x28] sm:$0xf]  ;;  %v2540_v60 = vsel %vm7722_vm2, %v5808_v44, %v2539_v37  ;;  %v5846_v63 = vld [vmem:[#allocation2 + $0x2c] sm:$0x3]  ;;  %v5890_v4 = vrot.slane %v5844_v57, 10 }
  0x69   : > { %6750 = vmatprep.subr.bf16.mxu0 %v7334_v25  ;;  %v3091_v0 = vrot.slane %v5845_v58, 6  ;;  %v3094_v6 = vrot.slane %v5846_v63, 6  ;;  %v5847_v7 = vld [vmem:[#allocation2 + $0x30] sm:$0xc]  ;;  %v7356_v10 = vld [vmem:[#allocation5 + $0x178] sm:$0xff]   ;;  %v7363_v14 = vld [vmem:[#allocation5 + $0x68] sm:$0xff]  }
  0x6a   : > { %v5891_v13 = vrot.slane %v5847_v7, 10  ;;  %v7358_v23 = vld [vmem:[#allocation2 + $0x6c] sm:$0xff]   ;;  %v7360_v26 = vld [vmem:[#allocation5 + $0x180] sm:$0xff]   ;;  %v5853_v31 = vld [vmem:[#allocation2 + $0x48] sm:$0xc]  ;;  %s7507_s27 = scalar_lea.vmem %s7506_s10, 4096 }
  0x6b   : > { %6559 = vmatpush3.bf16.msra.mxu1 %v7333_v20  ;;  %v2528_v20 = vrot.slane %v5770_v11, 5  ;;  %v5848_v11 = vld [vmem:[#allocation2 + $0x34] sm:$0xf]  ;;  %v3092_v24 = vsel %vm7755_vm5, %v5890_v4, %v3091_v0  ;;  %v5854_v32 = vld [vmem:[#allocation2 + $0x4c] sm:$0xf]  ;;  %v7371_v63 = vld [vmem:[#allocation5 + $0x78] sm:$0xff]   ;;  %p7509_p11 = scmp.lt.s32.totalorder %s7507_s27, %s7501_s8 }
  0x6c   : > { %6751 = vmatpush3.bf16.msra.mxu0 %v7334_v25  ;;  %6560 = vmatprep.subr.bf16.mxu1 %v7335_v29  ;;  %v7346_v25 = vld [vmem:[#allocation5 + $0x158] sm:$0xff]   ;;  %v5856_v44 = vld [vmem:[#allocation2 + $0x54] sm:$0xc]  ;;  %v5864_v7 = vld [vmem:[#allocation2 + $0x74] sm:$0x3] }
  0x6d   : > { %6752 = vmatprep.subr.bf16.mxu0 %v7336_v35  ;;  %p7510_p13 = por %p7509_p11, %p7508_p10 }
  0x6f   : > { %6561 = vmatpush3.bf16.msra.mxu1 %v7335_v29  ;;  %v2534_v29 = vrot.slane %v2532_v27, 4  ;;  %v7361_v27 = vld [vmem:[#allocation2 + $0x78] sm:$0xff]   ;;  %p7511_p1 = pnand %p7510_p13, %p7504_p8 }
  0x70   : > { %6753 = vmatpush3.bf16.msra.mxu0 %v7336_v35  ;;  %6594 = vmatprep.subr.bf16.mxu1 %v7339_v42  ;;  %v2529_v35 = vsel %vm7722_vm2, %v2527_v19, %v2528_v20  ;;  %v5851_v20 = vld [vmem:[#allocation2 + $0x40] sm:$0xf] }
  0x71   : > { %6786 = vmatprep.subr.bf16.mxu0 %v7340_v48  ;;  %v2536_v40 = vsel %vm7722_vm2, %v2534_v29, %v2535_v28  ;;  %v3105_v22 = vrot.slane %v5851_v20, 6 }
  0x72   : > { %6563 = vmatmul.mubr.bf16.vlgmr.msra.gmra.mrb[0].mxu1 %v7338_v41  ;;  %v7352_v41 = vld [vmem:[#allocation2 + $0x48] sm:$0xff]   ;;  %v5823_v47 = vcombine.low %v2533_v39, %v2536_v40  ;;  %v5893_v40 = vrot.slane %v5853_v31, 10 }
  0x73   : > { %6755 = vmatmul.mubr.bf16.vlgmr.msra.gmra.mrb[0].mxu0 %v5818_v55  ;;  %6595 = vmatpush3.bf16.msra.mxu1 %v7339_v42  ;;  %v5822_v42 = vcombine.low %v2526_v34, %v2529_v35  ;;  %v7359_v55 = vld [vmem:[#allocation5 + $0x60] sm:$0xff]   ;;  %v5855_v34 = vld [vmem:[#allocation2 + $0x50] sm:$0x3]  ;;  %v3112_v35 = vrot.slane %v5854_v32, 6  ;;  %v7369_v31 = vld [vmem:[#allocation2 + $0xa8] sm:$0xff]  }
  0x74   : > { %6787 = vmatpush3.bf16.msra.mxu0 %v7340_v48  ;;  %6566 = vmatprep.mubr.bf16.mxu1 %v7342_v51  ;;  %v2541_v48 = vrot.slane %v2539_v37, 4  ;;  %v5889_v51 = vrot.slane %v5841_v46, 10  ;;  %v3107_v37 = vrot.slane %v3105_v22, 4  ;;  %v5858_v46 = vld [vmem:[#allocation2 + $0x5c] sm:$0x3] }
  0x75   : > { %6788 = vmatprep.subr.bf16.mxu0 %v7341_v56  ;;  %6758 = vmatprep.mubr.bf16.mxu0 %v5819_v61  ;;  %v3113_v57 = vsel %vm7755_vm5, %v5893_v40, %v3112_v35 }
  0x76   : > { %6596 = vmatprep.subr.bf16.mxu1 %v7344_v1  ;;  %v2543_v61 = vsel %vm7722_vm2, %v2541_v48, %v2542_v45  ;;  %v3085_v2 = vsel %vm7755_vm5, %v5889_v51, %v3084_v53  ;;  %v5857_v45 = vld [vmem:[#allocation2 + $0x58] sm:$0xf]  ;;  %v7362_v48 = vld [vmem:[#allocation2 + $0x84] sm:$0xff]   ;;  %v5894_v51 = vrot.slane %v5856_v44, 10 }
  0x77   : > { %6597 = vmatpush3.bf16.msra.mxu1 %v7344_v1  ;;  %v7357_v1 = vld [vmem:[#allocation2 + $0x60] sm:$0xff]  }
  0x78   : > { %6789 = vmatpush3.bf16.msra.mxu0 %v7341_v56  ;;  %6598 = vmatprep.subr.bf16.mxu1 %v7349_v9  ;;  %v3086_v56 = vrot.slane %v3084_v53, 4  ;;  %v7368_v53 = vld [vmem:[#allocation5 + $0x190] sm:$0xff]   ;;  %v5868_v44 = vld [vmem:[#allocation2 + $0x84] sm:$0xc] }
  0x79   : > { %6790 = vmatprep.subr.bf16.mxu0 %v7345_v12 }
  0x7a   : > { %6567 = vmatmul.mubr.bf16.gmra.mrb[4].mxu1 %v7343_v5  ;;  %v3088_v3 = vsel %vm7755_vm5, %v3086_v56, %v3087_v54  ;;  %v3093_v5 = vrot.slane %v3091_v0, 4  ;;  %v5859_v54 = vld [vmem:[#allocation2 + $0x60] sm:$0xc]  ;;  %v7365_v56 = vld [vmem:[#allocation2 + $0x90] sm:$0xff]  }
  0x7b   : > { %6759 = vmatmul.mubr.bf16.gmra.mrb[4].mxu0 %v5820_v18  ;;  %6570 = vmatprep.mubr.bf16.mxu1 %v7347_v16  ;;  %v5905_v15 = vcombine.low %v3085_v2, %v3088_v3  ;;  %v3098_v16 = vrot.slane %v5848_v11, 6  ;;  %v5850_v18 = vld [vmem:[#allocation2 + $0x3c] sm:$0xc]  ;;  %v5862_v3 = vld [vmem:[#allocation2 + $0x6c] sm:$0xc] }
  0x7c   : > { %6791 = vmatpush3.bf16.msra.mxu0 %v7345_v12  ;;  %6762 = vmatprep.mubr.bf16.mxu0 %v5821_v21  ;;  %v5849_v12 = vld [vmem:[#allocation2 + $0x38] sm:$0x3]  ;;  %v5852_v21 = vld [vmem:[#allocation2 + $0x44] sm:$0x3] }
  0x7d   : > { %6792 = vmatprep.subr.bf16.mxu0 %v7346_v25  ;;  %6599 = vmatpush3.bf16.msra.mxu1 %v7349_v9  ;;  %v5824_v9 = vcombine.low %v2540_v60, %v2543_v61  ;;  %v3101_v17 = vrot.slane %v5849_v12, 6  ;;  %v3100_v19 = vrot.slane %v3098_v16, 4  ;;  %v3099_v28 = vsel %vm7755_vm5, %v5891_v13, %v3098_v16  ;;  %v5861_v60 = vld [vmem:[#allocation2 + $0x68] sm:$0x3]  ;;  %v7372_v11 = vld [vmem:[#allocation5 + $0x198] sm:$0xff]  }
  0x7e   : > { %6600 = vmatprep.subr.bf16.mxu1 %v7354_v30  ;;  %v3129_v2 = vrot.slane %v5861_v60, 6  ;;  %v712_v12 = vld [vmem:[#allocation2] sm:$0xe]  ;;  %v713_v13 = vld [vmem:[#allocation2 + $0x4] sm:$0xf] }
  0x7f   : > { %v3102_v29 = vsel %vm7755_vm5, %v3100_v19, %v3101_v17  ;;  %v845_v16 = vrot.slane %v713_v13, 5  ;;  %v5865_v17 = vld [vmem:[#allocation2 + $0x78] sm:$0xc]  ;;  %v5617_v32 = vrot.slane %v712_v12, 9 }
  0x80   : > { %6793 = vmatpush3.bf16.msra.mxu0 %v7346_v25  ;;  %v3095_v25 = vsel %vm7755_vm5, %v3093_v5, %v3094_v6  ;;  %v5907_v39 = vcombine.low %v3099_v28, %v3102_v29  ;;  %v5863_v6 = vld [vmem:[#allocation2 + $0x70] sm:$0xf]  ;;  %v7374_v29 = vld [vmem:[#allocation5 + $0x1a0] sm:$0xff]  }
  0x81   : > { %6794 = vmatprep.subr.bf16.mxu0 %v7350_v38  ;;  %6601 = vmatpush3.bf16.msra.mxu1 %v7354_v30  ;;  %v5892_v30 = vrot.slane %v5850_v18, 10  ;;  %v5906_v36 = vcombine.low %v3092_v24, %v3095_v25  ;;  %v7796_v28 = vld [vmem:[#allocation2 + $0x10] sm:$0xf] }
  0x82   : > { %6571 = vmatmul.mubr.bf16.gmra.mrb[8].mxu1 %v7348_v33  ;;  %6602 = vmatprep.subr.bf16.mxu1 %v7359_v55  ;;  %v3108_v33 = vrot.slane %v5852_v21, 6  ;;  %v3136_v21 = vrot.slane %v5864_v7, 6 }
  0x83   : > { %6763 = vmatmul.mubr.bf16.gmra.mrb[8].mxu0 %v5822_v42  ;;  %6574 = vmatprep.mubr.bf16.mxu1 %v7352_v41  ;;  %v3114_v41 = vrot.slane %v3112_v35, 4  ;;  %v3115_v42 = vrot.slane %v5855_v34, 6  ;;  %v3106_v49 = vsel %vm7755_vm5, %v5892_v30, %v3105_v22  ;;  %v5866_v22 = vld [vmem:[#allocation2 + $0x7c] sm:$0xf]  ;;  %v5897_v35 = vrot.slane %v5865_v17, 10 }
  0x84   : > { %6795 = vmatpush3.bf16.msra.mxu0 %v7350_v38  ;;  %6766 = vmatprep.mubr.bf16.mxu0 %v5823_v47  ;;  %v7364_v38 = vld [vmem:[#allocation5 + $0x188] sm:$0xff]   ;;  %v3119_v47 = vrot.slane %v5857_v45, 6  ;;  %v3109_v50 = vsel %vm7755_vm5, %v3107_v37, %v3108_v33  ;;  %v7366_v30 = vld [vmem:[#allocation2 + $0x9c] sm:$0xff]   ;;  %v847_v33 = vrot.slane %v845_v16, 4 }
  0x85   : > { %6796 = vmatprep.subr.bf16.mxu0 %v7351_v43  ;;  %6603 = vmatpush3.bf16.msra.mxu1 %v7359_v55  ;;  %v5860_v55 = vld [vmem:[#allocation2 + $0x64] sm:$0xf]  ;;  %v3116_v58 = vsel %vm7755_vm5, %v3114_v41, %v3115_v42  ;;  %v5908_v0 = vcombine.low %v3106_v49, %v3109_v50  ;;  %v7799_v41 = vld [vmem:[#allocation2 + $0x14] sm:$0x1]  ;;  %v5870_v49 = vld [vmem:[#allocation2 + $0x8c] sm:$0x3] }
  0x86   : > { %6604 = vmatprep.subr.bf16.mxu1 %v7363_v14  ;;  %v3126_v61 = vrot.slane %v5860_v55, 6  ;;  %v5909_v4 = vcombine.low %v3113_v57, %v3116_v58  ;;  %v3120_v18 = vsel %vm7755_vm5, %v5894_v51, %v3119_v47  ;;  %v718_v50 = vld [vmem:[#allocation2 + $0x18] sm:$0xe]  ;;  %v846_v51 = vsel %vm7722_vm2, %v5617_v32, %v845_v16  ;;  %v720_v57 = vld [vmem:[#allocation2 + $0x20] sm:$0x1]  ;;  %v7378_v16 = vld [vmem:[#allocation5 + $0x1b0] sm:$0xff]  }
  0x87   : > { %v855_v55 = vrot.slane %v7799_v41, 5  ;;  %v7370_v58 = vld [vmem:[#allocation2 + $0xb4] sm:$0xff]  }
  0x88   : > { %6797 = vmatpush3.bf16.msra.mxu0 %v7351_v43  ;;  %v7367_v43 = vld [vmem:[#allocation5 + $0x70] sm:$0xff]   ;;  %v3128_v5 = vrot.slane %v3126_v61, 4 }
  0x89   : > { %6798 = vmatprep.subr.bf16.mxu0 %v7355_v62  ;;  %6605 = vmatpush3.bf16.msra.mxu1 %v7363_v14  ;;  %v5896_v14 = vrot.slane %v5862_v3, 10  ;;  %v5619_v3 = vrot.slane %v718_v50, 9 }
  0x8a   : > { %6575 = vmatmul.mubr.bf16.gmra.mrb[12].mxu1 %v7353_v59  ;;  %6606 = vmatprep.subr.bf16.mxu1 %v7367_v43  ;;  %v3122_v59 = vrot.slane %v5858_v46, 6  ;;  %v3130_v25 = vsel %vm7755_vm5, %v3128_v5, %v3129_v2  ;;  %v7376_v46 = vld [vmem:[#allocation5 + $0x1a8] sm:$0xff]   ;;  %v3150_v2 = vrot.slane %v5870_v49, 6 }
  0x8b   : > { %6767 = vmatmul.mubr.bf16.gmra.mrb[12].mxu0 %v5824_v9  ;;  %6578 = vmatprep.mubr.bf16.mxu1 %v7357_v1  ;;  %v5895_v1 = vrot.slane %v5859_v54, 10  ;;  %v7783_v9 = vld [vmem:[#allocation5 + $0x80] sm:$0xff]  }
  0x8c   : > { %6799 = vmatpush3.bf16.msra.mxu0 %v7355_v62  ;;  %6802 = vmatprep.mubr.bf16.mxu0 %v5905_v15  ;;  %v3121_v62 = vrot.slane %v3119_v47, 4  ;;  %v714_v15 = vld [vmem:[#allocation2 + $0x8] sm:$0x1] }
  0x8d   : > { %6800 = vmatprep.subr.bf16.mxu0 %v7356_v10  ;;  %6607 = vmatpush3.bf16.msra.mxu1 %v7367_v43  ;;  %v3127_v24 = vsel %vm7755_vm5, %v5895_v1, %v3126_v61  ;;  %v848_v34 = vrot.slane %v714_v15, 5  ;;  %v7802_v43 = vld [vmem:[#allocation2 + $0x88] sm:$0xf]  ;;  %v5898_v61 = vrot.slane %v5868_v44, 10 }
  0x8e   : > { %6608 = vmatprep.subr.bf16.mxu1 %v7371_v63  ;;  %v3123_v19 = vsel %vm7755_vm5, %v3121_v62, %v3122_v59  ;;  %v3147_v45 = vrot.slane %v7802_v43, 6 }
  0x90   : > { %6801 = vmatpush3.bf16.msra.mxu0 %v7356_v10  ;;  %v3133_v10 = vrot.slane %v5863_v6, 6  ;;  %v3149_v1 = vrot.slane %v3147_v45, 4  ;;  %v862_v6 = vrot.slane %v720_v57, 5  ;;  %v728_v57 = vld [vmem:[#allocation2 + $0x40] sm:$0xf] }
  0x91   : > { %6834 = vmatprep.subr.bf16.mxu0 %v7360_v26  ;;  %6609 = vmatpush3.bf16.msra.mxu1 %v7371_v63  ;;  %v5871_v63 = vld [vmem:[#allocation2 + $0x90] sm:$0xc] }
  0x92   : > { %6579 = vmatmul.mubr.bf16.gmra.mrb[16].mxu1 %v7358_v23  ;;  %6642 = vmatprep.subr.bf16.mxu1 %v7783_v9  ;;  %v3135_v20 = vrot.slane %v3133_v10, 4  ;;  %v5867_v23 = vld [vmem:[#allocation2 + $0x80] sm:$0x3]  ;;  %v3134_v47 = vsel %vm7755_vm5, %v5896_v14, %v3133_v10  ;;  %v5899_v7 = vrot.slane %v5871_v63, 10  ;;  %v721_v10 = vld [vmem:[#allocation2 + $0x24] sm:$0xe]  ;;  %v3151_v32 = vsel %vm7755_vm5, %v3149_v1, %v3150_v2 }
  0x93   : > { %6803 = vmatmul.mubr.bf16.vlgmr.msra.gmra.mrb[0].mxu0 %v5906_v36  ;;  %6582 = vmatprep.mubr.bf16.mxu1 %v7361_v27  ;;  %v7794_v27 = vld [vmem:[#allocation2 + $0xc] sm:$0xe]  ;;  %v5910_v36 = vcombine.low %v3120_v18, %v3123_v19  ;;  %v3143_v37 = vrot.slane %v5867_v23, 6  ;;  %v723_v14 = vld [vmem:[#allocation2 + $0x2c] sm:$0x1] }
  0x94   : > { %6835 = vmatpush3.bf16.msra.mxu0 %v7360_v26  ;;  %6806 = vmatprep.mubr.bf16.mxu0 %v5907_v39  ;;  %v3140_v26 = vrot.slane %v5866_v22, 6  ;;  %v5911_v39 = vcombine.low %v3127_v24, %v3130_v25  ;;  %v5618_v42 = vrot.slane %v7794_v27, 9  ;;  %v5875_v23 = vld [vmem:[#allocation2 + $0xa0] sm:$0xf]  ;;  %v5876_v24 = vld [vmem:[#allocation2 + $0xa4] sm:$0x3] }
  0x95   : > { %6836 = vmatprep.subr.bf16.mxu0 %v7364_v38  ;;  %v7380_v25 = vld [vmem:[#allocation5 + $0x1b8] sm:$0xff]   ;;  %v729_v63 = vld [vmem:[#allocation2 + $0x44] sm:$0x1] }
  0x96   : > { %v3142_v40 = vrot.slane %v3140_v26, 4  ;;  %v3141_v59 = vsel %vm7755_vm5, %v5897_v35, %v3140_v26  ;;  %v5620_v26 = vrot.slane %v721_v10, 9 }
  0x98   : > { %6837 = vmatpush3.bf16.msra.mxu0 %v7364_v38  ;;  %v852_v38 = vrot.slane %v7796_v28, 5  ;;  %v3144_v60 = vsel %vm7755_vm5, %v3142_v40, %v3143_v37  ;;  %v869_v28 = vrot.slane %v723_v14, 5  ;;  %v5877_v40 = vld [vmem:[#allocation2 + $0xa8] sm:$0xc] }
  0x99   : > { %6838 = vmatprep.subr.bf16.mxu0 %v7368_v53  ;;  %v5913_v17 = vcombine.low %v3141_v59, %v3144_v60 }
  0x9a   : > { %6583 = vmatmul.mubr.bf16.gmra.mrb[20].mxu1 %v7362_v48  ;;  %v3137_v48 = vsel %vm7755_vm5, %v3135_v20, %v3136_v21  ;;  %v854_v54 = vrot.slane %v852_v38, 4  ;;  %v5874_v20 = vld [vmem:[#allocation2 + $0x9c] sm:$0xc]  ;;  %v853_v21 = vsel %vm7722_vm2, %v5618_v42, %v852_v38  ;;  %v3164_v38 = vrot.slane %v5876_v24, 6  ;;  %v5884_v24 = vld [vmem:[#allocation2 + $0xc4] sm:$0xf] }
  0x9b   : > { %6807 = vmatmul.mubr.bf16.gmra.mrb[4].mxu0 %v5908_v0  ;;  %6586 = vmatprep.mubr.bf16.mxu1 %v7365_v56  ;;  %v719_v56 = vld [vmem:[#allocation2 + $0x1c] sm:$0xf]  ;;  %v5872_v0 = vld [vmem:[#allocation2 + $0x94] sm:$0xf]  ;;  %v5912_v12 = vcombine.low %v3134_v47, %v3137_v48  ;;  %v5900_v37 = vrot.slane %v5874_v20, 10 }
  0x9c   : > { %6810 = vmatprep.mubr.bf16.mxu0 %v5909_v4  ;;  %6839 = vmatpush3.bf16.msra.mxu0 %v7368_v53  ;;  %v849_v53 = vsel %vm7722_vm2, %v847_v33, %v848_v34  ;;  %v859_v62 = vrot.slane %v719_v56, 5  ;;  %v5873_v4 = vld [vmem:[#allocation2 + $0x98] sm:$0x3]  ;;  %v3154_v5 = vrot.slane %v5872_v0, 6  ;;  %v724_v33 = vld [vmem:[#allocation2 + $0x30] sm:$0xe] }
  0x9d   : > { %6840 = vmatprep.subr.bf16.mxu0 %v7372_v11  ;;  %v5633_v13 = vcombine.low %v846_v51, %v849_v53  ;;  %v3157_v19 = vrot.slane %v5873_v4, 6  ;;  %v725_v34 = vld [vmem:[#allocation2 + $0x34] sm:$0xf]  ;;  %v5621_v49 = vrot.slane %v724_v33, 9  ;;  %v7375_v51 = vld [vmem:[#allocation5 + $0x88] sm:$0xff]  }
  0x9e   : > { %v861_v18 = vrot.slane %v859_v62, 4  ;;  %v3156_v22 = vrot.slane %v3154_v5, 4  ;;  %v860_v35 = vsel %vm7722_vm2, %v5619_v3, %v859_v62  ;;  %v873_v44 = vrot.slane %v725_v34, 5  ;;  %v727_v62 = vld [vmem:[#allocation2 + $0x3c] sm:$0xe] }
  0x9f   : > { %v880_v3 = vrot.slane %v728_v57, 5  ;;  %v5881_v4 = vld [vmem:[#allocation2 + $0xb8] sm:$0xf]  ;;  %v7382_v57 = vld [vmem:[#allocation5 + $0xa0] sm:$0xff]  }
  0xa0   : > { %6841 = vmatpush3.bf16.msra.mxu0 %v7372_v11  ;;  %v722_v11 = vld [vmem:[#allocation2 + $0x28] sm:$0xf]  ;;  %v863_v41 = vsel %vm7722_vm2, %v861_v18, %v862_v6  ;;  %v3158_v42 = vsel %vm7755_vm5, %v3156_v22, %v3157_v19  ;;  %v875_v53 = vrot.slane %v873_v44, 4  ;;  %v5880_v6 = vld [vmem:[#allocation2 + $0xb4] sm:$0xc]  ;;  %v874_v10 = vsel %vm7722_vm2, %v5621_v49, %v873_v44 }
  0xa1   : > { %6842 = vmatprep.subr.bf16.mxu0 %v7374_v29  ;;  %v866_v15 = vrot.slane %v722_v11, 5  ;;  %v3175_v14 = vrot.slane %v5881_v4, 6  ;;  %v731_v18 = vld [vmem:[#allocation2 + $0x4c] sm:$0xf]  ;;  %v732_v19 = vld [vmem:[#allocation2 + $0x50] sm:$0x1] }
  0xa2   : > { %6587 = vmatmul.mubr.bf16.gmra.mrb[24].mxu1 %v7366_v30  ;;  %v856_v30 = vsel %vm7722_vm2, %v854_v54, %v855_v55  ;;  %v5901_v55 = vrot.slane %v5877_v40, 10  ;;  %v883_v22 = vrot.slane %v729_v63, 5  ;;  %v890_v33 = vrot.slane %v732_v19, 5  ;;  %v734_v34 = vld [vmem:[#allocation2 + $0x58] sm:$0xf] }
  0xa3   : > { %6811 = vmatmul.mubr.bf16.gmra.mrb[8].mxu0 %v5910_v36  ;;  %6590 = vmatprep.mubr.bf16.mxu1 %v7369_v31  ;;  %v868_v27 = vrot.slane %v866_v15, 4  ;;  %v3148_v31 = vsel %vm7755_vm5, %v5898_v61, %v3147_v45  ;;  %v3155_v36 = vsel %vm7755_vm5, %v5899_v7, %v3154_v5  ;;  %v5878_v45 = vld [vmem:[#allocation2 + $0xac] sm:$0xf]  ;;  %v5634_v47 = vcombine.low %v853_v21, %v856_v30  ;;  %v7377_v5 = vld [vmem:[#allocation5 + $0x90] sm:$0xff]   ;;  %v7842_v7 = vld [vmem:[#allocation5 + $0x1c0] sm:$0xff]  }
  0xa4   : > { %6814 = vmatprep.mubr.bf16.mxu0 %v5911_v39  ;;  %6843 = vmatpush3.bf16.msra.mxu0 %v7374_v29  ;;  %v3161_v29 = vrot.slane %v5875_v23, 6  ;;  %v726_v39 = vld [vmem:[#allocation2 + $0x38] sm:$0x1]  ;;  %v5914_v48 = vcombine.low %v3148_v31, %v3151_v32  ;;  %v3168_v50 = vrot.slane %v5878_v45, 6  ;;  %v5915_v59 = vcombine.low %v3155_v36, %v3158_v42  ;;  %v5883_v23 = vld [vmem:[#allocation2 + $0xc0] sm:$0xc] }
  0xa5   : > { %6844 = vmatprep.subr.bf16.mxu0 %v7376_v46  ;;  %v876_v54 = vrot.slane %v726_v39, 5  ;;  %v867_v60 = vsel %vm7722_vm2, %v5620_v26, %v866_v15  ;;  %v870_v61 = vsel %vm7722_vm2, %v868_v27, %v869_v28  ;;  %v882_v21 = vrot.slane %v880_v3, 4  ;;  %v5885_v28 = vld [vmem:[#allocation2 + $0xc8] sm:$0x3]  ;;  %v735_v45 = vld [vmem:[#allocation2 + $0x5c] sm:$0x1] }
  0xa6   : > { %v3163_v43 = vrot.slane %v3161_v29, 4  ;;  %v3162_v0 = vsel %vm7755_vm5, %v5900_v37, %v3161_v29  ;;  %v3170_v2 = vrot.slane %v3168_v50, 4  ;;  %v5636_v15 = vcombine.low %v867_v60, %v870_v61  ;;  %v738_v63 = vld [vmem:[#allocation2 + $0x68] sm:$0x1] }
  0xa7   : > { %v877_v11 = vsel %vm7722_vm2, %v875_v53, %v876_v54  ;;  %v5902_v26 = vrot.slane %v5880_v6, 10  ;;  %v887_v27 = vrot.slane %v731_v18, 5  ;;  %v3182_v29 = vrot.slane %v5884_v24, 6  ;;  %v5888_v54 = vld [vmem:[#allocation2 + $0xd4] sm:$0x3]  ;;  %v7386_v18 = vld [vmem:[#allocation5 + $0xa8] sm:$0xff]  }
  0xa8   : > { %6845 = vmatpush3.bf16.msra.mxu0 %v7376_v46  ;;  %v5879_v46 = vld [vmem:[#allocation2 + $0xb0] sm:$0x3]  ;;  %v3165_v1 = vsel %vm7755_vm5, %v3163_v43, %v3164_v38  ;;  %v3177_v30 = vrot.slane %v3175_v14, 4  ;;  %v5903_v37 = vrot.slane %v5883_v23, 10  ;;  %v7379_v38 = vld [vmem:[#allocation5 + $0x98] sm:$0xff]   ;;  %v884_v40 = vsel %vm7722_vm2, %v882_v21, %v883_v22 }
  0xa9   : > { %6846 = vmatprep.subr.bf16.mxu0 %v7378_v16  ;;  %v3171_v56 = vrot.slane %v5879_v46, 6  ;;  %v889_v36 = vrot.slane %v887_v27, 4  ;;  %v3185_v42 = vrot.slane %v5885_v28, 6  ;;  %v733_v43 = vld [vmem:[#allocation2 + $0x54] sm:$0xe]  ;;  %v3176_v44 = vsel %vm7755_vm5, %v5902_v26, %v3175_v14 }
  0xaa   : > { %6591 = vmatmul.mubr.bf16.gmra.mrb[28].mxu1 %v7370_v58  ;;  %v5635_v58 = vcombine.low %v860_v35, %v863_v41  ;;  %v3184_v41 = vrot.slane %v3182_v29, 4  ;;  %v894_v46 = vrot.slane %v734_v34, 5  ;;  %v5624_v60 = vrot.slane %v733_v43, 9  ;;  %v742_v21 = vld [vmem:[#allocation2 + $0x78] sm:$0xe] }
  0xab   : > { %6815 = vmatmul.mubr.bf16.gmra.mrb[12].mxu0 %v5912_v12  ;;  %6610 = vmatprep.mubr.bf16.mxu1 %v5633_v13  ;;  %v5622_v12 = vrot.slane %v727_v62, 9  ;;  %v5882_v13 = vld [vmem:[#allocation2 + $0xbc] sm:$0x3]  ;;  %v3172_v20 = vsel %vm7755_vm5, %v3170_v2, %v3171_v56  ;;  %v736_v56 = vld [vmem:[#allocation2 + $0x60] sm:$0xe]  ;;  %v897_v61 = vrot.slane %v735_v45, 5 }
  0xac   : > { %6818 = vmatprep.mubr.bf16.mxu0 %v5913_v17  ;;  %6847 = vmatpush3.bf16.msra.mxu0 %v7378_v16  ;;  %v5916_v16 = vcombine.low %v3162_v0, %v3165_v1  ;;  %v730_v17 = vld [vmem:[#allocation2 + $0x48] sm:$0xe]  ;;  %v3178_v31 = vrot.slane %v5882_v13, 6  ;;  %v737_v62 = vld [vmem:[#allocation2 + $0x64] sm:$0xf]  ;;  %v896_v2 = vrot.slane %v894_v46, 4  ;;  %v895_v19 = vsel %vm7722_vm2, %v5624_v60, %v894_v46 }
  0xad   : > { %6848 = vmatprep.subr.bf16.mxu0 %v7380_v25  ;;  %v5623_v32 = vrot.slane %v730_v17, 9  ;;  %v881_v39 = vsel %vm7722_vm2, %v5622_v12, %v880_v3  ;;  %v901_v3 = vrot.slane %v737_v62, 5  ;;  %v3192_v6 = vrot.slane %v5888_v54, 6  ;;  %v743_v22 = vld [vmem:[#allocation2 + $0x7c] sm:$0xf] }
  0xae   : > { %v5638_v53 = vcombine.low %v881_v39, %v884_v40  ;;  %v904_v14 = vrot.slane %v738_v63, 5  ;;  %v744_v26 = vld [vmem:[#allocation2 + $0x80] sm:$0x1]  ;;  %v5627_v34 = vrot.slane %v742_v21, 9  ;;  %v746_v39 = vld [vmem:[#allocation2 + $0x88] sm:$0xf] }
  0xaf   : > { %v888_v49 = vsel %vm7722_vm2, %v5623_v32, %v887_v27  ;;  %v903_v13 = vrot.slane %v901_v3, 4  ;;  %v915_v27 = vrot.slane %v743_v22, 5  ;;  %v7381_v32 = vld [vmem:[#allocation2 + $0x30] sm:$0xff]   ;;  %v7394_v40 = vld [vmem:[#allocation5 + $0xb8] sm:$0xff]   ;;  %v747_v46 = vld [vmem:[#allocation2 + $0x8c] sm:$0x1] }
  0xb0   : > { %6849 = vmatpush3.bf16.msra.mxu0 %v7380_v25  ;;  %v5637_v25 = vcombine.low %v874_v10, %v877_v11  ;;  %v5625_v10 = vrot.slane %v736_v56, 9  ;;  %v740_v11 = vld [vmem:[#allocation2 + $0x70] sm:$0xf]  ;;  %v749_v43 = vld [vmem:[#allocation2 + $0x94] sm:$0xf]  ;;  %v7385_v56 = vld [vmem:[#allocation2 + $0x48] sm:$0xff]  }
  0xb1   : > { %6882 = vmatprep.subr.bf16.mxu0 %v7842_v7  ;;  %v908_v17 = vrot.slane %v740_v11, 5  ;;  %v750_v54 = vld [vmem:[#allocation2 + $0x98] sm:$0x1]  ;;  %v754_v11 = vld [vmem:[#allocation2 + $0xa8] sm:$0xe] }
  0xb2   : > { %6611 = vmatmul.mubr.bf16.vlgmr.msra.gmra.mrb[0].mxu1 %v5634_v47  ;;  %v5887_v47 = vld [vmem:[#allocation2 + $0xd0] sm:$0xf]  ;;  %v902_v24 = vsel %vm7722_vm2, %v5625_v10, %v901_v3  ;;  %v932_v63 = vrot.slane %v750_v54, 5  ;;  %v751_v3 = vld [vmem:[#allocation2 + $0x9c] sm:$0xe] }
  0xb3   : > { %6819 = vmatmul.mubr.bf16.gmra.mrb[16].mxu0 %v5914_v48  ;;  %6643 = vmatpush3.bf16.msra.mxu1 %v7783_v9  ;;  %v3169_v9 = vsel %vm7755_vm5, %v5901_v55, %v3168_v50  ;;  %v3179_v48 = vsel %vm7755_vm5, %v3177_v30, %v3178_v31  ;;  %v891_v50 = vsel %vm7722_vm2, %v889_v36, %v890_v33  ;;  %v3189_v55 = vrot.slane %v5887_v47, 6  ;;  %v7390_v31 = vld [vmem:[#allocation5 + $0xb0] sm:$0xff]   ;;  %v1316_v54 = vld [vmem:[#allocation2 + $0x1c] sm:$0xf] }
  0xb4   : > { %6614 = vmatprep.mubr.bf16.mxu1 %v5635_v58  ;;  %6822 = vmatprep.mubr.bf16.mxu0 %v5915_v59  ;;  %v5917_v35 = vcombine.low %v3169_v9, %v3172_v20  ;;  %v3183_v58 = vsel %vm7755_vm5, %v5903_v37, %v3182_v29  ;;  %v3186_v59 = vsel %vm7755_vm5, %v3184_v41, %v3185_v42  ;;  %v910_v33 = vrot.slane %v908_v17, 4  ;;  %v745_v41 = vld [vmem:[#allocation2 + $0x84] sm:$0xe] }
  0xb5   : > { %6644 = vmatprep.subr.bf16.mxu1 %v7375_v51  ;;  %v5918_v0 = vcombine.low %v3176_v44, %v3179_v48  ;;  %v5639_v1 = vcombine.low %v888_v49, %v891_v50  ;;  %v5919_v12 = vcombine.low %v3183_v58, %v3186_v59  ;;  %v898_v9 = vsel %vm7722_vm2, %v896_v2, %v897_v61  ;;  %v748_v49 = vld [vmem:[#allocation2 + $0x90] sm:$0xe]  ;;  %v7890_v61 = vld [vmem:[#allocation5 + $0xc0] sm:$0xff]   ;;  %v755_v2 = vld [vmem:[#allocation2 + $0xac] sm:$0xf] }
  0xb6   : > { %v5640_v28 = vcombine.low %v895_v19, %v898_v9  ;;  %v918_v36 = vrot.slane %v744_v26, 5  ;;  %v922_v42 = vrot.slane %v746_v39, 5  ;;  %v916_v47 = vsel %vm7722_vm2, %v5627_v34, %v915_v27  ;;  %v757_v26 = vld [vmem:[#allocation2 + $0xb4] sm:$0xe]  ;;  %v1313_v39 = vld [vmem:[#allocation2 + $0x10] sm:$0xf] }
  0xb7   : > { %6645 = vmatpush3.bf16.msra.mxu1 %v7375_v51  ;;  %v5886_v51 = vld [vmem:[#allocation2 + $0xcc] sm:$0xc]  ;;  %v929_v50 = vrot.slane %v749_v43, 5  ;;  %v925_v58 = vrot.slane %v747_v46, 5  ;;  %v5629_v60 = vrot.slane %v748_v49, 9  ;;  %v5630_v19 = vrot.slane %v751_v3, 9 }
  0xb8   : > { %6646 = vmatprep.subr.bf16.mxu1 %v7377_v5  ;;  %v5904_v4 = vrot.slane %v5886_v51, 10  ;;  %v7383_v51 = vld [vmem:[#allocation2 + $0x3c] sm:$0xff]  }
  0xb9   : > { %v931_v62 = vrot.slane %v929_v50, 4  ;;  %v7393_v46 = vld [vmem:[#allocation2 + $0x78] sm:$0xff]  }
  0xba   : > { %6615 = vmatmul.mubr.bf16.gmra.mrb[4].mxu1 %v5636_v15  ;;  %v739_v15 = vld [vmem:[#allocation2 + $0x6c] sm:$0xe]  ;;  %v3190_v20 = vsel %vm7755_vm5, %v5904_v4, %v3189_v55  ;;  %v753_v4 = vld [vmem:[#allocation2 + $0xa4] sm:$0x1] }
  0xbb   : > { %6823 = vmatmul.mubr.bf16.gmra.mrb[20].mxu0 %v5916_v16  ;;  %6618 = vmatprep.mubr.bf16.mxu1 %v5637_v25  ;;  %v741_v16 = vld [vmem:[#allocation2 + $0x74] sm:$0x1]  ;;  %v905_v25 = vsel %vm7722_vm2, %v903_v13, %v904_v14  ;;  %v5626_v29 = vrot.slane %v739_v15, 9  ;;  %v930_v13 = vsel %vm7722_vm2, %v5629_v60, %v929_v50  ;;  %v933_v14 = vsel %vm7722_vm2, %v931_v62, %v932_v63  ;;  %v1317_v62 = vld [vmem:[#allocation2 + $0x20] sm:$0x3] }
  0xbc   : > { %6826 = vmatprep.mubr.bf16.mxu0 %v5917_v35  ;;  %6647 = vmatpush3.bf16.msra.mxu1 %v7377_v5  ;;  %v3191_v5 = vrot.slane %v3189_v55, 4  ;;  %v911_v30 = vrot.slane %v741_v16, 5  ;;  %v917_v35 = vrot.slane %v915_v27, 4  ;;  %v7392_v15 = vld [vmem:[#allocation5 + $0x1d0] sm:$0xff]   ;;  %v943_v16 = vrot.slane %v755_v2, 5  ;;  %v7396_v27 = vld [vmem:[#allocation5 + $0x1d8] sm:$0xff]  }
  0xbd   : > { %6648 = vmatprep.subr.bf16.mxu1 %v7379_v38  ;;  %v909_v44 = vsel %vm7722_vm2, %v5626_v29, %v908_v17  ;;  %v5645_v9 = vcombine.low %v930_v13, %v933_v14  ;;  %v939_v22 = vrot.slane %v753_v4, 5  ;;  %v759_v29 = vld [vmem:[#allocation2 + $0xbc] sm:$0x1]  ;;  %v1449_v50 = vrot.slane %v1313_v39, 6  ;;  %v7397_v2 = vld [vmem:[#allocation2 + $0x90] sm:$0xff]  }
  0xbe   : > { %v3193_v23 = vsel %vm7755_vm5, %v3191_v5, %v3192_v6  ;;  %v912_v45 = vsel %vm7722_vm2, %v910_v33, %v911_v30  ;;  %v919_v48 = vsel %vm7722_vm2, %v917_v35, %v918_v36  ;;  %v1309_v33 = vld [vmem:[#allocation2] sm:$0xc]  ;;  %v953_v43 = vrot.slane %v759_v29, 5  ;;  %v1318_v13 = vld [vmem:[#allocation2 + $0x24] sm:$0xc] }
  0xbf   : > { %v5920_v37 = vcombine.low %v3190_v20, %v3193_v23  ;;  %v5642_v55 = vcombine.low %v909_v44, %v912_v45  ;;  %v5643_v59 = vcombine.low %v916_v47, %v919_v48  ;;  %v7389_v20 = vld [vmem:[#allocation2 + $0x60] sm:$0xff]   ;;  %v5631_v23 = vrot.slane %v754_v11, 9  ;;  %v7391_v44 = vld [vmem:[#allocation2 + $0x6c] sm:$0xff]   ;;  %v1322_v14 = vld [vmem:[#allocation2 + $0x34] sm:$0xf] }
  0xc0   : > { %6649 = vmatpush3.bf16.msra.mxu1 %v7379_v38  ;;  %v5641_v38 = vcombine.low %v902_v24, %v905_v25  ;;  %v758_v24 = vld [vmem:[#allocation2 + $0xb8] sm:$0xf]  ;;  %v5657_v47 = vrot.slane %v1309_v33, 10  ;;  %v1451_v4 = vrot.slane %v1449_v50, 4  ;;  %v1325_v29 = vld [vmem:[#allocation2 + $0x40] sm:$0xf] }
  0xc1   : > { %6650 = vmatprep.subr.bf16.mxu1 %v7382_v57  ;;  %v950_v30 = vrot.slane %v758_v24, 5  ;;  %v944_v34 = vsel %vm7722_vm2, %v5631_v23, %v943_v16  ;;  %v5660_v24 = vrot.slane %v1318_v13, 10  ;;  %v7951_v13 = vld [vmem:[#allocation2 + $0x30] sm:$0xe] }
  0xc2   : > { %6619 = vmatmul.mubr.bf16.gmra.mrb[8].mxu1 %v5638_v53  ;;  %v5628_v53 = vrot.slane %v745_v41, 9  ;;  %v5632_v41 = vrot.slane %v757_v26, 9 }
  0xc3   : > { %6827 = vmatmul.mubr.bf16.gmra.mrb[24].mxu0 %v5918_v0  ;;  %6622 = vmatprep.mubr.bf16.mxu1 %v5639_v1  ;;  %v752_v0 = vld [vmem:[#allocation2 + $0xa0] sm:$0xf]  ;;  %v7388_v1 = vld [vmem:[#allocation5 + $0x1c8] sm:$0xff]  }
  0xc4   : > { %6830 = vmatprep.mubr.bf16.mxu0 %v5919_v12  ;;  %6651 = vmatpush3.bf16.msra.mxu1 %v7382_v57  ;;  %v924_v57 = vrot.slane %v922_v42, 4  ;;  %v923_v5 = vsel %vm7722_vm2, %v5628_v53, %v922_v42  ;;  %v936_v10 = vrot.slane %v752_v0, 5  ;;  %v756_v12 = vld [vmem:[#allocation2 + $0xb0] sm:$0x1]  ;;  %v952_v42 = vrot.slane %v950_v30, 4  ;;  %v7395_v0 = vld [vmem:[#allocation2 + $0x84] sm:$0xff]  }
  0xc5   : > { %6652 = vmatprep.subr.bf16.mxu1 %v7386_v18  ;;  %v946_v25 = vrot.slane %v756_v12, 5  ;;  %v1312_v53 = vld [vmem:[#allocation2 + $0xc] sm:$0xc]  ;;  %v1459_v12 = vrot.slane %v1317_v62, 6 }
  0xc6   : > { %v926_v6 = vsel %vm7722_vm2, %v924_v57, %v925_v58  ;;  %v938_v21 = vrot.slane %v936_v10, 4  ;;  %v1314_v57 = vld [vmem:[#allocation2 + $0x14] sm:$0x3]  ;;  %v1315_v58 = vld [vmem:[#allocation2 + $0x18] sm:$0xc]  ;;  %v5658_v3 = vrot.slane %v1312_v53, 10 }
  0xc7   : > { %v5644_v17 = vcombine.low %v923_v5, %v926_v6  ;;  %v1452_v5 = vrot.slane %v1314_v57, 6  ;;  %v5659_v6 = vrot.slane %v1315_v58, 10  ;;  %v7405_v57 = vld [vmem:[#allocation2 + $0xc0] sm:$0xff]  }
  0xc8   : > { %6653 = vmatpush3.bf16.msra.mxu1 %v7386_v18  ;;  %v7387_v18 = vld [vmem:[#allocation2 + $0x54] sm:$0xff]   ;;  %v7939_v58 = vld [vmem:[#allocation2 + $0x64] sm:$0xf] }
  0xc9   : > { %6654 = vmatprep.subr.bf16.mxu1 %v7390_v31 }
  0xca   : > { %6623 = vmatmul.mubr.bf16.gmra.mrb[12].mxu1 %v5640_v28  ;;  %v1310_v28 = vld [vmem:[#allocation2 + $0x4] sm:$0xf] }
  0xcb   : > { %6831 = vmatmul.mubr.bf16.gmra.mrb[28].mxu0 %v5920_v37  ;;  %6626 = vmatprep.mubr.bf16.mxu1 %v5641_v38  ;;  %v1442_v36 = vrot.slane %v1310_v28, 6  ;;  %v7400_v37 = vld [vmem:[#allocation5 + $0x1e0] sm:$0xff]   ;;  %v1311_v38 = vld [vmem:[#allocation2 + $0x8] sm:$0x3] }
  0xcc   : > { %6850 = vmatprep.mubr.bf16.mxu0 %v7381_v32  ;;  %6655 = vmatpush3.bf16.msra.mxu1 %v7390_v31  ;;  %v937_v31 = vsel %vm7722_vm2, %v5630_v19, %v936_v10  ;;  %v940_v32 = vsel %vm7722_vm2, %v938_v21, %v939_v22  ;;  %v1445_v49 = vrot.slane %v1311_v38, 6  ;;  %v1319_v10 = vld [vmem:[#allocation2 + $0x28] sm:$0xf]  ;;  %v1321_v19 = vld [vmem:[#allocation2 + $0x30] sm:$0xc]  ;;  %v1453_v21 = vsel %vm7755_vm5, %v1451_v4, %v1452_v5 }
  0xcd   : > { %6656 = vmatprep.subr.bf16.mxu1 %v7394_v40  ;;  %v1444_v48 = vrot.slane %v1442_v36, 4  ;;  %v1323_v22 = vld [vmem:[#allocation2 + $0x38] sm:$0x3]  ;;  %v5661_v28 = vrot.slane %v1321_v19, 10  ;;  %v1477_v38 = vrot.slane %v1325_v29, 6 }
  0xce   : > { %v1473_v33 = vrot.slane %v1323_v22, 6  ;;  %v1333_v4 = vld [vmem:[#allocation2 + $0x60] sm:$0xc]  ;;  %v1335_v5 = vld [vmem:[#allocation2 + $0x68] sm:$0x3] }
  0xcf   : > { %v1446_v60 = vsel %vm7755_vm5, %v1444_v48, %v1445_v49  ;;  %v1329_v48 = vld [vmem:[#allocation2 + $0x50] sm:$0x3]  ;;  %v7935_v49 = vld [vmem:[#allocation2 + $0x58] sm:$0xf]  ;;  %v7413_v22 = vld [vmem:[#allocation5 + $0xe0] sm:$0xff]  }
  0xd0   : > { %6657 = vmatpush3.bf16.msra.mxu1 %v7394_v40  ;;  %v5646_v40 = vcombine.low %v937_v31, %v940_v32  ;;  %v7401_v31 = vld [vmem:[#allocation2 + $0xa8] sm:$0xff]  }
  0xd1   : > { %6690 = vmatprep.subr.bf16.mxu1 %v7890_v61 }
  0xd2   : > { %6627 = vmatmul.mubr.bf16.gmra.mrb[16].mxu1 %v5642_v55  ;;  %v951_v55 = vsel %vm7722_vm2, %v5632_v41, %v950_v30  ;;  %v1326_v41 = vld [vmem:[#allocation2 + $0x44] sm:$0x3] }
  0xd3   : > { %6851 = vmatmul.mubr.bf16.vlgmr.msra.gmra.mrb[0].mxu0 %v7383_v51  ;;  %6630 = vmatprep.mubr.bf16.mxu1 %v5643_v59  ;;  %v7404_v51 = vld [vmem:[#allocation5 + $0x1e8] sm:$0xff]   ;;  %v1443_v59 = vsel %vm7755_vm5, %v5657_v47, %v1442_v36  ;;  %v7412_v36 = vld [vmem:[#allocation5 + $0x1f8] sm:$0xff]   ;;  %v1480_v53 = vrot.slane %v1326_v41, 6 }
  0xd4   : > { %6883 = vmatpush3.bf16.msra.mxu0 %v7842_v7  ;;  %6854 = vmatprep.mubr.bf16.mxu0 %v7385_v56  ;;  %v945_v7 = vrot.slane %v943_v16, 4  ;;  %v954_v56 = vsel %vm7722_vm2, %v952_v42, %v953_v43  ;;  %v5673_v11 = vcombine.low %v1443_v59, %v1446_v60  ;;  %v1320_v16 = vld [vmem:[#allocation2 + $0x2c] sm:$0x3]  ;;  %v1327_v47 = vld [vmem:[#allocation2 + $0x48] sm:$0xc] }
  0xd5   : > { %6884 = vmatprep.subr.bf16.mxu0 %v7388_v1  ;;  %v5648_v63 = vcombine.low %v951_v55, %v954_v56  ;;  %v7941_v59 = vld [vmem:[#allocation2 + $0x34] sm:$0xf]  ;;  %v5663_v60 = vrot.slane %v1327_v47, 10 }
  0xd6   : > { %v947_v35 = vsel %vm7722_vm2, %v945_v7, %v946_v25  ;;  %v7399_v7 = vld [vmem:[#allocation2 + $0x9c] sm:$0xff]  }
  0xd7   : > { %v5647_v45 = vcombine.low %v944_v34, %v947_v35  ;;  %v1328_v35 = vld [vmem:[#allocation2 + $0x4c] sm:$0xf] }
  0xd8   : > { %6885 = vmatpush3.bf16.msra.mxu0 %v7388_v1  ;;  %v1456_v1 = vrot.slane %v1316_v54, 6  ;;  %v7937_v54 = vld [vmem:[#allocation5 + $0x200] sm:$0xff]  }
  0xd9   : > { %6886 = vmatprep.subr.bf16.mxu0 %v7392_v15 }
  0xda   : > { %6631 = vmatmul.mubr.bf16.gmra.mrb[20].mxu1 %v5644_v17  ;;  %v1458_v17 = vrot.slane %v1456_v1, 4  ;;  %v1457_v23 = vsel %vm7755_vm5, %v5659_v6, %v1456_v1  ;;  %v1491_v1 = vrot.slane %v7935_v49, 6  ;;  %v1498_v6 = vrot.slane %v7939_v58, 6  ;;  %v5993_v49 = vld [vmem:[#allocation2 + $0x50] sm:$0x1] }
  0xdb   : > { %6855 = vmatmul.mubr.bf16.gmra.mrb[4].mxu0 %v7387_v18  ;;  %6634 = vmatprep.mubr.bf16.mxu1 %v5645_v9  ;;  %v1463_v18 = vrot.slane %v1319_v10, 6  ;;  %v1470_v9 = vrot.slane %v1322_v14, 6  ;;  %v4132_v10 = vrot.slane %v7941_v59, 5  ;;  %v7953_v14 = vld [vmem:[#allocation2 + $0x38] sm:$0x1] }
  0xdc   : > { %6858 = vmatprep.mubr.bf16.mxu0 %v7389_v20  ;;  %6887 = vmatpush3.bf16.msra.mxu0 %v7392_v15  ;;  %v7408_v15 = vld [vmem:[#allocation5 + $0x1f0] sm:$0xff]   ;;  %v1450_v20 = vsel %vm7755_vm5, %v5658_v3, %v1449_v50  ;;  %v1460_v25 = vsel %vm7755_vm5, %v1458_v17, %v1459_v12  ;;  %v1332_v3 = vld [vmem:[#allocation2 + $0x5c] sm:$0x3] }
  0xdd   : > { %6888 = vmatprep.subr.bf16.mxu0 %v7396_v27  ;;  %v1465_v26 = vrot.slane %v1463_v18, 4  ;;  %v5674_v30 = vcombine.low %v1450_v20, %v1453_v21  ;;  %v1472_v32 = vrot.slane %v1470_v9, 4  ;;  %v5675_v34 = vcombine.low %v1457_v23, %v1460_v25  ;;  %v7403_v50 = vld [vmem:[#allocation2 + $0xb4] sm:$0xff]   ;;  %v7959_v21 = vld [vmem:[#allocation2 + $0x70] sm:$0xf] }
  0xde   : > { %v1464_v39 = vsel %vm7755_vm5, %v5660_v24, %v1463_v18  ;;  %v1471_v43 = vsel %vm7755_vm5, %v5661_v28, %v1470_v9  ;;  %v1494_v17 = vrot.slane %v1332_v3, 6  ;;  %v5665_v18 = vrot.slane %v1333_v4, 10  ;;  %v7961_v23 = vld [vmem:[#allocation2 + $0x40] sm:$0xf]  ;;  %v7407_v24 = vld [vmem:[#allocation2 + $0xcc] sm:$0xff]  }
  0xdf   : > { %v1501_v20 = vrot.slane %v1335_v5, 6  ;;  %v6033_v25 = vrot.slane %v7951_v13, 9  ;;  %v7967_v28 = vld [vmem:[#allocation2 + $0x6c] sm:$0xc]  ;;  %v4149_v4 = vrot.slane %v5993_v49, 5 }
  0xe0   : > { %6889 = vmatpush3.bf16.msra.mxu0 %v7396_v27  ;;  %v1466_v27 = vrot.slane %v1320_v16, 6  ;;  %v1493_v16 = vrot.slane %v1491_v1, 4  ;;  %v8000_v5 = vld [vmem:[#allocation2 + $0x84] sm:$0xc]  ;;  %v8004_v13 = vld [vmem:[#allocation2 + $0x8c] sm:$0x3] }
  0xe1   : > { %6890 = vmatprep.subr.bf16.mxu0 %v7400_v37 }
  0xe2   : > { %6635 = vmatmul.mubr.bf16.gmra.mrb[24].mxu1 %v5646_v40  ;;  %v1324_v40 = vld [vmem:[#allocation2 + $0x3c] sm:$0xc]  ;;  %v1467_v42 = vsel %vm7755_vm5, %v1465_v26, %v1466_v27  ;;  %v4134_v26 = vrot.slane %v4132_v10, 4  ;;  %v4135_v27 = vrot.slane %v7953_v14, 5 }
  0xe3   : > { %6859 = vmatmul.mubr.bf16.gmra.mrb[8].mxu0 %v7391_v44  ;;  %6638 = vmatprep.mubr.bf16.mxu1 %v5647_v45  ;;  %v1474_v44 = vsel %vm7755_vm5, %v1472_v32, %v1473_v33  ;;  %v7406_v45 = vld [vmem:[#allocation5 + $0xd0] sm:$0xff]   ;;  %v5676_v55 = vcombine.low %v1464_v39, %v1467_v42  ;;  %v5988_v32 = vld [vmem:[#allocation2 + $0x3c] sm:$0xe]  ;;  %v7969_v33 = vld [vmem:[#allocation2 + $0x44] sm:$0x1]  ;;  %v1495_v42 = vsel %vm7755_vm5, %v1493_v16, %v1494_v17 }
  0xe4   : > { %6862 = vmatprep.mubr.bf16.mxu0 %v7393_v46  ;;  %6891 = vmatpush3.bf16.msra.mxu0 %v7400_v37  ;;  %v7402_v37 = vld [vmem:[#allocation5 + $0xc8] sm:$0xff]   ;;  %v1484_v46 = vrot.slane %v1328_v35, 6  ;;  %v5677_v56 = vcombine.low %v1471_v43, %v1474_v44  ;;  %v1339_v39 = vld [vmem:[#allocation2 + $0x78] sm:$0xc]  ;;  %v8011_v17 = vld [vmem:[#allocation2 + $0x5c] sm:$0x1] }
  0xe5   : > { %6892 = vmatprep.subr.bf16.mxu0 %v7404_v51  ;;  %v5991_v44 = vld [vmem:[#allocation2 + $0x48] sm:$0xe]  ;;  %v5667_v58 = vrot.slane %v1339_v39, 10 }
  0xe6   : > { %v1486_v62 = vrot.slane %v1484_v46, 4  ;;  %v1485_v19 = vsel %vm7755_vm5, %v5663_v60, %v1484_v46  ;;  %v1499_v46 = vsel %vm7755_vm5, %v5665_v18, %v1498_v6 }
  0xe8   : > { %6893 = vmatpush3.bf16.msra.mxu0 %v7404_v51  ;;  %v1479_v51 = vrot.slane %v1477_v38, 4 }
  0xe9   : > { %6894 = vmatprep.subr.bf16.mxu0 %v7408_v15 }
  0xea   : > { %6639 = vmatmul.mubr.bf16.gmra.mrb[28].mxu1 %v5648_v63  ;;  %v1487_v63 = vrot.slane %v1329_v48, 6  ;;  %v1481_v12 = vsel %vm7755_vm5, %v1479_v51, %v1480_v53  ;;  %v5666_v48 = vrot.slane %v7967_v28, 10  ;;  %v6034_v53 = vrot.slane %v5988_v32, 9  ;;  %v5997_v28 = vld [vmem:[#allocation2 + $0x60] sm:$0xe] }
  0xeb   : > { %6863 = vmatmul.mubr.bf16.gmra.mrb[12].mxu0 %v7395_v0  ;;  %6658 = vmatprep.mubr.bf16.mxu1 %v5673_v11  ;;  %v1330_v0 = vld [vmem:[#allocation2 + $0x54] sm:$0xc]  ;;  %v5999_v32 = vld [vmem:[#allocation2 + $0x68] sm:$0x1] }
  0xec   : > { %6866 = vmatprep.mubr.bf16.mxu0 %v7397_v2  ;;  %6895 = vmatpush3.bf16.msra.mxu0 %v7408_v15  ;;  %v7410_v2 = vld [vmem:[#allocation5 + $0xd8] sm:$0xff]   ;;  %v5664_v15 = vrot.slane %v1330_v0, 10  ;;  %v1488_v9 = vsel %vm7755_vm5, %v1486_v62, %v1487_v63  ;;  %v6035_v62 = vrot.slane %v5991_v44, 9  ;;  %v7417_v63 = vld [vmem:[#allocation5 + $0xf0] sm:$0xff]   ;;  %v7411_v0 = vld [vmem:[#allocation2 + $0xe4] sm:$0xff]  }
  0xed   : > { %6896 = vmatprep.subr.bf16.mxu0 %v7412_v36  ;;  %v5679_v35 = vcombine.low %v1485_v19, %v1488_v9  ;;  %v8014_v19 = vld [vmem:[#allocation2 + $0x64] sm:$0xf]  ;;  %v7419_v9 = vld [vmem:[#allocation5 + $0xf8] sm:$0xff]  }
  0xee   : > { %v1492_v41 = vsel %vm7755_vm5, %v5664_v15, %v1491_v1  ;;  %v4133_v1 = vsel %vm7722_vm2, %v6033_v25, %v4132_v10  ;;  %v8007_v15 = vld [vmem:[#allocation2 + $0x54] sm:$0xe]  ;;  %v5668_v25 = vrot.slane %v8000_v5, 10 }
  0xef   : > { %v8009_v10 = vld [vmem:[#allocation2 + $0x94] sm:$0xf] }
  0xf0   : > { %6897 = vmatpush3.bf16.msra.mxu0 %v7412_v36  ;;  %v1505_v36 = vrot.slane %v7959_v21, 6 }
  0xf1   : > { %6930 = vmatprep.subr.bf16.mxu0 %v7937_v54 }
  0xf2   : > { %6659 = vmatmul.mubr.bf16.vlgmr.msra.gmra.mrb[0].mxu1 %v5674_v30  ;;  %v7409_v30 = vld [vmem:[#allocation2 + $0xd8] sm:$0xff]  }
  0xf3   : > { %6867 = vmatmul.mubr.bf16.gmra.mrb[16].mxu0 %v7399_v7  ;;  %6691 = vmatpush3.bf16.msra.mxu1 %v7890_v61  ;;  %v5662_v61 = vrot.slane %v1324_v40, 10  ;;  %v1500_v7 = vrot.slane %v1498_v6, 4  ;;  %v7977_v40 = vld [vmem:[#allocation2 + $0x80] sm:$0x3]  ;;  %v8002_v6 = vld [vmem:[#allocation2 + $0x58] sm:$0xf] }
  0xf4   : > { %6662 = vmatprep.mubr.bf16.mxu1 %v5675_v34  ;;  %6870 = vmatprep.mubr.bf16.mxu0 %v7401_v31  ;;  %v1338_v31 = vld [vmem:[#allocation2 + $0x74] sm:$0x3]  ;;  %v7971_v34 = vld [vmem:[#allocation2 + $0x7c] sm:$0xf]  ;;  %v1515_v60 = vrot.slane %v7977_v40, 6  ;;  %v4153_v18 = vrot.slane %v8002_v6, 5 }
  0xf5   : > { %6692 = vmatprep.subr.bf16.mxu1 %v7402_v37  ;;  %v1478_v11 = vsel %vm7755_vm5, %v5662_v61, %v1477_v38  ;;  %v7975_v38 = vld [vmem:[#allocation2 + $0x4c] sm:$0xf]  ;;  %v1512_v43 = vrot.slane %v7971_v34, 6  ;;  %v1502_v47 = vsel %vm7755_vm5, %v1500_v7, %v1501_v20  ;;  %v1507_v61 = vrot.slane %v1505_v36, 4  ;;  %v6004_v6 = vld [vmem:[#allocation2 + $0x7c] sm:$0xf] }
  0xf6   : > { %v5678_v29 = vcombine.low %v1478_v11, %v1481_v12  ;;  %v1508_v51 = vrot.slane %v1338_v31, 6  ;;  %v5680_v11 = vcombine.low %v1492_v41, %v1495_v42  ;;  %v5681_v59 = vcombine.low %v1499_v46, %v1502_v47  ;;  %v1348_v46 = vld [vmem:[#allocation2 + $0x9c] sm:$0xc]  ;;  %v8042_v47 = vld [vmem:[#allocation2 + $0x70] sm:$0xf] }
  0xf7   : > { %6693 = vmatpush3.bf16.msra.mxu1 %v7402_v37  ;;  %v4139_v37 = vrot.slane %v7961_v23, 5  ;;  %v1514_v3 = vrot.slane %v1512_v43, 4  ;;  %v1506_v20 = vsel %vm7755_vm5, %v5666_v48, %v1505_v36  ;;  %v1345_v23 = vld [vmem:[#allocation2 + $0x90] sm:$0xc]  ;;  %v1513_v7 = vsel %vm7755_vm5, %v5667_v58, %v1512_v43  ;;  %v1352_v58 = vld [vmem:[#allocation2 + $0xac] sm:$0xf] }
  0xf8   : > { %6694 = vmatprep.subr.bf16.mxu1 %v7406_v45  ;;  %v1509_v21 = vsel %vm7755_vm5, %v1507_v61, %v1508_v51  ;;  %v1522_v31 = vrot.slane %v8004_v13, 6  ;;  %v6036_v36 = vrot.slane %v8007_v15, 9  ;;  %v4155_v39 = vrot.slane %v4153_v18, 4  ;;  %v1350_v61 = vld [vmem:[#allocation2 + $0xa4] sm:$0x3] }
  0xf9   : > { %v5669_v40 = vrot.slane %v1345_v23, 10  ;;  %v6037_v42 = vrot.slane %v5997_v28, 9  ;;  %v5682_v43 = vcombine.low %v1506_v20, %v1509_v21  ;;  %v1540_v13 = vrot.slane %v1352_v58, 6  ;;  %v1355_v28 = vld [vmem:[#allocation2 + $0xb8] sm:$0xf] }
  0xfa   : > { %6663 = vmatmul.mubr.bf16.gmra.mrb[4].mxu1 %v5676_v55  ;;  %v4142_v55 = vrot.slane %v7969_v33, 5  ;;  %v4160_v33 = vrot.slane %v8014_v19, 5  ;;  %v4174_v20 = vrot.slane %v6004_v6, 5  ;;  %v6011_v58 = vld [vmem:[#allocation2 + $0x98] sm:$0x1] }
  0xfb   : > { %6871 = vmatmul.mubr.bf16.gmra.mrb[20].mxu0 %v7403_v50  ;;  %6666 = vmatprep.mubr.bf16.mxu1 %v5677_v56  ;;  %v4146_v50 = vrot.slane %v7975_v38, 5  ;;  %v7991_v56 = vld [vmem:[#allocation2 + $0x88] sm:$0xf]  ;;  %v8040_v38 = vld [vmem:[#allocation2 + $0xa0] sm:$0xf]  ;;  %v4191_v6 = vrot.slane %v6011_v58, 5 }
  0xfc   : > { %6874 = vmatprep.mubr.bf16.mxu0 %v7405_v57  ;;  %6695 = vmatpush3.bf16.msra.mxu1 %v7406_v45  ;;  %v7415_v45 = vld [vmem:[#allocation5 + $0xe8] sm:$0xff]   ;;  %v4141_v57 = vrot.slane %v4139_v37, 4  ;;  %v1519_v14 = vrot.slane %v7991_v56, 6  ;;  %v1533_v51 = vrot.slane %v8040_v38, 6  ;;  %v4161_v56 = vsel %vm7722_vm2, %v6037_v42, %v4160_v33  ;;  %v1356_v38 = vld [vmem:[#allocation2 + $0xbc] sm:$0x3] }
  0xfd   : > { %6696 = vmatprep.subr.bf16.mxu1 %v7410_v2  ;;  %v4148_v12 = vrot.slane %v4146_v50, 4 }
  0xfe   : > { %v1535_v15 = vrot.slane %v1533_v51, 4 }
  0xff   : > { %v4150_v34 = vsel %vm7722_vm2, %v4148_v12, %v4149_v4  ;;  %v4154_v4 = vsel %vm7722_vm2, %v6036_v36, %v4153_v18  ;;  %v5670_v12 = vrot.slane %v1348_v46, 10  ;;  %v6006_v46 = vld [vmem:[#allocation2 + $0x84] sm:$0xe] }
 0x100   : > { %6697 = vmatpush3.bf16.msra.mxu1 %v7410_v2  ;;  %v4136_v2 = vsel %vm7722_vm2, %v4134_v26, %v4135_v27  ;;  %v1347_v26 = vld [vmem:[#allocation2 + $0x98] sm:$0x3]  ;;  %v1526_v27 = vrot.slane %v8009_v10, 6  ;;  %v1536_v10 = vrot.slane %v1350_v61, 6  ;;  %v1550_v61 = vrot.slane %v1356_v38, 6 }
 0x101   : > { %6698 = vmatprep.subr.bf16.mxu1 %v7413_v22  ;;  %v6049_v16 = vcombine.low %v4133_v1, %v4136_v2  ;;  %v1529_v41 = vrot.slane %v1347_v26, 6  ;;  %v8046_v1 = vld [vmem:[#allocation5 + $0x100] sm:$0xff]   ;;  %v1520_v2 = vsel %vm7755_vm5, %v5668_v25, %v1519_v14  ;;  %v1542_v25 = vrot.slane %v1540_v13, 4 }
 0x102   : > { %6667 = vmatmul.mubr.bf16.gmra.mrb[8].mxu1 %v5678_v29  ;;  %v1516_v29 = vsel %vm7755_vm5, %v1514_v3, %v1515_v60  ;;  %v1528_v44 = vrot.slane %v1526_v27, 4  ;;  %v7416_v60 = vld [vmem:[#allocation5 + $0x208] sm:$0xff]  }
 0x103   : > { %6875 = vmatmul.mubr.bf16.gmra.mrb[24].mxu0 %v7407_v24  ;;  %6670 = vmatprep.mubr.bf16.mxu1 %v5679_v35  ;;  %v4143_v24 = vsel %vm7722_vm2, %v4141_v57, %v4142_v55  ;;  %v1521_v35 = vrot.slane %v1519_v14, 4  ;;  %v5683_v49 = vcombine.low %v1513_v7, %v1516_v29  ;;  %v6000_v55 = vld [vmem:[#allocation2 + $0x6c] sm:$0xe]  ;;  %v6002_v57 = vld [vmem:[#allocation2 + $0x74] sm:$0x1]  ;;  %v7420_v29 = vld [vmem:[#allocation5 + $0x218] sm:$0xff]  }
 0x104   : > { %6878 = vmatprep.mubr.bf16.mxu0 %v7409_v30  ;;  %6699 = vmatpush3.bf16.msra.mxu1 %v7413_v22  ;;  %v4140_v22 = vsel %vm7722_vm2, %v6034_v53, %v4139_v37  ;;  %v4147_v30 = vsel %vm7722_vm2, %v6035_v62, %v4146_v50  ;;  %v4156_v37 = vrot.slane %v8011_v17, 5  ;;  %v4162_v50 = vrot.slane %v4160_v33, 4  ;;  %v6003_v17 = vld [vmem:[#allocation2 + $0x78] sm:$0xe] }
 0x105   : > { %6700 = vmatprep.subr.bf16.mxu1 %v7415_v45  ;;  %v6050_v48 = vcombine.low %v4140_v22, %v4143_v24  ;;  %v6051_v53 = vcombine.low %v4147_v30, %v4150_v34  ;;  %v4167_v62 = vrot.slane %v8042_v47, 5  ;;  %v1523_v3 = vsel %vm7755_vm5, %v1521_v35, %v1522_v31  ;;  %v6007_v31 = vld [vmem:[#allocation2 + $0x88] sm:$0xf]  ;;  %v6008_v47 = vld [vmem:[#allocation2 + $0x8c] sm:$0x1] }
 0x106   : > { %v4157_v5 = vsel %vm7722_vm2, %v4155_v39, %v4156_v37  ;;  %v1530_v14 = vsel %vm7755_vm5, %v1528_v44, %v1529_v41  ;;  %v6038_v18 = vrot.slane %v6000_v55, 9  ;;  %v4170_v19 = vrot.slane %v6002_v57, 5 }
 0x107   : > { %v5684_v21 = vcombine.low %v1520_v2, %v1523_v3  ;;  %v4169_v22 = vrot.slane %v4167_v62, 4  ;;  %v6052_v24 = vcombine.low %v4154_v4, %v4157_v5  ;;  %v6039_v26 = vrot.slane %v6003_v17, 9  ;;  %v6013_v3 = vld [vmem:[#allocation2 + $0xa0] sm:$0xf] }
 0x108   : > { %6701 = vmatpush3.bf16.msra.mxu1 %v7415_v45  ;;  %v4163_v45 = vrot.slane %v5999_v32, 5  ;;  %v1534_v32 = vsel %vm7755_vm5, %v5670_v12, %v1533_v51  ;;  %v4176_v33 = vrot.slane %v4174_v20, 4  ;;  %v1537_v35 = vsel %vm7755_vm5, %v1535_v15, %v1536_v10  ;;  %v6012_v10 = vld [vmem:[#allocation2 + $0x9c] sm:$0xe] }
 0x109   : > { %6702 = vmatprep.subr.bf16.mxu1 %v7417_v63  ;;  %v4168_v36 = vsel %vm7722_vm2, %v6038_v18, %v4167_v62  ;;  %v4171_v37 = vsel %vm7722_vm2, %v4169_v22, %v4170_v19  ;;  %v4181_v44 = vrot.slane %v6007_v31, 5  ;;  %v6040_v62 = vrot.slane %v6006_v46, 9  ;;  %v6015_v19 = vld [vmem:[#allocation2 + $0xa8] sm:$0xe]  ;;  %v7432_v31 = vld [vmem:[#allocation5 + $0x238] sm:$0xff]   ;;  %v7424_v46 = vld [vmem:[#allocation2 + $0x30] sm:$0xff]  }
 0x10a   : > { %6671 = vmatmul.mubr.bf16.gmra.mrb[12].mxu1 %v5680_v11  ;;  %v1527_v11 = vsel %vm7755_vm5, %v5669_v40, %v1526_v27  ;;  %v1354_v27 = vld [vmem:[#allocation2 + $0xb4] sm:$0xc]  ;;  %v6054_v55 = vcombine.low %v4168_v36, %v4171_v37 }
 0x10b   : > { %6879 = vmatmul.mubr.bf16.gmra.mrb[28].mxu0 %v7411_v0  ;;  %6674 = vmatprep.mubr.bf16.mxu1 %v5681_v59  ;;  %v1353_v0 = vld [vmem:[#allocation2 + $0xb0] sm:$0x3]  ;;  %v4164_v59 = vsel %vm7722_vm2, %v4162_v50, %v4163_v45  ;;  %v5685_v7 = vcombine.low %v1527_v11, %v1530_v14  ;;  %v5672_v39 = vrot.slane %v1354_v27, 10  ;;  %v6010_v40 = vld [vmem:[#allocation2 + $0x94] sm:$0xf]  ;;  %v7423_v45 = vld [vmem:[#allocation5 + $0x220] sm:$0xff]  }
 0x10c   : > { %6898 = vmatprep.mubr.bf16.mxu0 %v6049_v16  ;;  %6703 = vmatpush3.bf16.msra.mxu1 %v7417_v63  ;;  %v1351_v63 = vld [vmem:[#allocation2 + $0xa8] sm:$0xc]  ;;  %v7418_v16 = vld [vmem:[#allocation5 + $0x210] sm:$0xff]   ;;  %v1543_v23 = vrot.slane %v1353_v0, 6  ;;  %v6053_v30 = vcombine.low %v4161_v56, %v4164_v59  ;;  %v4188_v51 = vrot.slane %v6010_v40, 5  ;;  %v4184_v0 = vrot.slane %v6008_v47, 5 }
 0x10d   : > { %6704 = vmatprep.subr.bf16.mxu1 %v7419_v9  ;;  %v7426_v11 = vld [vmem:[#allocation5 + $0x228] sm:$0xff]   ;;  %v4195_v14 = vrot.slane %v6013_v3, 5  ;;  %v4182_v59 = vsel %vm7722_vm2, %v6040_v62, %v4181_v44  ;;  %v6043_v27 = vrot.slane %v6015_v19, 9  ;;  %v6021_v40 = vld [vmem:[#allocation2 + $0xc0] sm:$0xe] }
 0x10e   : > { %v1544_v42 = vsel %vm7755_vm5, %v1542_v25, %v1543_v23  ;;  %v4190_v5 = vrot.slane %v4188_v51, 4  ;;  %v6016_v56 = vld [vmem:[#allocation2 + $0xac] sm:$0xf]  ;;  %v6074_v19 = vld [vmem:[#allocation2 + $0x34] sm:$0xf] }
 0x110   : > { %6705 = vmatpush3.bf16.msra.mxu1 %v7419_v9  ;;  %v5671_v9 = vrot.slane %v1351_v63, 10  ;;  %v4183_v63 = vrot.slane %v4181_v44, 4  ;;  %v4192_v18 = vsel %vm7722_vm2, %v4190_v5, %v4191_v6  ;;  %v6027_v5 = vld [vmem:[#allocation2 + $0xd8] sm:$0xe]  ;;  %v6029_v6 = vld [vmem:[#allocation2 + $0xe0] sm:$0x1] }
 0x111   : > { %6978 = vmatprep.subr.bf16.mxu1 %v8046_v1 }
 0x112   : > { %6675 = vmatmul.mubr.bf16.gmra.mrb[16].mxu1 %v5682_v43  ;;  %v1541_v41 = vsel %vm7755_vm5, %v5671_v9, %v1540_v13  ;;  %v1547_v43 = vrot.slane %v1355_v28, 6  ;;  %v4185_v15 = vsel %vm7722_vm2, %v4183_v63, %v4184_v0  ;;  %v6017_v9 = vld [vmem:[#allocation2 + $0xb0] sm:$0x1]  ;;  %v7425_v63 = vld [vmem:[#allocation2 + $0x3c] sm:$0xff]   ;;  %v7442_v0 = vld [vmem:[#allocation5 + $0x108] sm:$0xff]  }
 0x113   : > { %6899 = vmatmul.mubr.bf16.vlgmr.msra.gmra.mrb[0].mxu0 %v6050_v48  ;;  %6678 = vmatprep.mubr.bf16.mxu1 %v5683_v49  ;;  %v6009_v48 = vld [vmem:[#allocation2 + $0x90] sm:$0xe]  ;;  %v4175_v49 = vsel %vm7722_vm2, %v6039_v26, %v4174_v20  ;;  %v5687_v57 = vcombine.low %v1541_v41, %v1544_v42  ;;  %v4202_v20 = vrot.slane %v6016_v56, 5  ;;  %v6056_v23 = vcombine.low %v4182_v59, %v4185_v15  ;;  %v7422_v42 = vld [vmem:[#allocation2 + $0x24] sm:$0xff]  }
 0x114   : > { %6931 = vmatpush3.bf16.msra.mxu0 %v7937_v54  ;;  %6902 = vmatprep.mubr.bf16.mxu0 %v6051_v53  ;;  %v6005_v54 = vld [vmem:[#allocation2 + $0x80] sm:$0x1]  ;;  %v5686_v53 = vcombine.low %v1534_v32, %v1537_v35  ;;  %v6041_v4 = vrot.slane %v6009_v48, 9  ;;  %v1548_v12 = vsel %vm7755_vm5, %v5672_v39, %v1547_v43  ;;  %v4205_v28 = vrot.slane %v6017_v9, 5  ;;  %v6022_v32 = vld [vmem:[#allocation2 + $0xc4] sm:$0xf] }
 0x115   : > { %6932 = vmatprep.subr.bf16.mxu0 %v7416_v60  ;;  %v4177_v34 = vrot.slane %v6005_v54, 5  ;;  %v7421_v54 = vld [vmem:[#allocation2 + $0x18] sm:$0xff]   ;;  %v4203_v37 = vsel %vm7722_vm2, %v6043_v27, %v4202_v20  ;;  %v4216_v41 = vrot.slane %v6022_v32, 5  ;;  %v7427_v56 = vld [vmem:[#allocation2 + $0x48] sm:$0xff]   ;;  %v6073_v27 = vld [vmem:[#allocation2 + $0x30] sm:$0xc] }
 0x116   : > { %v4189_v17 = vsel %vm7722_vm2, %v6041_v4, %v4188_v51  ;;  %v6020_v39 = vld [vmem:[#allocation2 + $0xbc] sm:$0x1] }
 0x117   : > { %v4178_v50 = vsel %vm7722_vm2, %v4176_v33, %v4177_v34  ;;  %v6057_v26 = vcombine.low %v4189_v17, %v4192_v18  ;;  %v6018_v33 = vld [vmem:[#allocation2 + $0xb4] sm:$0xe]  ;;  %v4218_v51 = vrot.slane %v4216_v41, 4  ;;  %v4233_v17 = vrot.slane %v6029_v6, 5  ;;  %v6031_v18 = vld [vmem:[#allocation2 + $0xe8] sm:$0xf] }
 0x118   : > { %6933 = vmatpush3.bf16.msra.mxu0 %v7416_v60  ;;  %v1549_v60 = vrot.slane %v1547_v43, 4  ;;  %v6055_v2 = vcombine.low %v4175_v49, %v4178_v50  ;;  %v6023_v43 = vld [vmem:[#allocation2 + $0xc8] sm:$0x1]  ;;  %v4212_v49 = vrot.slane %v6020_v39, 5  ;;  %v6045_v50 = vrot.slane %v6021_v40, 9 }
 0x119   : > { %6934 = vmatprep.subr.bf16.mxu0 %v7418_v16  ;;  %v6077_v39 = vld [vmem:[#allocation2 + $0x40] sm:$0xf]  ;;  %v6080_v40 = vld [vmem:[#allocation2 + $0x4c] sm:$0xf] }
 0x11a   : > { %6679 = vmatmul.mubr.bf16.gmra.mrb[20].mxu1 %v5684_v21  ;;  %v1551_v13 = vsel %vm7755_vm5, %v1549_v60, %v1550_v61  ;;  %v7429_v21 = vld [vmem:[#allocation5 + $0x230] sm:$0xff]   ;;  %v6024_v60 = vld [vmem:[#allocation2 + $0xcc] sm:$0xe] }
 0x11b   : > { %6903 = vmatmul.mubr.bf16.gmra.mrb[4].mxu0 %v6052_v24  ;;  %6682 = vmatprep.mubr.bf16.mxu1 %v5685_v7  ;;  %v5688_v22 = vcombine.low %v1548_v12, %v1551_v13  ;;  %v6042_v24 = vrot.slane %v6012_v10, 9  ;;  %v4197_v7 = vrot.slane %v4195_v14, 4  ;;  %v6025_v61 = vld [vmem:[#allocation2 + $0xd0] sm:$0xf]  ;;  %v6046_v12 = vrot.slane %v6024_v60, 9 }
 0x11c   : > { %6906 = vmatprep.mubr.bf16.mxu0 %v6053_v30  ;;  %6935 = vmatpush3.bf16.msra.mxu0 %v7418_v16  ;;  %v6014_v16 = vld [vmem:[#allocation2 + $0xa4] sm:$0x1]  ;;  %v4204_v30 = vrot.slane %v4202_v20, 4  ;;  %v4223_v62 = vrot.slane %v6025_v61, 5  ;;  %v6047_v10 = vrot.slane %v6027_v5, 9 }
 0x11d   : > { %6936 = vmatprep.subr.bf16.mxu0 %v7420_v29  ;;  %v4198_v25 = vrot.slane %v6014_v16, 5  ;;  %v4196_v34 = vsel %vm7722_vm2, %v6042_v24, %v4195_v14  ;;  %v7443_v14 = vld [vmem:[#allocation5 + $0x110] sm:$0xff]   ;;  %v6030_v24 = vld [vmem:[#allocation2 + $0xe4] sm:$0xe]  ;;  %v6079_v61 = vld [vmem:[#allocation2 + $0x48] sm:$0xc] }
 0x11e   : > { %v4206_v38 = vsel %vm7722_vm2, %v4204_v30, %v4205_v28  ;;  %v4225_v59 = vrot.slane %v4223_v62, 4  ;;  %v4224_v9 = vsel %vm7722_vm2, %v6046_v12, %v4223_v62  ;;  %v6075_v28 = vld [vmem:[#allocation2 + $0x38] sm:$0x3]  ;;  %v7430_v30 = vld [vmem:[#allocation2 + $0x60] sm:$0xff]   ;;  %v6048_v32 = vrot.slane %v6030_v24, 9 }
 0x11f   : > { %v4199_v35 = vsel %vm7722_vm2, %v4197_v7, %v4198_v25  ;;  %v6059_v47 = vcombine.low %v4203_v37, %v4206_v38  ;;  %v6032_v7 = vld [vmem:[#allocation2 + $0xec] sm:$0x1]  ;;  %v4726_v25 = vrot.slane %v6074_v19, 6  ;;  %v4729_v37 = vrot.slane %v6075_v28, 6  ;;  %v7445_v38 = vld [vmem:[#allocation5 + $0x120] sm:$0xff]   ;;  %v7435_v19 = vld [vmem:[#allocation2 + $0x90] sm:$0xff]  }
 0x120   : > { %6937 = vmatpush3.bf16.msra.mxu0 %v7420_v29  ;;  %v6019_v29 = vld [vmem:[#allocation2 + $0xb8] sm:$0xf]  ;;  %v6058_v44 = vcombine.low %v4196_v34, %v4199_v35  ;;  %v4240_v34 = vrot.slane %v6032_v7, 5  ;;  %v6121_v35 = vrot.slane %v6073_v27, 10 }
 0x121   : > { %6938 = vmatprep.subr.bf16.mxu0 %v7423_v45  ;;  %v4209_v36 = vrot.slane %v6019_v29, 5 }
 0x122   : > { %6683 = vmatmul.mubr.bf16.gmra.mrb[24].mxu1 %v5686_v53  ;;  %v4219_v53 = vrot.slane %v6023_v43, 5  ;;  %v4733_v43 = vrot.slane %v6077_v39, 6 }
 0x123   : > { %6907 = vmatmul.mubr.bf16.gmra.mrb[8].mxu0 %v6054_v55  ;;  %6686 = vmatprep.mubr.bf16.mxu1 %v5687_v57  ;;  %v4211_v48 = vrot.slane %v4209_v36, 4  ;;  %v6028_v55 = vld [vmem:[#allocation2 + $0xdc] sm:$0xf] }
 0x124   : > { %6910 = vmatprep.mubr.bf16.mxu0 %v6055_v2  ;;  %6939 = vmatpush3.bf16.msra.mxu0 %v7423_v45  ;;  %v6044_v45 = vrot.slane %v6018_v33, 9  ;;  %v4217_v2 = vsel %vm7722_vm2, %v6045_v50, %v4216_v41  ;;  %v4220_v3 = vsel %vm7722_vm2, %v4218_v51, %v4219_v53  ;;  %v4230_v4 = vrot.slane %v6028_v55, 5  ;;  %v7431_v50 = vld [vmem:[#allocation2 + $0x6c] sm:$0xff]   ;;  %v7433_v55 = vld [vmem:[#allocation2 + $0x78] sm:$0xff]  }
 0x125   : > { %6940 = vmatprep.subr.bf16.mxu0 %v7426_v11  ;;  %v4213_v58 = vsel %vm7722_vm2, %v4211_v48, %v4212_v49  ;;  %v6061_v13 = vcombine.low %v4217_v2, %v4220_v3  ;;  %v4740_v48 = vrot.slane %v6080_v40, 6  ;;  %v7446_v49 = vld [vmem:[#allocation5 + $0x128] sm:$0xff]   ;;  %v6081_v51 = vld [vmem:[#allocation2 + $0x50] sm:$0x3]  ;;  %v4735_v60 = vrot.slane %v4733_v43, 4 }
 0x126   : > { %v4210_v57 = vsel %vm7722_vm2, %v6044_v45, %v4209_v36  ;;  %v4232_v16 = vrot.slane %v4230_v4, 4  ;;  %v4728_v36 = vrot.slane %v4726_v25, 4  ;;  %v4743_v2 = vrot.slane %v6081_v51, 6  ;;  %v6083_v3 = vld [vmem:[#allocation2 + $0x58] sm:$0xf] }
 0x128   : > { %6941 = vmatpush3.bf16.msra.mxu0 %v7426_v11  ;;  %v6060_v11 = vcombine.low %v4210_v57, %v4213_v58  ;;  %v4730_v45 = vsel %vm7755_vm5, %v4728_v36, %v4729_v37  ;;  %v6093_v36 = vld [vmem:[#allocation2 + $0x80] sm:$0x3] }
 0x129   : > { %6942 = vmatprep.subr.bf16.mxu0 %v7429_v21 }
 0x12a   : > { %6687 = vmatmul.mubr.bf16.gmra.mrb[28].mxu1 %v5688_v22  ;;  %v4231_v22 = vsel %vm7722_vm2, %v6047_v10, %v4230_v4  ;;  %v6086_v4 = vld [vmem:[#allocation2 + $0x64] sm:$0xf] }
 0x12b   : > { %6911 = vmatmul.mubr.bf16.gmra.mrb[12].mxu0 %v6056_v23  ;;  %6706 = vmatprep.mubr.bf16.mxu1 %v7421_v54  ;;  %v4234_v23 = vsel %vm7722_vm2, %v4232_v16, %v4233_v17  ;;  %v7444_v54 = vld [vmem:[#allocation5 + $0x118] sm:$0xff]   ;;  %v7434_v10 = vld [vmem:[#allocation2 + $0x84] sm:$0xff]   ;;  %v6085_v16 = vld [vmem:[#allocation2 + $0x60] sm:$0xc] }
 0x12c   : > { %6914 = vmatprep.mubr.bf16.mxu0 %v6057_v26  ;;  %6943 = vmatpush3.bf16.msra.mxu0 %v7429_v21  ;;  %v4237_v21 = vrot.slane %v6031_v18, 5  ;;  %v7428_v26 = vld [vmem:[#allocation2 + $0x54] sm:$0xff]   ;;  %v6087_v17 = vld [vmem:[#allocation2 + $0x68] sm:$0x3] }
 0x12d   : > { %6944 = vmatprep.subr.bf16.mxu0 %v7432_v31  ;;  %v4757_v7 = vrot.slane %v6087_v17, 6 }
 0x12e   : > { %v4239_v33 = vrot.slane %v4237_v21, 4  ;;  %v4238_v41 = vsel %vm7722_vm2, %v6048_v32, %v4237_v21 }
 0x130   : > { %6945 = vmatpush3.bf16.msra.mxu0 %v7432_v31  ;;  %v6063_v31 = vcombine.low %v4231_v22, %v4234_v23  ;;  %v6089_v23 = vld [vmem:[#allocation2 + $0x70] sm:$0xf] }
 0x132   : > { %6707 = vmatmul.mubr.bf16.vlgmr.msra.gmra.mrb[0].mxu1 %v7422_v42  ;;  %v4241_v42 = vsel %vm7722_vm2, %v4239_v33, %v4240_v34  ;;  %v7436_v34 = vld [vmem:[#allocation2 + $0x9c] sm:$0xff]  }
 0x133   : > { %6915 = vmatmul.mubr.bf16.gmra.mrb[16].mxu0 %v6058_v44  ;;  %6986 = vmatpush3.bf16.msra.mxu1 %v8046_v1  ;;  %v6026_v1 = vld [vmem:[#allocation2 + $0xd4] sm:$0x1]  ;;  %v4727_v44 = vsel %vm7755_vm5, %v6121_v35, %v4726_v25  ;;  %v6064_v53 = vcombine.low %v4238_v41, %v4241_v42  ;;  %v6092_v25 = vld [vmem:[#allocation2 + $0x7c] sm:$0xf]  ;;  %v6091_v35 = vld [vmem:[#allocation2 + $0x78] sm:$0xc] }
 0x134   : > { %6710 = vmatprep.mubr.bf16.mxu1 %v7424_v46  ;;  %6918 = vmatprep.mubr.bf16.mxu0 %v6059_v47  ;;  %v4226_v15 = vrot.slane %v6026_v1, 5  ;;  %v6076_v46 = vld [vmem:[#allocation2 + $0x3c] sm:$0xc]  ;;  %v6078_v47 = vld [vmem:[#allocation2 + $0x44] sm:$0x3]  ;;  %v6137_v57 = vcombine.low %v4727_v44, %v4730_v45  ;;  %v7447_v1 = vld [vmem:[#allocation5 + $0x130] sm:$0xff]  }
 0x135   : > { %6979 = vmatprep.subr.bf16.mxu1 %v7442_v0  ;;  %v6122_v58 = vrot.slane %v6076_v46, 10  ;;  %v4736_v62 = vrot.slane %v6078_v47, 6  ;;  %v4768_v33 = vrot.slane %v6092_v25, 6  ;;  %v5778_v44 = vld [vmem:[#allocation2 + $0x7c] sm:$0xf]  ;;  %v6127_v45 = vrot.slane %v6091_v35, 10 }
 0x136   : > { %v4227_v20 = vsel %vm7722_vm2, %v4225_v59, %v4226_v15  ;;  %v4754_v59 = vrot.slane %v6086_v4, 6  ;;  %v7448_v15 = vld [vmem:[#allocation5 + $0x138] sm:$0xff]   ;;  %v4771_v47 = vrot.slane %v6093_v36, 6  ;;  %v6102_v25 = vld [vmem:[#allocation2 + $0xa4] sm:$0x3] }
 0x137   : > { %6987 = vmatpush3.bf16.msra.mxu1 %v7442_v0  ;;  %v6062_v29 = vcombine.low %v4224_v9, %v4227_v20  ;;  %v4742_v0 = vrot.slane %v4740_v48, 4  ;;  %v4734_v5 = vsel %vm7755_vm5, %v6122_v58, %v4733_v43  ;;  %v4737_v6 = vsel %vm7755_vm5, %v4735_v60, %v4736_v62  ;;  %v6095_v43 = vld [vmem:[#allocation2 + $0x88] sm:$0xf]  ;;  %v5779_v58 = vld [vmem:[#allocation2 + $0x80] sm:$0x1]  ;;  %v7438_v60 = vld [vmem:[#allocation2 + $0xb4] sm:$0xff]  }
 0x138   : > { %6980 = vmatprep.subr.bf16.mxu1 %v7443_v14  ;;  %v6138_v18 = vcombine.low %v4734_v5, %v4737_v6  ;;  %v4756_v24 = vrot.slane %v4754_v59, 4  ;;  %v4770_v46 = vrot.slane %v4768_v33, 4  ;;  %v4775_v51 = vrot.slane %v6095_v43, 6  ;;  %v6099_v5 = vld [vmem:[#allocation2 + $0x98] sm:$0x3] }
 0x139   : > { %v4744_v12 = vsel %vm7755_vm5, %v4742_v0, %v4743_v2  ;;  %v4769_v62 = vsel %vm7755_vm5, %v6127_v45, %v4768_v33  ;;  %v6097_v0 = vld [vmem:[#allocation2 + $0x90] sm:$0xc]  ;;  %v5781_v6 = vld [vmem:[#allocation2 + $0x88] sm:$0xf] }
 0x13a   : > { %6711 = vmatmul.mubr.bf16.gmra.mrb[4].mxu1 %v7425_v63  ;;  %v6123_v63 = vrot.slane %v6079_v61, 10  ;;  %v4758_v32 = vsel %vm7755_vm5, %v4756_v24, %v4757_v7  ;;  %v6094_v61 = vld [vmem:[#allocation2 + $0x84] sm:$0xc]  ;;  %v6100_v7 = vld [vmem:[#allocation2 + $0x9c] sm:$0xc] }
 0x13b   : > { %6919 = vmatmul.mubr.bf16.gmra.mrb[20].mxu0 %v6060_v11  ;;  %6714 = vmatprep.mubr.bf16.mxu1 %v7427_v56  ;;  %v4747_v11 = vrot.slane %v6083_v3, 6 }
 0x13c   : > { %6922 = vmatprep.mubr.bf16.mxu0 %v6061_v13  ;;  %6988 = vmatpush3.bf16.msra.mxu1 %v7443_v14  ;;  %v4741_v56 = vsel %vm7755_vm5, %v6123_v63, %v4740_v48  ;;  %v6082_v13 = vld [vmem:[#allocation2 + $0x54] sm:$0xc]  ;;  %v6084_v14 = vld [vmem:[#allocation2 + $0x5c] sm:$0x3]  ;;  %v4772_v63 = vsel %vm7755_vm5, %v4770_v46, %v4771_v47  ;;  %v5787_v47 = vld [vmem:[#allocation2 + $0xa0] sm:$0xf] }
 0x13d   : > { %6981 = vmatprep.subr.bf16.mxu1 %v7444_v54  ;;  %v6139_v9 = vcombine.low %v4741_v56, %v4744_v12  ;;  %v6124_v20 = vrot.slane %v6082_v13, 10  ;;  %v4749_v21 = vrot.slane %v4747_v11, 4  ;;  %v4750_v22 = vrot.slane %v6084_v14, 6  ;;  %v6098_v48 = vld [vmem:[#allocation2 + $0x94] sm:$0xf] }
 0x13e   : > { %v4782_v2 = vrot.slane %v6098_v48, 6  ;;  %v4777_v56 = vrot.slane %v4775_v51, 4  ;;  %v2549_v14 = vrot.slane %v5779_v58, 5 }
 0x13f   : > { %v4748_v27 = vsel %vm7755_vm5, %v6124_v20, %v4747_v11  ;;  %v4751_v28 = vsel %vm7755_vm5, %v4749_v21, %v4750_v22  ;;  %v7439_v11 = vld [vmem:[#allocation2 + $0xc0] sm:$0xff]   ;;  %v5782_v22 = vld [vmem:[#allocation2 + $0x8c] sm:$0x1] }
 0x140   : > { %6989 = vmatpush3.bf16.msra.mxu1 %v7444_v54  ;;  %v6125_v54 = vrot.slane %v6085_v16, 10  ;;  %v6140_v37 = vcombine.low %v4748_v27, %v4751_v28  ;;  %v5784_v16 = vld [vmem:[#allocation2 + $0x94] sm:$0xf]  ;;  %v4784_v17 = vrot.slane %v4782_v2, 4  ;;  %v2556_v35 = vrot.slane %v5782_v22, 5 }
 0x141   : > { %6982 = vmatprep.subr.bf16.mxu1 %v7445_v38  ;;  %v2560_v27 = vrot.slane %v5784_v16, 5 }
 0x142   : > { %6715 = vmatmul.mubr.bf16.gmra.mrb[8].mxu1 %v7428_v26  ;;  %v4761_v26 = vrot.slane %v6089_v23, 6  ;;  %v6104_v23 = vld [vmem:[#allocation2 + $0xac] sm:$0xf] }
 0x143   : > { %6923 = vmatmul.mubr.bf16.gmra.mrb[24].mxu0 %v6062_v29  ;;  %6718 = vmatprep.mubr.bf16.mxu1 %v7430_v30  ;;  %v6088_v29 = vld [vmem:[#allocation2 + $0x6c] sm:$0xc]  ;;  %v6090_v30 = vld [vmem:[#allocation2 + $0x74] sm:$0x3]  ;;  %v4796_v36 = vrot.slane %v6104_v23, 6  ;;  %v2562_v45 = vrot.slane %v2560_v27, 4 }
 0x144   : > { %6926 = vmatprep.mubr.bf16.mxu0 %v6063_v31  ;;  %6990 = vmatpush3.bf16.msra.mxu1 %v7445_v38  ;;  %v4755_v31 = vsel %vm7755_vm5, %v6125_v54, %v4754_v59  ;;  %v7437_v38 = vld [vmem:[#allocation2 + $0xa8] sm:$0xff]   ;;  %v6126_v39 = vrot.slane %v6088_v29, 10  ;;  %v4763_v40 = vrot.slane %v4761_v26, 4  ;;  %v4764_v41 = vrot.slane %v6090_v30, 6  ;;  %v5783_v30 = vld [vmem:[#allocation2 + $0x90] sm:$0xe] }
 0x145   : > { %6983 = vmatprep.subr.bf16.mxu1 %v7446_v49  ;;  %v6141_v42 = vcombine.low %v4755_v31, %v4758_v32  ;;  %v6143_v59 = vcombine.low %v4769_v62, %v4772_v63  ;;  %v5785_v31 = vld [vmem:[#allocation2 + $0x98] sm:$0x1]  ;;  %v7440_v32 = vld [vmem:[#allocation2 + $0xcc] sm:$0xff]   ;;  %v2567_v62 = vrot.slane %v5787_v47, 5  ;;  %v6110_v63 = vld [vmem:[#allocation2 + $0xc4] sm:$0xf] }
 0x146   : > { %v2563_v46 = vrot.slane %v5785_v31, 5  ;;  %v5796_v31 = vld [vmem:[#allocation2 + $0xc4] sm:$0xf] }
 0x148   : > { %6991 = vmatpush3.bf16.msra.mxu1 %v7446_v49  ;;  %v4762_v49 = vsel %vm7755_vm5, %v6126_v39, %v4761_v26  ;;  %v6130_v39 = vrot.slane %v6100_v7, 10 }
 0x149   : > { %6984 = vmatprep.subr.bf16.mxu1 %v7447_v1 }
 0x14a   : > { %6719 = vmatmul.mubr.bf16.gmra.mrb[12].mxu1 %v7431_v50  ;;  %v4765_v50 = vsel %vm7755_vm5, %v4763_v40, %v4764_v41  ;;  %v4792_v40 = vrot.slane %v6102_v25, 6  ;;  %v6103_v41 = vld [vmem:[#allocation2 + $0xa8] sm:$0xc] }
 0x14b   : > { %6927 = vmatmul.mubr.bf16.gmra.mrb[28].mxu0 %v6064_v53  ;;  %6722 = vmatprep.mubr.bf16.mxu1 %v7433_v55  ;;  %v5777_v53 = vld [vmem:[#allocation2 + $0x78] sm:$0xe]  ;;  %v2546_v55 = vrot.slane %v5778_v44, 5  ;;  %v6142_v3 = vcombine.low %v4762_v49, %v4765_v50  ;;  %v5811_v44 = vrot.slane %v5783_v30, 9 }
 0x14c   : > { %6946 = vmatprep.mubr.bf16.mxu0 %v6137_v57  ;;  %6992 = vmatpush3.bf16.msra.mxu1 %v7447_v1  ;;  %v6096_v57 = vld [vmem:[#allocation2 + $0x8c] sm:$0x3]  ;;  %v6128_v1 = vrot.slane %v6094_v61, 10  ;;  %v5809_v4 = vrot.slane %v5777_v53, 9  ;;  %v6107_v50 = vld [vmem:[#allocation2 + $0xb8] sm:$0xf] }
 0x14d   : > { %6985 = vmatprep.subr.bf16.mxu1 %v7448_v15  ;;  %v4778_v12 = vrot.slane %v6096_v57, 6  ;;  %v2548_v13 = vrot.slane %v2546_v55, 4  ;;  %v4798_v53 = vrot.slane %v4796_v36, 4  ;;  %v5790_v57 = vld [vmem:[#allocation2 + $0xac] sm:$0xf] }
 0x14e   : > { %v4776_v20 = vsel %vm7755_vm5, %v6128_v1, %v4775_v51  ;;  %v2547_v21 = vsel %vm7722_vm2, %v5809_v4, %v2546_v55  ;;  %v6131_v51 = vrot.slane %v6103_v41, 10  ;;  %v5788_v1 = vld [vmem:[#allocation2 + $0xa4] sm:$0x1]  ;;  %v6106_v4 = vld [vmem:[#allocation2 + $0xb4] sm:$0xc] }
 0x14f   : > { %v4779_v54 = vsel %vm7755_vm5, %v4777_v56, %v4778_v12  ;;  %v2550_v24 = vsel %vm7722_vm2, %v2548_v13, %v2549_v14  ;;  %v5789_v56 = vld [vmem:[#allocation2 + $0xa8] sm:$0xe]  ;;  %v2574_v12 = vrot.slane %v5790_v57, 5 }
 0x150   : > { %6993 = vmatpush3.bf16.msra.mxu1 %v7448_v15  ;;  %v6129_v15 = vrot.slane %v6097_v0, 10  ;;  %v4797_v13 = vsel %vm7755_vm5, %v6131_v51, %v4796_v36 }
 0x151   : > { %v2576_v7 = vrot.slane %v2574_v12, 4 }
 0x152   : > { %6723 = vmatmul.mubr.bf16.gmra.mrb[16].mxu1 %v7434_v10  ;;  %v6101_v10 = vld [vmem:[#allocation2 + $0xa0] sm:$0xf]  ;;  %v4783_v28 = vsel %vm7755_vm5, %v6129_v15, %v4782_v2  ;;  %v2561_v2 = vsel %vm7722_vm2, %v5811_v44, %v2560_v27  ;;  %v5791_v15 = vld [vmem:[#allocation2 + $0xb0] sm:$0x1]  ;;  %v6114_v44 = vld [vmem:[#allocation2 + $0xd4] sm:$0x3] }
 0x153   : > { %6947 = vmatmul.mubr.bf16.vlgmr.msra.gmra.mrb[0].mxu0 %v6138_v18  ;;  %6726 = vmatprep.mubr.bf16.mxu1 %v7435_v19  ;;  %v4785_v18 = vrot.slane %v6099_v5, 6  ;;  %v5780_v19 = vld [vmem:[#allocation2 + $0x84] sm:$0xe]  ;;  %v4789_v26 = vrot.slane %v6101_v10, 6  ;;  %v4803_v5 = vrot.slane %v6107_v50, 6  ;;  %v4810_v10 = vrot.slane %v6110_v63, 6 }
 0x154   : > { %6950 = vmatprep.mubr.bf16.mxu0 %v6139_v9  ;;  %v2553_v9 = vrot.slane %v5781_v6, 5  ;;  %v5810_v29 = vrot.slane %v5780_v19, 9  ;;  %v2570_v19 = vrot.slane %v5788_v1, 5  ;;  %v2577_v25 = vrot.slane %v5791_v15, 5  ;;  %v6113_v27 = vld [vmem:[#allocation2 + $0xd0] sm:$0xf] }
 0x155   : > { %v4786_v33 = vsel %vm7755_vm5, %v4784_v17, %v4785_v18  ;;  %v4791_v43 = vrot.slane %v4789_v26, 4  ;;  %v4790_v58 = vsel %vm7755_vm5, %v6130_v39, %v4789_v26  ;;  %v2569_v18 = vrot.slane %v2567_v62, 4  ;;  %v5793_v26 = vld [vmem:[#allocation2 + $0xb8] sm:$0xf]  ;;  %v5797_v50 = vld [vmem:[#allocation2 + $0xc8] sm:$0x1] }
 0x156   : > { %v6145_v48 = vcombine.low %v4783_v28, %v4786_v33  ;;  %v2554_v49 = vsel %vm7722_vm2, %v5810_v29, %v2553_v9  ;;  %v4805_v22 = vrot.slane %v4803_v5, 4  ;;  %v4812_v29 = vrot.slane %v4810_v10, 4 }
 0x157   : > { %v4793_v0 = vsel %vm7755_vm5, %v4791_v43, %v4792_v40  ;;  %v2571_v33 = vsel %vm7722_vm2, %v2569_v18, %v2570_v19  ;;  %v2581_v39 = vrot.slane %v5793_v26, 5  ;;  %v6112_v40 = vld [vmem:[#allocation2 + $0xcc] sm:$0xc]  ;;  %v4817_v41 = vrot.slane %v6113_v27, 6 }
 0x158   : > { %v6146_v16 = vcombine.low %v4790_v58, %v4793_v0  ;;  %v2578_v43 = vsel %vm7722_vm2, %v2576_v7, %v2577_v25  ;;  %v6134_v57 = vrot.slane %v6112_v40, 10  ;;  %v6115_v58 = vld [vmem:[#allocation2 + $0xd8] sm:$0xc]  ;;  %v5798_v19 = vld [vmem:[#allocation2 + $0xcc] sm:$0xe] }
 0x159   : > { %v2583_v63 = vrot.slane %v2581_v39, 4  ;;  %v4819_v0 = vrot.slane %v4817_v41, 4  ;;  %v5816_v26 = vrot.slane %v5798_v19, 9 }
 0x15a   : > { %6727 = vmatmul.mubr.bf16.gmra.mrb[20].mxu1 %v7436_v34  ;;  %v2555_v34 = vrot.slane %v2553_v9, 4  ;;  %v6109_v9 = vld [vmem:[#allocation2 + $0xc0] sm:$0xc]  ;;  %v4818_v15 = vsel %vm7755_vm5, %v6134_v57, %v4817_v41 }
 0x15b   : > { %6951 = vmatmul.mubr.bf16.gmra.mrb[4].mxu0 %v6140_v37  ;;  %6730 = vmatprep.mubr.bf16.mxu1 %v7437_v38  ;;  %v6144_v37 = vcombine.low %v4776_v20, %v4779_v54  ;;  %v5825_v38 = vcombine.low %v2547_v21, %v2550_v24  ;;  %v6111_v20 = vld [vmem:[#allocation2 + $0xc8] sm:$0x3]  ;;  %v6132_v21 = vrot.slane %v6106_v4, 10  ;;  %v5813_v54 = vrot.slane %v5789_v56, 9 }
 0x15c   : > { %6954 = vmatprep.mubr.bf16.mxu0 %v6141_v42  ;;  %v6105_v42 = vld [vmem:[#allocation2 + $0xb0] sm:$0x3]  ;;  %v2557_v61 = vsel %vm7722_vm2, %v2555_v34, %v2556_v35  ;;  %v6133_v28 = vrot.slane %v6109_v9, 10  ;;  %v4813_v30 = vrot.slane %v6111_v20, 6  ;;  %v5792_v34 = vld [vmem:[#allocation2 + $0xb4] sm:$0xe] }
 0x15d   : > { %v4799_v55 = vrot.slane %v6105_v42, 6  ;;  %v5826_v6 = vcombine.low %v2554_v49, %v2557_v61  ;;  %v6116_v35 = vld [vmem:[#allocation2 + $0xdc] sm:$0xf]  ;;  %v4804_v36 = vsel %vm7755_vm5, %v6132_v21, %v4803_v5  ;;  %v2575_v42 = vsel %vm7722_vm2, %v5813_v54, %v2574_v12  ;;  %v5795_v49 = vld [vmem:[#allocation2 + $0xc0] sm:$0xe] }
 0x15e   : > { %v4814_v47 = vsel %vm7755_vm5, %v4812_v29, %v4813_v30  ;;  %v4824_v61 = vrot.slane %v6116_v35, 6  ;;  %v5815_v1 = vrot.slane %v5795_v49, 9  ;;  %v2591_v5 = vrot.slane %v5797_v50, 5  ;;  %v5800_v9 = vld [vmem:[#allocation2 + $0xd4] sm:$0x1] }
 0x15f   : > { %v4800_v14 = vsel %vm7755_vm5, %v4798_v53, %v4799_v55  ;;  %v6120_v54 = vld [vmem:[#allocation2 + $0xec] sm:$0x3] }
 0x160   : > { %v6147_v24 = vcombine.low %v4797_v13, %v4800_v14  ;;  %v4826_v56 = vrot.slane %v4824_v61, 4  ;;  %v6119_v13 = vld [vmem:[#allocation2 + $0xe8] sm:$0xf] }
 0x161   : > { %v4831_v20 = vrot.slane %v6119_v13, 6 }
 0x162   : > { %6731 = vmatmul.mubr.bf16.gmra.mrb[24].mxu1 %v7438_v60  ;;  %v5786_v60 = vld [vmem:[#allocation2 + $0x9c] sm:$0xe] }
 0x163   : > { %6955 = vmatmul.mubr.bf16.gmra.mrb[8].mxu0 %v6142_v3  ;;  %6734 = vmatprep.mubr.bf16.mxu1 %v7439_v11  ;;  %v2564_v3 = vsel %vm7722_vm2, %v2562_v45, %v2563_v46  ;;  %v6108_v11 = vld [vmem:[#allocation2 + $0xbc] sm:$0x3]  ;;  %v2588_v45 = vrot.slane %v5796_v31, 5  ;;  %v4811_v46 = vsel %vm7755_vm5, %v6133_v28, %v4810_v10  ;;  %v2598_v28 = vrot.slane %v5800_v9, 5 }
 0x164   : > { %6958 = vmatprep.mubr.bf16.mxu0 %v6143_v59  ;;  %v5812_v59 = vrot.slane %v5786_v60, 9  ;;  %v5827_v17 = vcombine.low %v2561_v2, %v2564_v3  ;;  %v4806_v23 = vrot.slane %v6108_v11, 6  ;;  %v6117_v60 = vld [vmem:[#allocation2 + $0xe0] sm:$0x3]  ;;  %v4820_v2 = vrot.slane %v6114_v44, 6 }
 0x165   : > { %v6149_v3 = vcombine.low %v4811_v46, %v4814_v47  ;;  %v2590_v4 = vrot.slane %v2588_v45, 4  ;;  %v6135_v11 = vrot.slane %v6115_v58, 10  ;;  %v4827_v12 = vrot.slane %v6117_v60, 6 }
 0x166   : > { %v4821_v10 = vsel %vm7755_vm5, %v4819_v0, %v4820_v2  ;;  %v4833_v31 = vrot.slane %v4831_v20, 4 }
 0x167   : > { %v2592_v18 = vsel %vm7722_vm2, %v2590_v4, %v2591_v5  ;;  %v4825_v21 = vsel %vm7755_vm5, %v6135_v11, %v4824_v61  ;;  %v6150_v7 = vcombine.low %v4818_v15, %v4821_v10 }
 0x16a   : > { %6735 = vmatmul.mubr.bf16.gmra.mrb[28].mxu1 %v7440_v32  ;;  %v2568_v32 = vsel %vm7722_vm2, %v5812_v59, %v2567_v62  ;;  %v5829_v62 = vcombine.low %v2575_v42, %v2578_v43 }
 0x16b   : > { %6959 = vmatmul.mubr.bf16.gmra.mrb[12].mxu0 %v6144_v37  ;;  %6770 = vmatprep.mubr.bf16.mxu1 %v5825_v38  ;;  %v4807_v37 = vsel %vm7755_vm5, %v4805_v22, %v4806_v23  ;;  %v5794_v38 = vld [vmem:[#allocation2 + $0xbc] sm:$0x1]  ;;  %v5828_v51 = vcombine.low %v2568_v32, %v2571_v33  ;;  %v4828_v22 = vsel %vm7755_vm5, %v4826_v56, %v4827_v12  ;;  %v6118_v23 = vld [vmem:[#allocation2 + $0xe4] sm:$0xc]  ;;  %v4834_v32 = vrot.slane %v6120_v54, 6 }
 0x16c   : > { %6962 = vmatprep.mubr.bf16.mxu0 %v6145_v48  ;;  %v5814_v48 = vrot.slane %v5792_v34, 9  ;;  %v6148_v53 = vcombine.low %v4804_v36, %v4807_v37  ;;  %v2584_v55 = vrot.slane %v5794_v38, 5  ;;  %v6151_v29 = vcombine.low %v4825_v21, %v4828_v22 }
 0x16d   : > { %v6136_v30 = vrot.slane %v6118_v23, 10  ;;  %v4835_v36 = vsel %vm7755_vm5, %v4833_v31, %v4834_v32 }
 0x16e   : > { %v2582_v14 = vsel %vm7722_vm2, %v5814_v48, %v2581_v39  ;;  %v2585_v59 = vsel %vm7722_vm2, %v2583_v63, %v2584_v55  ;;  %v8232_v55 = vld [vmem:[%s8345_s2] ss:$0 sm:$0xff] }
 0x16f   : > { %v4832_v35 = vsel %vm7755_vm5, %v6136_v30, %v4831_v20 }
 0x170   : > { %v6152_v38 = vcombine.low %v4832_v35, %v4835_v36 }
 0x172   : > { %6771 = vmatmul.mubr.bf16.vlgmr.msra.gmra.mrb[16].mxu1 %v5826_v6  ;;  %v5799_v6 = vld [vmem:[#allocation2 + $0xd0] sm:$0xf] }
 0x173   : > { %6963 = vmatmul.mubr.bf16.gmra.mrb[16].mxu0 %v6146_v16  ;;  %6774 = vmatprep.mubr.bf16.mxu1 %v5827_v17  ;;  %v2595_v16 = vrot.slane %v5799_v6, 5  ;;  %v2589_v17 = vsel %vm7722_vm2, %v5815_v1, %v2588_v45 }
 0x174   : > { %6966 = vmatprep.mubr.bf16.mxu0 %v6147_v24  ;;  %v5830_v24 = vcombine.low %v2582_v14, %v2585_v59  ;;  %v5831_v25 = vcombine.low %v2589_v17, %v2592_v18 }
 0x175   : > { %v2597_v27 = vrot.slane %v2595_v16, 4  ;;  %v2596_v33 = vsel %vm7722_vm2, %v5816_v26, %v2595_v16 }
 0x177   : > { %v2599_v34 = vsel %vm7722_vm2, %v2597_v27, %v2598_v28 }
 0x178   : > { %v5832_v37 = vcombine.low %v2596_v33, %v2599_v34 }
 0x17a   : > { %6775 = vmatmul.mubr.bf16.gmra.mrb[20].mxu1 %v5828_v51 }
 0x17b   : > { %6967 = vmatmul.mubr.bf16.gmra.mrb[20].mxu0 %v6148_v53  ;;  %6778 = vmatprep.mubr.bf16.mxu1 %v5829_v62 }
 0x17c   : > { %6970 = vmatprep.mubr.bf16.mxu0 %v6149_v3 }
 0x182   : > { %6779 = vmatmul.mubr.bf16.gmra.mrb[24].mxu1 %v5830_v24 }
 0x183   : > { %6971 = vmatmul.mubr.bf16.gmra.mrb[24].mxu0 %v6150_v7  ;;  %6782 = vmatprep.mubr.bf16.mxu1 %v5831_v25 }
 0x184   : > { %6974 = vmatprep.mubr.bf16.mxu0 %v6151_v29 }
 0x18a   : > { %6783 = vmatmul.mubr.bf16.gmra.mrb[28].mxu1 %v5832_v37 }
 0x18b   : > { %6975 = vmatmul.mubr.bf16.gmra.mrb[28].mxu0 %v6152_v38 }
 0x205   : > { %v6708_v39 = vpop.f32.mrb[0].mxu1 }
 0x206   : > { %v2169_v40 = vpop.f32.mrb[1].mxu1 }
 0x207   : > { %v6709_v41 = vpop.f32.mrb[2].mxu1 }
 0x208   : > { %v2172_v42 = vpop.f32.mrb[3].mxu1 }
 0x20d   : > { %v6712_v43 = vpop.f32.mrb[4].mxu1 }
 0x20e   : > { %v2185_v44 = vpop.f32.mrb[5].mxu1 }
 0x20f   : > { %v6713_v45 = vpop.f32.mrb[6].mxu1 }
 0x210   : > { %v2188_v8 = vpop.f32.mrb[7].mxu1 }
 0x215   : > { %v6716_v46 = vpop.f32.mrb[8].mxu1 }
 0x216   : > { %v2201_v47 = vpop.f32.mrb[9].mxu1 }
 0x217   : > { %v6717_v48 = vpop.f32.mrb[10].mxu1 }
 0x218   : > { %v2204_v49 = vpop.f32.mrb[11].mxu1 }
 0x21d   : > { %v8221_v50 = vpop.f32.mrb[12].mxu1 }
 0x21e   : > { %v8223_v52 = vpop.f32.mrb[13].mxu1 }
 0x21f   : > { %v8225_v61 = vpop.f32.mrb[14].mxu1 }
 0x220   : > { %v8227_v51 = vpop.f32.mrb[15].mxu1 }
 0x226   : > { %v6948_v53 = vpop.f32.mrb[0].mxu0 }
 0x227   : > { %v6994_v57 = vadd.f32 %v6948_v53, %v6708_v39  ;;  %v4999_v58 = vpop.f32.mrb[1].mxu0 }
 0x228   : > { %v6995_v60 = vadd.f32 %v4999_v58, %v2169_v40  ;;  %v6949_v62 = vpop.f32.mrb[2].mxu0 }
 0x229   : > { %v5231_v63 = vadd.f32 %v6994_v57, %v8232_v55  ;;  %v6996_v0 = vadd.f32 %v6949_v62, %v6709_v41  ;;  %v5002_v2 = vpop.f32.mrb[3].mxu0 }
 0x22a   : > { %v5229_v3 = vadd.f32 %v6995_v60, %v8232_v55  ;;  %v6997_v1 = vadd.f32 %v5002_v2, %v2172_v42 }
 0x22b   : > { %v5232_v4 = vadd.f32 %v6996_v0, %v8232_v55  ;;  %v5263_v6 = vmax.f32 %v5231_v63, 0.0 }
 0x22c   : > { %v5230_v5 = vadd.f32 %v6997_v1, %v8232_v55  ;;  %v5261_v56 = vmax.f32 %v5229_v3, 0.0 }
 0x22d   : > { %v5264_v11 = vmax.f32 %v5232_v4, 0.0 }
 0x22e   : > { %v5262_v12 = vmax.f32 %v5230_v5, 0.0  ;;  %v6952_v13 = vpop.f32.mrb[4].mxu0 }
 0x22f   : > { %v6243_v14 = vpack.c.bf16 %v5264_v11, %v5263_v6  ;;  %v6998_v59 = vadd.f32 %v6952_v13, %v6712_v43  ;;  %v5015_v15 = vpop.f32.mrb[5].mxu0 }
 0x230   : > { %v6238_v10 = vpack.c.bf16 %v5262_v12, %v5261_v56  ;;  %v6999_v16 = vadd.f32 %v5015_v15, %v2185_v44  ;;  %v6953_v17 = vpop.f32.mrb[6].mxu0 }
 0x231   : > { %6315 = vst [vmem:[%s7720_s23 + $0x8] sm:$0xff] %v6243_v14   ;;  %v5235_v18 = vadd.f32 %v6998_v59, %v8232_v55  ;;  %v7000_v19 = vadd.f32 %v6953_v17, %v6713_v45  ;;  %v5018_v9 = vpop.f32.mrb[7].mxu0 }
 0x232   : > { %6239 = vst [vmem:[%s7720_s23] sm:$0xff] %v6238_v10   ;;  %v5233_v20 = vadd.f32 %v6999_v16, %v8232_v55  ;;  %v7001_v21 = vadd.f32 %v5018_v9, %v2188_v8 }
 0x233   : > { %v5236_v22 = vadd.f32 %v7000_v19, %v8232_v55  ;;  %v5267_v54 = vmax.f32 %v5235_v18, 0.0 }
 0x234   : > { %v5234_v23 = vadd.f32 %v7001_v21, %v8232_v55  ;;  %v5265_v7 = vmax.f32 %v5233_v20, 0.0 }
 0x235   : > { %v5268_v24 = vmax.f32 %v5236_v22, 0.0 }
 0x236   : > { %v5266_v25 = vmax.f32 %v5234_v23, 0.0  ;;  %v6956_v26 = vpop.f32.mrb[8].mxu0 }
 0x237   : > { %v6253_v27 = vpack.c.bf16 %v5268_v24, %v5267_v54  ;;  %v7002_v28 = vadd.f32 %v6956_v26, %v6716_v46  ;;  %v5031_v29 = vpop.f32.mrb[9].mxu0 }
 0x238   : > { %v6248_v30 = vpack.c.bf16 %v5266_v25, %v5265_v7  ;;  %v7003_v31 = vadd.f32 %v5031_v29, %v2201_v47  ;;  %v6957_v32 = vpop.f32.mrb[10].mxu0 }
 0x239   : > { %6317 = vst [vmem:[%s7720_s23 + $0x18] sm:$0xff] %v6253_v27   ;;  %v5239_v33 = vadd.f32 %v7002_v28, %v8232_v55  ;;  %v7004_v34 = vadd.f32 %v6957_v32, %v6717_v48  ;;  %v5034_v35 = vpop.f32.mrb[11].mxu0 }
 0x23a   : > { %6316 = vst [vmem:[%s7720_s23 + $0x10] sm:$0xff] %v6248_v30   ;;  %v5237_v36 = vadd.f32 %v7003_v31, %v8232_v55  ;;  %v7005_v37 = vadd.f32 %v5034_v35, %v2204_v49 }
 0x23b   : > { %v5240_v38 = vadd.f32 %v7004_v34, %v8232_v55  ;;  %v5271_v40 = vmax.f32 %v5239_v33, 0.0 }
 0x23c   : > { %v5238_v39 = vadd.f32 %v7005_v37, %v8232_v55  ;;  %v5269_v42 = vmax.f32 %v5237_v36, 0.0 }
 0x23d   : > { %v5272_v41 = vmax.f32 %v5240_v38, 0.0 }
 0x23e   : > { %v5270_v43 = vmax.f32 %v5238_v39, 0.0  ;;  %v6960_v44 = vpop.f32.mrb[12].mxu0 }
 0x23f   : > { %v6263_v45 = vpack.c.bf16 %v5272_v41, %v5271_v40  ;;  %v7006_v8 = vadd.f32 %v6960_v44, %v8221_v50  ;;  %v5047_v46 = vpop.f32.mrb[13].mxu0 }
 0x240   : > { %v6258_v47 = vpack.c.bf16 %v5270_v43, %v5269_v42  ;;  %v7007_v48 = vadd.f32 %v5047_v46, %v8223_v52  ;;  %v6961_v53 = vpop.f32.mrb[14].mxu0 }
 0x241   : > { %6319 = vst [vmem:[%s7720_s23 + $0x28] sm:$0xff] %v6263_v45   ;;  %v5243_v49 = vadd.f32 %v7006_v8, %v8232_v55  ;;  %v7008_v57 = vadd.f32 %v6961_v53, %v8225_v61  ;;  %v5050_v58 = vpop.f32.mrb[15].mxu0 }
 0x242   : > { %6318 = vst [vmem:[%s7720_s23 + $0x20] sm:$0xff] %v6258_v47   ;;  %v5241_v60 = vadd.f32 %v7007_v48, %v8232_v55  ;;  %v7009_v62 = vadd.f32 %v5050_v58, %v8227_v51 }
 0x243   : > { %v5244_v63 = vadd.f32 %v7008_v57, %v8232_v55  ;;  %v5275_v0 = vmax.f32 %v5243_v49, 0.0 }
 0x244   : > { %v5242_v50 = vadd.f32 %v7009_v62, %v8232_v55  ;;  %v5273_v3 = vmax.f32 %v5241_v60, 0.0 }
 0x245   : > { %v5276_v2 = vmax.f32 %v5244_v63, 0.0  ;;  %v6772_v52 = vpop.f32.mrb[16].mxu1 }
 0x246   : > { %v5274_v1 = vmax.f32 %v5242_v50, 0.0  ;;  %v6964_v4 = vpop.f32.mrb[16].mxu0  ;;  %v2827_v5 = vpop.f32.mrb[17].mxu1 }
 0x247   : > { %v6273_v61 = vpack.c.bf16 %v5276_v2, %v5275_v0  ;;  %v7010_v6 = vadd.f32 %v6964_v4, %v6772_v52  ;;  %v5063_v11 = vpop.f32.mrb[17].mxu0  ;;  %v6773_v56 = vpop.f32.mrb[18].mxu1 }
 0x248   : > { %v6268_v12 = vpack.c.bf16 %v5274_v1, %v5273_v3  ;;  %v7011_v13 = vadd.f32 %v5063_v11, %v2827_v5  ;;  %v6965_v51 = vpop.f32.mrb[18].mxu0  ;;  %v2830_v14 = vpop.f32.mrb[19].mxu1 }
 0x249   : > { %6321 = vst [vmem:[%s7720_s23 + $0x38] sm:$0xff] %v6273_v61   ;;  %v5247_v59 = vadd.f32 %v7010_v6, %v8232_v55  ;;  %v7012_v15 = vadd.f32 %v6965_v51, %v6773_v56  ;;  %v5066_v10 = vpop.f32.mrb[19].mxu0 }
 0x24a   : > { %6320 = vst [vmem:[%s7720_s23 + $0x30] sm:$0xff] %v6268_v12   ;;  %v5245_v16 = vadd.f32 %v7011_v13, %v8232_v55  ;;  %v7013_v17 = vadd.f32 %v5066_v10, %v2830_v14 }
 0x24b   : > { %v5248_v18 = vadd.f32 %v7012_v15, %v8232_v55  ;;  %v5279_v9 = vmax.f32 %v5247_v59, 0.0 }
 0x24c   : > { %v5246_v19 = vadd.f32 %v7013_v17, %v8232_v55  ;;  %v5277_v22 = vmax.f32 %v5245_v16, 0.0 }
 0x24d   : > { %v5280_v20 = vmax.f32 %v5248_v18, 0.0  ;;  %v6776_v21 = vpop.f32.mrb[20].mxu1 }
 0x24e   : > { %v5278_v23 = vmax.f32 %v5246_v19, 0.0  ;;  %v6968_v54 = vpop.f32.mrb[20].mxu0  ;;  %v2843_v24 = vpop.f32.mrb[21].mxu1 }
 0x24f   : > { %v6283_v7 = vpack.c.bf16 %v5280_v20, %v5279_v9  ;;  %v7014_v25 = vadd.f32 %v6968_v54, %v6776_v21  ;;  %v5079_v26 = vpop.f32.mrb[21].mxu0  ;;  %v6777_v27 = vpop.f32.mrb[22].mxu1 }
 0x250   : > { %v6278_v28 = vpack.c.bf16 %v5278_v23, %v5277_v22  ;;  %v7015_v29 = vadd.f32 %v5079_v26, %v2843_v24  ;;  %v6969_v30 = vpop.f32.mrb[22].mxu0  ;;  %v2846_v31 = vpop.f32.mrb[23].mxu1 }
 0x251   : > { %6323 = vst [vmem:[%s7720_s23 + $0x48] sm:$0xff] %v6283_v7   ;;  %v5251_v32 = vadd.f32 %v7014_v25, %v8232_v55  ;;  %v7016_v33 = vadd.f32 %v6969_v30, %v6777_v27  ;;  %v5082_v34 = vpop.f32.mrb[23].mxu0 }
 0x252   : > { %6322 = vst [vmem:[%s7720_s23 + $0x40] sm:$0xff] %v6278_v28   ;;  %v5249_v35 = vadd.f32 %v7015_v29, %v8232_v55  ;;  %v7017_v36 = vadd.f32 %v5082_v34, %v2846_v31 }
 0x253   : > { %v5252_v37 = vadd.f32 %v7016_v33, %v8232_v55  ;;  %v5283_v39 = vmax.f32 %v5251_v32, 0.0 }
 0x254   : > { %v5250_v38 = vadd.f32 %v7017_v36, %v8232_v55  ;;  %v5281_v42 = vmax.f32 %v5249_v35, 0.0 }
 0x255   : > { %v5284_v40 = vmax.f32 %v5252_v37, 0.0  ;;  %v6780_v41 = vpop.f32.mrb[24].mxu1 }
 0x256   : > { %v5282_v43 = vmax.f32 %v5250_v38, 0.0  ;;  %v6972_v44 = vpop.f32.mrb[24].mxu0  ;;  %v2859_v45 = vpop.f32.mrb[25].mxu1 }
 0x257   : > { %v6293_v8 = vpack.c.bf16 %v5284_v40, %v5283_v39  ;;  %v7018_v46 = vadd.f32 %v6972_v44, %v6780_v41  ;;  %v5095_v47 = vpop.f32.mrb[25].mxu0  ;;  %v6781_v48 = vpop.f32.mrb[26].mxu1 }
 0x258   : > { %v6288_v53 = vpack.c.bf16 %v5282_v43, %v5281_v42  ;;  %v7019_v49 = vadd.f32 %v5095_v47, %v2859_v45  ;;  %v6973_v57 = vpop.f32.mrb[26].mxu0  ;;  %v2862_v58 = vpop.f32.mrb[27].mxu1 }
 0x259   : > { %6325 = vst [vmem:[%s7720_s23 + $0x58] sm:$0xff] %v6293_v8   ;;  %v5255_v60 = vadd.f32 %v7018_v46, %v8232_v55  ;;  %v7020_v62 = vadd.f32 %v6973_v57, %v6781_v48  ;;  %v5098_v63 = vpop.f32.mrb[27].mxu0 }
 0x25a   : > { %6324 = vst [vmem:[%s7720_s23 + $0x50] sm:$0xff] %v6288_v53   ;;  %v5253_v50 = vadd.f32 %v7019_v49, %v8232_v55  ;;  %v7021_v0 = vadd.f32 %v5098_v63, %v2862_v58 }
 0x25b   : > { %v5256_v2 = vadd.f32 %v7020_v62, %v8232_v55  ;;  %v5287_v3 = vmax.f32 %v5255_v60, 0.0 }
 0x25c   : > { %v5254_v52 = vadd.f32 %v7021_v0, %v8232_v55  ;;  %v5285_v5 = vmax.f32 %v5253_v50, 0.0 }
 0x25d   : > { %v5288_v1 = vmax.f32 %v5256_v2, 0.0  ;;  %v6784_v4 = vpop.f32.mrb[28].mxu1 }
 0x25e   : > { %v5286_v61 = vmax.f32 %v5254_v52, 0.0  ;;  %v6976_v6 = vpop.f32.mrb[28].mxu0  ;;  %v2875_v11 = vpop.f32.mrb[29].mxu1 }
 0x25f   : > { %v6303_v56 = vpack.c.bf16 %v5288_v1, %v5287_v3  ;;  %v7022_v12 = vadd.f32 %v6976_v6, %v6784_v4  ;;  %v5111_v13 = vpop.f32.mrb[29].mxu0  ;;  %v6785_v51 = vpop.f32.mrb[30].mxu1 }
 0x260   : > { %v6298_v14 = vpack.c.bf16 %v5286_v61, %v5285_v5  ;;  %v7023_v59 = vadd.f32 %v5111_v13, %v2875_v11  ;;  %v6977_v15 = vpop.f32.mrb[30].mxu0  ;;  %v2878_v10 = vpop.f32.mrb[31].mxu1 }
 0x261   : > { %6327 = vst [vmem:[%s7720_s23 + $0x68] sm:$0xff] %v6303_v56   ;;  %v5259_v16 = vadd.f32 %v7022_v12, %v8232_v55  ;;  %v7024_v17 = vadd.f32 %v6977_v15, %v6785_v51  ;;  %v5114_v18 = vpop.f32.mrb[31].mxu0 }
 0x262   : > { %6326 = vst [vmem:[%s7720_s23 + $0x60] sm:$0xff] %v6298_v14   ;;  %v5257_v19 = vadd.f32 %v7023_v59, %v8232_v55  ;;  %v7025_v9 = vadd.f32 %v5114_v18, %v2878_v10 }
 0x263   : > { %v5260_v20 = vadd.f32 %v7024_v17, %v8232_v55  ;;  %v5291_v22 = vmax.f32 %v5259_v16, 0.0 }
 0x264   : > { %v5258_v21 = vadd.f32 %v7025_v9, %v8232_v55  ;;  %v5289_v54 = vmax.f32 %v5257_v19, 0.0 }
 0x265   : > { %v5292_v23 = vmax.f32 %v5260_v20, 0.0 }
 0x266   : > { %v5290_v24 = vmax.f32 %v5258_v21, 0.0 }
 0x267   : > { %v6313_v7 = vpack.c.bf16 %v5292_v23, %v5291_v22 }
 0x268   : > { %v6308_v25 = vpack.c.bf16 %v5290_v24, %v5289_v54 }
 0x269   : > { %6329 = vst [vmem:[%s7720_s23 + $0x78] sm:$0xff] %v6313_v7  }
 0x26a   : > { %6328 = vst [vmem:[%s7720_s23 + $0x70] sm:$0xff] %v6308_v25  }
 0x26b   : > { %7514 = shalt.err (!%p7511_p1)
}
 0x26c   : > { %s7515_s28 = scalar_lea.hbm %s8289_s26, 2048  ;;  %s7519_s19 = scalar_lea.hbm %s8346_s3, 4096 }
 0x26d   : > { %p7516_p3 = scmp.ne.s32.totalorder %s8289_s26, %s7515_s28  ;;  %p7520_p7 = scmp.lt.u32.totalorder %s8289_s26, %s8346_s3 }
 0x26e   : > { %p7521_p9 = scmp.lt.u32.totalorder %s7519_s19, %s7515_s28  ;;  %p7523_p0 = scmp.lt.u32.totalorder %s7515_s28, %s8289_s26 }
 0x26f   : > { %p7517_p5 = pnand %p7516_p3, %p8362_p2 }
 0x270   : > { %p7522_p12 = por %p7521_p9, %p7520_p7 }
 0x271   : > { %p7518_p6 = pneg %p7517_p5 }
 0x272   : > { %p7524_p4 = por %p7523_p0, %p7522_p12 }
 0x274   : > { %p7525_p8 = pnand %p7524_p4, %p7518_p6 }
 0x276   : > { %7528 = shalt.err (!%p7525_p8)
}
 0x277   : > { %s7592_s4 = smov 64   ;;  %s7593_s30 = smov 4  }
 0x278   : > { %7254 = dma.vmem_to_hbm [thread:$0]  (%p8362_p2), %s8291_s6, 2048, %s8289_s26, %s8297_s15, %s7592_s4, %s7592_s4, %s7593_s30  }
 0x279 PF: > { %p7266_p10 = scmp.ge.s32.totalorder %s7585_s17, 2  ;;  %s5485_s5 = sand.u32 1, %s7565_s12  }
 0x27a   : > { %p8363_p11 = scmp.ne.s32.totalorder %s8352_s24, 0  ;;  %s5486_s29 = scalar_lea.sflag [#allocation7], %s5485_s5 }
 0x27c   : > { %p7261_p13 = pnand %p7266_p10, %p8363_p11 }
 0x27e   : > { %7560 = dma.done.wait (!%p7261_p13), %s5486_s29, 2048  }
 0x27f   : > { %7562 = vsyncadd (!%p7261_p13), %s5486_s29, 4294965248  ;;  %s17_s17 = sadd.s32 1, %s7585_s17   ;;  %s8364_s12 = smov %s7569_s13 }
 0x280   : > { %p14_p1 = scmp.ge.s32.totalorder %s17_s17, 4   ;;  %s8365_s13 = smov %s7573_s14 }
 0x281   : > { %s8366_s14 = smov %s7667_s25  ;;  %s8367_s15 = smov %s7581_s16 }
 0x282   : > { %s8368_s16 = smov %s8370_s20  ;;  %16 = sbr.rel (!%p14_p1) target bundleno = 5 (0x5), region = 100 }
 0x289   :  { %5491 = vsyncpa [#allocation6], 1 }
 0x28a   :  { %5493 = vsyncpa [#allocation6 + $0x1], 1 }
 0x28b   :  { %5494 = vsyncpa [#allocation7], 1 }
 0x28c   :  { %5496 = vsyncpa [#allocation7 + $0x1], 1 }
 0x28d   :  { %5497 = vsyncmov [#allocation3] }
 0x290   :  { %s5498_s22 = vpop.sfrf %5497 }
 0x291   :  { %p6199_p2 = scmp.ne.s32.totalorder %s5498_s22, 0 }
 0x293   :  { %5502 = shalt.err (%p6199_p2)  }
 0x294   :  { %5504 = vsyncmov [#allocation3 + $0x1] }
 0x297   :  { %s5505_s24 = vpop.sfrf %5504 }
 0x298   :  { %p6200_p3 = scmp.ne.s32.totalorder %s5505_s24, 0 }
 0x29a   :  { %5509 = shalt.err (%p6200_p3)  }

</bundles_post_ra>
